<compile_context>
chip_gen: v6e
topology: v6e:2x2x1
jax: 0.10.0
libtpu: 0.0.40
codegen_flags: <defaults>
</compile_context>

<pallas_src>
import functools
import math

import jax
import jax.numpy as jnp
from jax.experimental import pallas as pl
from jax.experimental.pallas import tpu as pltpu


# ----------------------- in-kernel numeric helpers -------------------------

def _layernorm(x, g, b, eps=1e-5):
    # single-pass stats: mean and mean(x^2) are independent reductions
    mu = jnp.mean(x, axis=-1, keepdims=True)
    m2 = jnp.mean(x * x, axis=-1, keepdims=True)
    var = m2 - mu * mu
    return (x - mu) * jax.lax.rsqrt(var + eps) * g + b


def _softmax_last(x):
    m = jnp.max(x, axis=-1, keepdims=True)
    e = jnp.exp(x - m)
    return e * pl.reciprocal(jnp.sum(e, axis=-1, keepdims=True), approx=True)


def _gelu(x):
    c = math.sqrt(2.0 / math.pi)
    return 0.5 * x * (1.0 + jnp.tanh(c * (x + 0.044715 * x * x * x)))


def _mm(x, w):
    """bf16-operand matmul with f32 accumulation (weights pre-cast to bf16)."""
    return jnp.dot(x.astype(jnp.bfloat16), w, preferred_element_type=jnp.float32)


def _embed(ids, table_ref):
    """Row gather as ONE one-hot MXU matmul (tables are tiny and VMEM-resident).

    # TODO(synk): for a real ~30k-row PLM vocab keep the table in HBM
    # (BlockSpec(memory_space=pl.ANY)) and DMA rows into a VMEM scratch instead.
    """
    n = ids.shape[0]
    v = table_ref.shape[0]
    iota = jax.lax.broadcasted_iota(jnp.int32, (n, v), 1)
    onehot = (ids == iota).astype(jnp.bfloat16)          # (n, v)
    return jnp.dot(onehot, table_ref[...], preferred_element_type=jnp.float32)


def _mha(qkv2d, wo, bo, *, batch, seq, heads, dim):
    """Fused multi-head self attention.

    qkv2d: (batch*seq, 3*dim) f32, rows ordered (batch, seq).  Attention runs
    over `seq` independently per `batch` row.  Heads are gathered onto ONE
    leading batch axis so the score/context matmuls and the softmax are a
    single batched 3-D einsum / reduction each (no per-head loops).
    The 1/sqrt(hd) scale is pre-folded into the Q projection weights.
    """
    hd = dim // heads
    q3 = qkv2d[:, 0 * dim:1 * dim].reshape(batch, seq, dim)
    k3 = qkv2d[:, 1 * dim:2 * dim].reshape(batch, seq, dim)
    v3 = qkv2d[:, 2 * dim:3 * dim].reshape(batch, seq, dim)

    def heads_to_batch(x3):
        parts = [x3[..., h * hd:(h + 1) * hd] for h in range(heads)]
        return jnp.concatenate(parts, axis=0).astype(jnp.bfloat16)  # (H*batch, seq, hd)

    qh, kh, vh = heads_to_batch(q3), heads_to_batch(k3), heads_to_batch(v3)
    s = jnp.einsum('nqd,nkd->nqk', qh, kh, preferred_element_type=jnp.float32)
    p = _softmax_last(s).astype(jnp.bfloat16)
    ctx = jnp.einsum('nqk,nkd->nqd', p, vh, preferred_element_type=jnp.float32)
    # merge heads back onto the lane axis, then one full-D output projection
    ctx2d = jnp.concatenate(
        [ctx[h * batch:(h + 1) * batch] for h in range(heads)],
        axis=-1).reshape(batch * seq, dim)
    return _mm(ctx2d, wo) + bo


# ------------------------------ fused kernel --------------------------------

def _news_encoder_kernel(B, T, E, text_heads, ent_heads,
                         # token / entity id columns (VMEM int32)
                         tok_ids_ref, ent_ids_ref,
                         # stand-in PLM text encoder params
                         wemb_ref, pemb_ref, ln0g_ref, ln0b_ref,
                         t_wqkv_ref, t_bqkv_ref, t_wo_ref, t_bo_ref,
                         ln1g_ref, ln1b_ref,
                         t_w1_ref, t_b1_ref, t_w2_ref, t_b2_ref,
                         ln2g_ref, ln2b_ref,
                         # entity encoder params
                         eemb_ref,
                         e_wqkv_ref, e_bqkv_ref, e_wo_ref, e_bo_ref,
                         a_w_ref, a_b_ref, a_q_ref,
                         # fusion Linear (output columns zero-padded to 128)
                         l_wt_ref, l_we_ref, l_b_ref,
                         out_ref):
    Dt = pemb_ref.shape[1]
    De = e_wo_ref.shape[1]

    # ---------------- text encoder (stand-in PLM) ----------------
    x = _embed(tok_ids_ref[...], wemb_ref)                     # (B*T, Dt) f32
    x = (x.reshape(B, T, Dt) + pemb_ref[...][None, :, :]).reshape(B * T, Dt)
    x = _layernorm(x, ln0g_ref[...], ln0b_ref[...])

    qkv = _mm(x, t_wqkv_ref[...]) + t_bqkv_ref[...]            # fused QKV projection
    attn = _mha(qkv, t_wo_ref[...], t_bo_ref[...],
                batch=B, seq=T, heads=text_heads, dim=Dt)
    x = _layernorm(x + attn, ln1g_ref[...], ln1b_ref[...])

    h1 = _gelu(_mm(x, t_w1_ref[...]) + t_b1_ref[...])
    h2 = _mm(h1, t_w2_ref[...]) + t_b2_ref[...]
    x = _layernorm(x + h2, ln2g_ref[...], ln2b_ref[...])
    text_vec = x.reshape(B, T, Dt)[:, 0, :]                    # CLS vector (B, Dt)
    # dropout: eval-mode identity

    # ---------------- entity encoder ----------------
    xe = _embed(ent_ids_ref[...], eemb_ref)                    # (B*E, De), rows (b,e)
    # dropout: eval-mode identity
    qkv_e = _mm(xe, e_wqkv_ref[...]) + e_bqkv_ref[...]         # (B*E, 3*De)
    # torch nn.MultiheadAttention default batch_first=False: for the (B, E, De)
    # input, dim 0 (B) is the attention axis and dim 1 (E) is the batch axis.
    # One full-tensor leading-axis swap instead of per-head swaps.
    qkv_e = jnp.swapaxes(qkv_e.reshape(B, E, 3 * De), 0, 1).reshape(E * B, 3 * De)
    attn_e = _mha(qkv_e, e_wo_ref[...], e_bo_ref[...],
                  batch=E, seq=B, heads=ent_heads, dim=De)     # (E*B, De), rows (e,b)
    attn_e = jnp.swapaxes(attn_e.reshape(E, B, De), 0, 1)      # (B, E, De)
    # dropout: eval-mode identity

    # additive attention pooling over the entity axis
    proj = jnp.tanh(_mm(attn_e.reshape(B * E, De), a_w_ref[...]) + a_b_ref[...])
    Q = proj.shape[-1]
    scores = jnp.sum(proj.reshape(B, E, Q) * a_q_ref[...][None, :, :], axis=-1)
    alpha = _softmax_last(scores)                              # (B, E)
    ent_vec = jnp.sum(alpha[:, :, None] * attn_e, axis=1)      # (B, De)

    # ---------------- fusion Linear(concat([text, entity])) ----------------
    # == text_vec @ W[:Dt] + ent_vec @ W[Dt:] + b, accumulated in f32
    out_ref[...] = (_mm(text_vec, l_wt_ref[...])
                    + _mm(ent_vec, l_we_ref[...])
                    + l_b_ref[...])


# --------------------- one-time parameter preparation ------------------------

_OUT_PAD = 128   # lane-dense output slab width


def prepare_params(p, *, text_heads, ent_heads):
    """Hoisted out of the hot path: bf16 casts, fused QKV weights with the
    1/sqrt(hd) scale folded into Q, lane-padded fusion Linear weights."""
    bf16 = lambda a: a.astype(jnp.bfloat16)
    pad = lambda w: jnp.pad(w, ((0, 0), (0, _OUT_PAD - w.shape[1])))
    text_dim = p['word_emb'].shape[1]
    ent_dim = p['ent_emb'].shape[1]
    ts = 1.0 / math.sqrt(text_dim // text_heads)
    es = 1.0 / math.sqrt(ent_dim // ent_heads)

    q = {}
    q['word_emb'] = bf16(p['word_emb'])
    q['pos_emb'] = p['pos_emb']
    q['ln0g'], q['ln0b'] = p['ln0g'], p['ln0b']
    q['t_wqkv'] = bf16(jnp.concatenate([p['t_wq'] * ts, p['t_wk'], p['t_wv']], 1))
    q['t_bqkv'] = jnp.concatenate([p['t_bq'] * ts, p['t_bk'], p['t_bv']], 1)
    q['t_wo'], q['t_bo'] = bf16(p['t_wo']), p['t_bo']
    q['ln1g'], q['ln1b'] = p['ln1g'], p['ln1b']
    q['t_w1'], q['t_b1'] = bf16(p['t_w1']), p['t_b1']
    q['t_w2'], q['t_b2'] = bf16(p['t_w2']), p['t_b2']
    q['ln2g'], q['ln2b'] = p['ln2g'], p['ln2b']
    q['ent_emb'] = bf16(p['ent_emb'])
    q['e_wqkv'] = bf16(jnp.concatenate([p['e_wq'] * es, p['e_wk'], p['e_wv']], 1))
    q['e_bqkv'] = jnp.concatenate([p['e_bq'] * es, p['e_bk'], p['e_bv']], 1)
    q['e_wo'], q['e_bo'] = bf16(p['e_wo']), p['e_bo']
    q['a_w'], q['a_b'], q['a_q'] = bf16(p['a_w']), p['a_b'], p['a_q']
    q['l_wt'] = bf16(pad(p['l_wt']))
    q['l_we'] = bf16(pad(p['l_we']))
    q['l_b'] = pad(p['l_b'])
    return q


# ------------------------------ wrapper --------------------------------------

def manner_news_encoder(tok_ids, ent_ids, q, *, text_heads, ent_heads):
    B, T = tok_ids.shape
    _, E = ent_ids.shape
    text_dim = q['pos_emb'].shape[1]

    tensor_args = [
        tok_ids.reshape(B * T, 1).astype(jnp.int32),
        ent_ids.reshape(B * E, 1).astype(jnp.int32),
        q['word_emb'], q['pos_emb'], q['ln0g'], q['ln0b'],
        q['t_wqkv'], q['t_bqkv'], q['t_wo'], q['t_bo'],
        q['ln1g'], q['ln1b'],
        q['t_w1'], q['t_b1'], q['t_w2'], q['t_b2'],
        q['ln2g'], q['ln2b'],
        q['ent_emb'],
        q['e_wqkv'], q['e_bqkv'], q['e_wo'], q['e_bo'],
        q['a_w'], q['a_b'], q['a_q'],
        q['l_wt'], q['l_we'], q['l_b'],
    ]

    # TODO(synk): for real PLM sizes (hidden 768, vocab ~30k) keep the
    # embedding tables in HBM (memory_space=pl.ANY + manual row DMA) and use
    # pipeline_mode=pl.Buffered(1) on grid-invariant weight specs so they are
    # not double-buffered (v7x has only 64 MiB VMEM).
    def full_spec(a):
        nd = a.ndim
        return pl.BlockSpec(a.shape, lambda *_, nd=nd: (0,) * nd)

    kernel = functools.partial(_news_encoder_kernel, B, T, E,
                               text_heads, ent_heads)

    out = pl.pallas_call(
        kernel,
        out_shape=jax.ShapeDtypeStruct((B, _OUT_PAD), jnp.float32),
        grid_spec=pltpu.PrefetchScalarGridSpec(
            num_scalar_prefetch=0,
            grid=(1,),
            in_specs=[full_spec(a) for a in tensor_args],
            out_specs=pl.BlockSpec((B, _OUT_PAD), lambda *_: (0, 0)),
        ),
        compiler_params=pltpu.CompilerParams(
            dimension_semantics=("arbitrary",),
            vmem_limit_bytes=32 * 1024 * 1024),
    )(*tensor_args)

    return out[:, :text_dim]


# ------------------------------ parameters -----------------------------------

def init_params(key, *, vocab_text, seq_len, text_dim, vocab_ent, ent_dim,
                query_dim):
    keys = jax.random.split(key, 24)
    it = iter(keys)

    def nrm(shape, scale=0.05):
        return (scale * jax.random.normal(next(it), shape)).astype(jnp.float32)

    ones = lambda d: jnp.ones((1, d), jnp.float32)
    zeros = lambda d: jnp.zeros((1, d), jnp.float32)

    p = {}
    # stand-in PLM text encoder (single transformer layer)
    p['word_emb'] = nrm((vocab_text, text_dim))
    p['pos_emb'] = nrm((seq_len, text_dim))
    p['ln0g'], p['ln0b'] = ones(text_dim), zeros(text_dim)
    p['t_wq'], p['t_bq'] = nrm((text_dim, text_dim)), zeros(text_dim)
    p['t_wk'], p['t_bk'] = nrm((text_dim, text_dim)), zeros(text_dim)
    p['t_wv'], p['t_bv'] = nrm((text_dim, text_dim)), zeros(text_dim)
    p['t_wo'], p['t_bo'] = nrm((text_dim, text_dim)), zeros(text_dim)
    p['ln1g'], p['ln1b'] = ones(text_dim), zeros(text_dim)
    p['t_w1'], p['t_b1'] = nrm((text_dim, 4 * text_dim)), zeros(4 * text_dim)
    p['t_w2'], p['t_b2'] = nrm((4 * text_dim, text_dim)), zeros(text_dim)
    p['ln2g'], p['ln2b'] = ones(text_dim), zeros(text_dim)
    # entity encoder (synthetic "pretrained" entity embeddings; padding_idx=0
    # only affects gradients in torch, so the row is used as-is in forward)
    p['ent_emb'] = nrm((vocab_ent, ent_dim), scale=0.1)
    p['e_wq'], p['e_bq'] = nrm((ent_dim, ent_dim)), zeros(ent_dim)
    p['e_wk'], p['e_bk'] = nrm((ent_dim, ent_dim)), zeros(ent_dim)
    p['e_wv'], p['e_bv'] = nrm((ent_dim, ent_dim)), zeros(ent_dim)
    p['e_wo'], p['e_bo'] = nrm((ent_dim, ent_dim)), zeros(ent_dim)
    p['a_w'], p['a_b'] = nrm((ent_dim, query_dim)), zeros(query_dim)
    p['a_q'] = nrm((1, query_dim))
    # fusion Linear(text_dim + ent_dim -> text_dim), weight split into 2 blocks
    p['l_wt'] = nrm((text_dim, text_dim))
    p['l_we'] = nrm((ent_dim, text_dim))
    p['l_b'] = zeros(text_dim)
    return p


# ------------------------------ main -----------------------------------------

if __name__ == "__main__":
    B = 2                  # batch of news items
    T = 8                  # text token sequence length
    TEXT_DIM = 64          # PLM hidden size (text_embedding_dim)
    TEXT_HEADS = 4
    VOCAB_TEXT = 64
    E = 8                  # entities per news item
    ENT_DIM = 32           # entity_embedding_dim
    ENT_HEADS = 4          # num_attention_heads
    QUERY_DIM = 32         # query_vector_dim
    VOCAB_ENT = 32

    key = jax.random.PRNGKey(0)
    k_tok, k_ent, k_par = jax.random.split(key, 3)
    tok_ids = jax.random.randint(k_tok, (B, T), 0, VOCAB_TEXT, dtype=jnp.int32)
    ent_ids = jax.random.randint(k_ent, (B, E), 0, VOCAB_ENT, dtype=jnp.int32)

    raw_params = init_params(k_par, vocab_text=VOCAB_TEXT, seq_len=T,
                             text_dim=TEXT_DIM, vocab_ent=VOCAB_ENT,
                             ent_dim=ENT_DIM, query_dim=QUERY_DIM)
    # one-time prep (bf16 casts, QKV fusion, scale folding, lane padding)
    params = prepare_params(raw_params, text_heads=TEXT_HEADS,
                            ent_heads=ENT_HEADS)
    params = jax.block_until_ready(params)

    news_vec = manner_news_encoder(tok_ids, ent_ids, params,
                                   text_heads=TEXT_HEADS, ent_heads=ENT_HEADS)
    news_vec = jax.block_until_ready(news_vec)
    assert news_vec.shape == (B, TEXT_DIM)
    assert bool(jnp.all(jnp.isfinite(news_vec)))
    print("KERNEL_OK")
</pallas_src>

<mosaic_0001>
module attributes {stable_mosaic.version = 11 : i64} {
  func.func @_news_encoder_kernel(%arg0: i32, %arg1: memref<16x1xi32, #tpu.memory_space<vmem>>, %arg2: memref<16x1xi32, #tpu.memory_space<vmem>>, %arg3: memref<64x64xbf16, #tpu.memory_space<vmem>>, %arg4: memref<8x64xf32, #tpu.memory_space<vmem>>, %arg5: memref<1x64xf32, #tpu.memory_space<vmem>>, %arg6: memref<1x64xf32, #tpu.memory_space<vmem>>, %arg7: memref<64x192xbf16, #tpu.memory_space<vmem>>, %arg8: memref<1x192xf32, #tpu.memory_space<vmem>>, %arg9: memref<64x64xbf16, #tpu.memory_space<vmem>>, %arg10: memref<1x64xf32, #tpu.memory_space<vmem>>, %arg11: memref<1x64xf32, #tpu.memory_space<vmem>>, %arg12: memref<1x64xf32, #tpu.memory_space<vmem>>, %arg13: memref<64x256xbf16, #tpu.memory_space<vmem>>, %arg14: memref<1x256xf32, #tpu.memory_space<vmem>>, %arg15: memref<256x64xbf16, #tpu.memory_space<vmem>>, %arg16: memref<1x64xf32, #tpu.memory_space<vmem>>, %arg17: memref<1x64xf32, #tpu.memory_space<vmem>>, %arg18: memref<1x64xf32, #tpu.memory_space<vmem>>, %arg19: memref<32x32xbf16, #tpu.memory_space<vmem>>, %arg20: memref<32x96xbf16, #tpu.memory_space<vmem>>, %arg21: memref<1x96xf32, #tpu.memory_space<vmem>>, %arg22: memref<32x32xbf16, #tpu.memory_space<vmem>>, %arg23: memref<1x32xf32, #tpu.memory_space<vmem>>, %arg24: memref<32x32xbf16, #tpu.memory_space<vmem>>, %arg25: memref<1x32xf32, #tpu.memory_space<vmem>>, %arg26: memref<1x32xf32, #tpu.memory_space<vmem>>, %arg27: memref<64x128xbf16, #tpu.memory_space<vmem>>, %arg28: memref<32x128xbf16, #tpu.memory_space<vmem>>, %arg29: memref<1x128xf32, #tpu.memory_space<vmem>>, %arg30: memref<2x128xf32, #tpu.memory_space<vmem>>) attributes {dimension_semantics = [#tpu.dimension_semantics<arbitrary>], iteration_bounds = array<i64: 1>, scalar_prefetch = 0 : i64, scratch_operands = 0 : i64, tpu.core_type = #tpu.core_type<tc>, window_params = [{pipeline_mode = #tpu.pipeline_mode<synchronous>, transform_indices = @transform_0, window_bounds = array<i64: 16, 1>}, {pipeline_mode = #tpu.pipeline_mode<synchronous>, transform_indices = @transform_1, window_bounds = array<i64: 16, 1>}, {pipeline_mode = #tpu.pipeline_mode<synchronous>, transform_indices = @transform_2, window_bounds = array<i64: 64, 64>}, {pipeline_mode = #tpu.pipeline_mode<synchronous>, transform_indices = @transform_3, window_bounds = array<i64: 8, 64>}, {pipeline_mode = #tpu.pipeline_mode<synchronous>, transform_indices = @transform_4, window_bounds = array<i64: 1, 64>}, {pipeline_mode = #tpu.pipeline_mode<synchronous>, transform_indices = @transform_5, window_bounds = array<i64: 1, 64>}, {pipeline_mode = #tpu.pipeline_mode<synchronous>, transform_indices = @transform_6, window_bounds = array<i64: 64, 192>}, {pipeline_mode = #tpu.pipeline_mode<synchronous>, transform_indices = @transform_7, window_bounds = array<i64: 1, 192>}, {pipeline_mode = #tpu.pipeline_mode<synchronous>, transform_indices = @transform_8, window_bounds = array<i64: 64, 64>}, {pipeline_mode = #tpu.pipeline_mode<synchronous>, transform_indices = @transform_9, window_bounds = array<i64: 1, 64>}, {pipeline_mode = #tpu.pipeline_mode<synchronous>, transform_indices = @transform_10, window_bounds = array<i64: 1, 64>}, {pipeline_mode = #tpu.pipeline_mode<synchronous>, transform_indices = @transform_11, window_bounds = array<i64: 1, 64>}, {pipeline_mode = #tpu.pipeline_mode<synchronous>, transform_indices = @transform_12, window_bounds = array<i64: 64, 256>}, {pipeline_mode = #tpu.pipeline_mode<synchronous>, transform_indices = @transform_13, window_bounds = array<i64: 1, 256>}, {pipeline_mode = #tpu.pipeline_mode<synchronous>, transform_indices = @transform_14, window_bounds = array<i64: 256, 64>}, {pipeline_mode = #tpu.pipeline_mode<synchronous>, transform_indices = @transform_15, window_bounds = array<i64: 1, 64>}, {pipeline_mode = #tpu.pipeline_mode<synchronous>, transform_indices = @transform_16, window_bounds = array<i64: 1, 64>}, {pipeline_mode = #tpu.pipeline_mode<synchronous>, transform_indices = @transform_17, window_bounds = array<i64: 1, 64>}, {pipeline_mode = #tpu.pipeline_mode<synchronous>, transform_indices = @transform_18, window_bounds = array<i64: 32, 32>}, {pipeline_mode = #tpu.pipeline_mode<synchronous>, transform_indices = @transform_19, window_bounds = array<i64: 32, 96>}, {pipeline_mode = #tpu.pipeline_mode<synchronous>, transform_indices = @transform_20, window_bounds = array<i64: 1, 96>}, {pipeline_mode = #tpu.pipeline_mode<synchronous>, transform_indices = @transform_21, window_bounds = array<i64: 32, 32>}, {pipeline_mode = #tpu.pipeline_mode<synchronous>, transform_indices = @transform_22, window_bounds = array<i64: 1, 32>}, {pipeline_mode = #tpu.pipeline_mode<synchronous>, transform_indices = @transform_23, window_bounds = array<i64: 32, 32>}, {pipeline_mode = #tpu.pipeline_mode<synchronous>, transform_indices = @transform_24, window_bounds = array<i64: 1, 32>}, {pipeline_mode = #tpu.pipeline_mode<synchronous>, transform_indices = @transform_25, window_bounds = array<i64: 1, 32>}, {pipeline_mode = #tpu.pipeline_mode<synchronous>, transform_indices = @transform_26, window_bounds = array<i64: 64, 128>}, {pipeline_mode = #tpu.pipeline_mode<synchronous>, transform_indices = @transform_27, window_bounds = array<i64: 32, 128>}, {pipeline_mode = #tpu.pipeline_mode<synchronous>, transform_indices = @transform_28, window_bounds = array<i64: 1, 128>}, {pipeline_mode = #tpu.pipeline_mode<synchronous>, transform_indices = @transform_29, window_bounds = array<i64: 2, 128>}]} {
    %c0 = arith.constant 0 : index
    %c0_0 = arith.constant 0 : index
    %0 = vector.load %arg1[%c0, %c0_0] : memref<16x1xi32, #tpu.memory_space<vmem>>, vector<16x1xi32>
    %1 = tpu.iota {dimensions = array<i32: 1>} : vector<16x64xi32>
    %2 = vector.broadcast %0 : vector<16x1xi32> to vector<16x64xi32>
    %3 = arith.cmpi eq, %2, %1 : vector<16x64xi32>
    %4 = arith.extui %3 : vector<16x64xi1> to vector<16x64xi32>
    %5 = arith.sitofp %4 : vector<16x64xi32> to vector<16x64xf32>
    %6 = arith.truncf %5 : vector<16x64xf32> to vector<16x64xbf16>
    %c0_1 = arith.constant 0 : index
    %c0_2 = arith.constant 0 : index
    %7 = vector.load %arg3[%c0_1, %c0_2] : memref<64x64xbf16, #tpu.memory_space<vmem>>, vector<64x64xbf16>
    %cst = arith.constant dense<0.000000e+00> : vector<16x64xf32>
    %8 = tpu.matmul %6, %7, %cst {dimension_numbers = #tpu.dot_dimension_numbers<[1], [0], [0], [1], [0, 0, 1, 1], [], []>} : vector<16x64xbf16>, vector<64x64xbf16>, vector<16x64xf32> -> vector<16x64xf32>
    %9 = vector.shape_cast %8 : vector<16x64xf32> to vector<2x8x64xf32>
    %c0_3 = arith.constant 0 : index
    %c0_4 = arith.constant 0 : index
    %10 = vector.load %arg4[%c0_3, %c0_4] : memref<8x64xf32, #tpu.memory_space<vmem>>, vector<8x64xf32>
    %11 = vector.shape_cast %10 : vector<8x64xf32> to vector<1x8x64xf32>
    %12 = vector.broadcast %11 : vector<1x8x64xf32> to vector<2x8x64xf32>
    %13 = arith.addf %9, %12 : vector<2x8x64xf32>
    %14 = vector.shape_cast %13 : vector<2x8x64xf32> to vector<16x64xf32>
    %c0_5 = arith.constant 0 : index
    %c0_6 = arith.constant 0 : index
    %15 = vector.load %arg5[%c0_5, %c0_6] : memref<1x64xf32, #tpu.memory_space<vmem>>, vector<1x64xf32>
    %c0_7 = arith.constant 0 : index
    %c0_8 = arith.constant 0 : index
    %16 = vector.load %arg6[%c0_7, %c0_8] : memref<1x64xf32, #tpu.memory_space<vmem>>, vector<1x64xf32>
    %cst_9 = arith.constant dense<0.000000e+00> : vector<16xf32>
    %17 = vector.multi_reduction <add>, %14, %cst_9 [1] : vector<16x64xf32> to vector<16xf32>
    %18 = vector.shape_cast %17 : vector<16xf32> to vector<16x1xf32>
    %cst_10 = arith.constant 6.400000e+01 : f32
    %19 = vector.broadcast %cst_10 : f32 to vector<16x1xf32>
    %20 = arith.divf %18, %19 : vector<16x1xf32>
    %21 = arith.mulf %14, %14 : vector<16x64xf32>
    %cst_11 = arith.constant dense<0.000000e+00> : vector<16xf32>
    %22 = vector.multi_reduction <add>, %21, %cst_11 [1] : vector<16x64xf32> to vector<16xf32>
    %23 = vector.shape_cast %22 : vector<16xf32> to vector<16x1xf32>
    %cst_12 = arith.constant 6.400000e+01 : f32
    %24 = vector.broadcast %cst_12 : f32 to vector<16x1xf32>
    %25 = arith.divf %23, %24 : vector<16x1xf32>
    %26 = arith.mulf %20, %20 : vector<16x1xf32>
    %27 = arith.subf %25, %26 : vector<16x1xf32>
    %28 = vector.broadcast %20 : vector<16x1xf32> to vector<16x64xf32>
    %29 = arith.subf %14, %28 : vector<16x64xf32>
    %cst_13 = arith.constant 9.99999974E-6 : f32
    %30 = vector.broadcast %cst_13 : f32 to vector<16x1xf32>
    %31 = arith.addf %27, %30 : vector<16x1xf32>
    %32 = math.rsqrt %31 : vector<16x1xf32>
    %33 = vector.broadcast %32 : vector<16x1xf32> to vector<16x64xf32>
    %34 = arith.mulf %29, %33 : vector<16x64xf32>
    %35 = vector.broadcast %15 : vector<1x64xf32> to vector<16x64xf32>
    %36 = arith.mulf %34, %35 : vector<16x64xf32>
    %37 = vector.broadcast %16 : vector<1x64xf32> to vector<16x64xf32>
    %38 = arith.addf %36, %37 : vector<16x64xf32>
    %c0_14 = arith.constant 0 : index
    %c0_15 = arith.constant 0 : index
    %39 = vector.load %arg7[%c0_14, %c0_15] : memref<64x192xbf16, #tpu.memory_space<vmem>>, vector<64x192xbf16>
    %40 = arith.truncf %38 : vector<16x64xf32> to vector<16x64xbf16>
    %cst_16 = arith.constant dense<0.000000e+00> : vector<16x192xf32>
    %41 = tpu.matmul %40, %39, %cst_16 {dimension_numbers = #tpu.dot_dimension_numbers<[1], [0], [0], [1], [0, 0, 1, 1], [], []>} : vector<16x64xbf16>, vector<64x192xbf16>, vector<16x192xf32> -> vector<16x192xf32>
    %c0_17 = arith.constant 0 : index
    %c0_18 = arith.constant 0 : index
    %42 = vector.load %arg8[%c0_17, %c0_18] : memref<1x192xf32, #tpu.memory_space<vmem>>, vector<1x192xf32>
    %43 = vector.broadcast %42 : vector<1x192xf32> to vector<16x192xf32>
    %44 = arith.addf %41, %43 : vector<16x192xf32>
    %c0_19 = arith.constant 0 : index
    %c0_20 = arith.constant 0 : index
    %45 = vector.load %arg9[%c0_19, %c0_20] : memref<64x64xbf16, #tpu.memory_space<vmem>>, vector<64x64xbf16>
    %c0_21 = arith.constant 0 : index
    %c0_22 = arith.constant 0 : index
    %46 = vector.load %arg10[%c0_21, %c0_22] : memref<1x64xf32, #tpu.memory_space<vmem>>, vector<1x64xf32>
    %47 = vector.extract_strided_slice %44 {offsets = [0, 0], sizes = [16, 64], strides = [1, 1]} : vector<16x192xf32> to vector<16x64xf32>
    %48 = vector.shape_cast %47 : vector<16x64xf32> to vector<2x8x64xf32>
    %49 = vector.extract_strided_slice %44 {offsets = [0, 64], sizes = [16, 64], strides = [1, 1]} : vector<16x192xf32> to vector<16x64xf32>
    %50 = vector.shape_cast %49 : vector<16x64xf32> to vector<2x8x64xf32>
    %51 = vector.extract_strided_slice %44 {offsets = [0, 128], sizes = [16, 64], strides = [1, 1]} : vector<16x192xf32> to vector<16x64xf32>
    %52 = vector.shape_cast %51 : vector<16x64xf32> to vector<2x8x64xf32>
    %53 = vector.extract_strided_slice %48 {offsets = [0, 0, 0], sizes = [2, 8, 16], strides = [1, 1, 1]} : vector<2x8x64xf32> to vector<2x8x16xf32>
    %54 = vector.extract_strided_slice %48 {offsets = [0, 0, 16], sizes = [2, 8, 16], strides = [1, 1, 1]} : vector<2x8x64xf32> to vector<2x8x16xf32>
    %55 = vector.extract_strided_slice %48 {offsets = [0, 0, 32], sizes = [2, 8, 16], strides = [1, 1, 1]} : vector<2x8x64xf32> to vector<2x8x16xf32>
    %56 = vector.extract_strided_slice %48 {offsets = [0, 0, 48], sizes = [2, 8, 16], strides = [1, 1, 1]} : vector<2x8x64xf32> to vector<2x8x16xf32>
    %57 = tpu.concatenate %53, %54, %55, %56 in 0 : vector<2x8x16xf32>, vector<2x8x16xf32>, vector<2x8x16xf32>, vector<2x8x16xf32> -> vector<8x8x16xf32>
    %58 = arith.truncf %57 : vector<8x8x16xf32> to vector<8x8x16xbf16>
    %59 = vector.extract_strided_slice %50 {offsets = [0, 0, 0], sizes = [2, 8, 16], strides = [1, 1, 1]} : vector<2x8x64xf32> to vector<2x8x16xf32>
    %60 = vector.extract_strided_slice %50 {offsets = [0, 0, 16], sizes = [2, 8, 16], strides = [1, 1, 1]} : vector<2x8x64xf32> to vector<2x8x16xf32>
    %61 = vector.extract_strided_slice %50 {offsets = [0, 0, 32], sizes = [2, 8, 16], strides = [1, 1, 1]} : vector<2x8x64xf32> to vector<2x8x16xf32>
    %62 = vector.extract_strided_slice %50 {offsets = [0, 0, 48], sizes = [2, 8, 16], strides = [1, 1, 1]} : vector<2x8x64xf32> to vector<2x8x16xf32>
    %63 = tpu.concatenate %59, %60, %61, %62 in 0 : vector<2x8x16xf32>, vector<2x8x16xf32>, vector<2x8x16xf32>, vector<2x8x16xf32> -> vector<8x8x16xf32>
    %64 = arith.truncf %63 : vector<8x8x16xf32> to vector<8x8x16xbf16>
    %65 = vector.extract_strided_slice %52 {offsets = [0, 0, 0], sizes = [2, 8, 16], strides = [1, 1, 1]} : vector<2x8x64xf32> to vector<2x8x16xf32>
    %66 = vector.extract_strided_slice %52 {offsets = [0, 0, 16], sizes = [2, 8, 16], strides = [1, 1, 1]} : vector<2x8x64xf32> to vector<2x8x16xf32>
    %67 = vector.extract_strided_slice %52 {offsets = [0, 0, 32], sizes = [2, 8, 16], strides = [1, 1, 1]} : vector<2x8x64xf32> to vector<2x8x16xf32>
    %68 = vector.extract_strided_slice %52 {offsets = [0, 0, 48], sizes = [2, 8, 16], strides = [1, 1, 1]} : vector<2x8x64xf32> to vector<2x8x16xf32>
    %69 = tpu.concatenate %65, %66, %67, %68 in 0 : vector<2x8x16xf32>, vector<2x8x16xf32>, vector<2x8x16xf32>, vector<2x8x16xf32> -> vector<8x8x16xf32>
    %70 = arith.truncf %69 : vector<8x8x16xf32> to vector<8x8x16xbf16>
    "tpu.trace_start"() <{level = 10 : i32, message = "nqd,nkd->nqk"}> : () -> ()
    %cst_23 = arith.constant dense<0.000000e+00> : vector<8x8x8xf32>
    %71 = tpu.matmul %58, %64, %cst_23 {dimension_numbers = #tpu.dot_dimension_numbers<[2], [2], [1], [1], [0, 0, 0, 1, 1, 1], [0], [0]>} : vector<8x8x16xbf16>, vector<8x8x16xbf16>, vector<8x8x8xf32> -> vector<8x8x8xf32>
    "tpu.trace_stop"() : () -> ()
    %cst_24 = arith.constant dense<0xFF800000> : vector<8x8xf32>
    %72 = vector.multi_reduction <maximumf>, %71, %cst_24 [2] : vector<8x8x8xf32> to vector<8x8xf32>
    %73 = vector.shape_cast %72 : vector<8x8xf32> to vector<8x8x1xf32>
    %74 = vector.broadcast %73 : vector<8x8x1xf32> to vector<8x8x8xf32>
    %75 = arith.subf %71, %74 : vector<8x8x8xf32>
    %76 = math.exp %75 : vector<8x8x8xf32>
    %cst_25 = arith.constant dense<0.000000e+00> : vector<8x8xf32>
    %77 = vector.multi_reduction <add>, %76, %cst_25 [2] : vector<8x8x8xf32> to vector<8x8xf32>
    %78 = vector.shape_cast %77 : vector<8x8xf32> to vector<8x8x1xf32>
    %79 = tpu.reciprocal %78 {approx = true} : vector<8x8x1xf32> -> vector<8x8x1xf32>
    %80 = vector.broadcast %79 : vector<8x8x1xf32> to vector<8x8x8xf32>
    %81 = arith.mulf %76, %80 : vector<8x8x8xf32>
    %82 = arith.truncf %81 : vector<8x8x8xf32> to vector<8x8x8xbf16>
    "tpu.trace_start"() <{level = 10 : i32, message = "nqk,nkd->nqd"}> : () -> ()
    %cst_26 = arith.constant dense<0.000000e+00> : vector<8x8x16xf32>
    %83 = tpu.matmul %82, %70, %cst_26 {dimension_numbers = #tpu.dot_dimension_numbers<[2], [1], [1], [2], [0, 0, 0, 1, 1, 2], [0], [0]>} : vector<8x8x8xbf16>, vector<8x8x16xbf16>, vector<8x8x16xf32> -> vector<8x8x16xf32>
    "tpu.trace_stop"() : () -> ()
    %84 = vector.extract_strided_slice %83 {offsets = [0, 0, 0], sizes = [2, 8, 16], strides = [1, 1, 1]} : vector<8x8x16xf32> to vector<2x8x16xf32>
    %85 = vector.extract_strided_slice %83 {offsets = [2, 0, 0], sizes = [2, 8, 16], strides = [1, 1, 1]} : vector<8x8x16xf32> to vector<2x8x16xf32>
    %86 = vector.extract_strided_slice %83 {offsets = [4, 0, 0], sizes = [2, 8, 16], strides = [1, 1, 1]} : vector<8x8x16xf32> to vector<2x8x16xf32>
    %87 = vector.extract_strided_slice %83 {offsets = [6, 0, 0], sizes = [2, 8, 16], strides = [1, 1, 1]} : vector<8x8x16xf32> to vector<2x8x16xf32>
    %88 = tpu.concatenate %84, %85, %86, %87 in 2 : vector<2x8x16xf32>, vector<2x8x16xf32>, vector<2x8x16xf32>, vector<2x8x16xf32> -> vector<2x8x64xf32>
    %89 = vector.shape_cast %88 : vector<2x8x64xf32> to vector<16x64xf32>
    %90 = arith.truncf %89 : vector<16x64xf32> to vector<16x64xbf16>
    %cst_27 = arith.constant dense<0.000000e+00> : vector<16x64xf32>
    %91 = tpu.matmul %90, %45, %cst_27 {dimension_numbers = #tpu.dot_dimension_numbers<[1], [0], [0], [1], [0, 0, 1, 1], [], []>} : vector<16x64xbf16>, vector<64x64xbf16>, vector<16x64xf32> -> vector<16x64xf32>
    %92 = vector.broadcast %46 : vector<1x64xf32> to vector<16x64xf32>
    %93 = arith.addf %91, %92 : vector<16x64xf32>
    %94 = arith.addf %38, %93 : vector<16x64xf32>
    %c0_28 = arith.constant 0 : index
    %c0_29 = arith.constant 0 : index
    %95 = vector.load %arg11[%c0_28, %c0_29] : memref<1x64xf32, #tpu.memory_space<vmem>>, vector<1x64xf32>
    %c0_30 = arith.constant 0 : index
    %c0_31 = arith.constant 0 : index
    %96 = vector.load %arg12[%c0_30, %c0_31] : memref<1x64xf32, #tpu.memory_space<vmem>>, vector<1x64xf32>
    %cst_32 = arith.constant dense<0.000000e+00> : vector<16xf32>
    %97 = vector.multi_reduction <add>, %94, %cst_32 [1] : vector<16x64xf32> to vector<16xf32>
    %98 = vector.shape_cast %97 : vector<16xf32> to vector<16x1xf32>
    %cst_33 = arith.constant 6.400000e+01 : f32
    %99 = vector.broadcast %cst_33 : f32 to vector<16x1xf32>
    %100 = arith.divf %98, %99 : vector<16x1xf32>
    %101 = arith.mulf %94, %94 : vector<16x64xf32>
    %cst_34 = arith.constant dense<0.000000e+00> : vector<16xf32>
    %102 = vector.multi_reduction <add>, %101, %cst_34 [1] : vector<16x64xf32> to vector<16xf32>
    %103 = vector.shape_cast %102 : vector<16xf32> to vector<16x1xf32>
    %cst_35 = arith.constant 6.400000e+01 : f32
    %104 = vector.broadcast %cst_35 : f32 to vector<16x1xf32>
    %105 = arith.divf %103, %104 : vector<16x1xf32>
    %106 = arith.mulf %100, %100 : vector<16x1xf32>
    %107 = arith.subf %105, %106 : vector<16x1xf32>
    %108 = vector.broadcast %100 : vector<16x1xf32> to vector<16x64xf32>
    %109 = arith.subf %94, %108 : vector<16x64xf32>
    %cst_36 = arith.constant 9.99999974E-6 : f32
    %110 = vector.broadcast %cst_36 : f32 to vector<16x1xf32>
    %111 = arith.addf %107, %110 : vector<16x1xf32>
    %112 = math.rsqrt %111 : vector<16x1xf32>
    %113 = vector.broadcast %112 : vector<16x1xf32> to vector<16x64xf32>
    %114 = arith.mulf %109, %113 : vector<16x64xf32>
    %115 = vector.broadcast %95 : vector<1x64xf32> to vector<16x64xf32>
    %116 = arith.mulf %114, %115 : vector<16x64xf32>
    %117 = vector.broadcast %96 : vector<1x64xf32> to vector<16x64xf32>
    %118 = arith.addf %116, %117 : vector<16x64xf32>
    %c0_37 = arith.constant 0 : index
    %c0_38 = arith.constant 0 : index
    %119 = vector.load %arg13[%c0_37, %c0_38] : memref<64x256xbf16, #tpu.memory_space<vmem>>, vector<64x256xbf16>
    %120 = arith.truncf %118 : vector<16x64xf32> to vector<16x64xbf16>
    %cst_39 = arith.constant dense<0.000000e+00> : vector<16x256xf32>
    %121 = tpu.matmul %120, %119, %cst_39 {dimension_numbers = #tpu.dot_dimension_numbers<[1], [0], [0], [1], [0, 0, 1, 1], [], []>} : vector<16x64xbf16>, vector<64x256xbf16>, vector<16x256xf32> -> vector<16x256xf32>
    %c0_40 = arith.constant 0 : index
    %c0_41 = arith.constant 0 : index
    %122 = vector.load %arg14[%c0_40, %c0_41] : memref<1x256xf32, #tpu.memory_space<vmem>>, vector<1x256xf32>
    %123 = vector.broadcast %122 : vector<1x256xf32> to vector<16x256xf32>
    %124 = arith.addf %121, %123 : vector<16x256xf32>
    %cst_42 = arith.constant 5.000000e-01 : f32
    %125 = vector.broadcast %cst_42 : f32 to vector<16x256xf32>
    %126 = arith.mulf %125, %124 : vector<16x256xf32>
    %cst_43 = arith.constant 4.471500e-02 : f32
    %127 = vector.broadcast %cst_43 : f32 to vector<16x256xf32>
    %128 = arith.mulf %127, %124 : vector<16x256xf32>
    %129 = arith.mulf %128, %124 : vector<16x256xf32>
    %130 = arith.mulf %129, %124 : vector<16x256xf32>
    %131 = arith.addf %124, %130 : vector<16x256xf32>
    %cst_44 = arith.constant 0.797884583 : f32
    %132 = vector.broadcast %cst_44 : f32 to vector<16x256xf32>
    %133 = arith.mulf %132, %131 : vector<16x256xf32>
    %134 = math.tanh %133 : vector<16x256xf32>
    %cst_45 = arith.constant 1.000000e+00 : f32
    %135 = vector.broadcast %cst_45 : f32 to vector<16x256xf32>
    %136 = arith.addf %135, %134 : vector<16x256xf32>
    %137 = arith.mulf %126, %136 : vector<16x256xf32>
    %c0_46 = arith.constant 0 : index
    %c0_47 = arith.constant 0 : index
    %138 = vector.load %arg15[%c0_46, %c0_47] : memref<256x64xbf16, #tpu.memory_space<vmem>>, vector<256x64xbf16>
    %139 = arith.truncf %137 : vector<16x256xf32> to vector<16x256xbf16>
    %cst_48 = arith.constant dense<0.000000e+00> : vector<16x64xf32>
    %140 = tpu.matmul %139, %138, %cst_48 {dimension_numbers = #tpu.dot_dimension_numbers<[1], [0], [0], [1], [0, 0, 1, 1], [], []>} : vector<16x256xbf16>, vector<256x64xbf16>, vector<16x64xf32> -> vector<16x64xf32>
    %c0_49 = arith.constant 0 : index
    %c0_50 = arith.constant 0 : index
    %141 = vector.load %arg16[%c0_49, %c0_50] : memref<1x64xf32, #tpu.memory_space<vmem>>, vector<1x64xf32>
    %142 = vector.broadcast %141 : vector<1x64xf32> to vector<16x64xf32>
    %143 = arith.addf %140, %142 : vector<16x64xf32>
    %144 = arith.addf %118, %143 : vector<16x64xf32>
    %c0_51 = arith.constant 0 : index
    %c0_52 = arith.constant 0 : index
    %145 = vector.load %arg17[%c0_51, %c0_52] : memref<1x64xf32, #tpu.memory_space<vmem>>, vector<1x64xf32>
    %c0_53 = arith.constant 0 : index
    %c0_54 = arith.constant 0 : index
    %146 = vector.load %arg18[%c0_53, %c0_54] : memref<1x64xf32, #tpu.memory_space<vmem>>, vector<1x64xf32>
    %cst_55 = arith.constant dense<0.000000e+00> : vector<16xf32>
    %147 = vector.multi_reduction <add>, %144, %cst_55 [1] : vector<16x64xf32> to vector<16xf32>
    %148 = vector.shape_cast %147 : vector<16xf32> to vector<16x1xf32>
    %cst_56 = arith.constant 6.400000e+01 : f32
    %149 = vector.broadcast %cst_56 : f32 to vector<16x1xf32>
    %150 = arith.divf %148, %149 : vector<16x1xf32>
    %151 = arith.mulf %144, %144 : vector<16x64xf32>
    %cst_57 = arith.constant dense<0.000000e+00> : vector<16xf32>
    %152 = vector.multi_reduction <add>, %151, %cst_57 [1] : vector<16x64xf32> to vector<16xf32>
    %153 = vector.shape_cast %152 : vector<16xf32> to vector<16x1xf32>
    %cst_58 = arith.constant 6.400000e+01 : f32
    %154 = vector.broadcast %cst_58 : f32 to vector<16x1xf32>
    %155 = arith.divf %153, %154 : vector<16x1xf32>
    %156 = arith.mulf %150, %150 : vector<16x1xf32>
    %157 = arith.subf %155, %156 : vector<16x1xf32>
    %158 = vector.broadcast %150 : vector<16x1xf32> to vector<16x64xf32>
    %159 = arith.subf %144, %158 : vector<16x64xf32>
    %cst_59 = arith.constant 9.99999974E-6 : f32
    %160 = vector.broadcast %cst_59 : f32 to vector<16x1xf32>
    %161 = arith.addf %157, %160 : vector<16x1xf32>
    %162 = math.rsqrt %161 : vector<16x1xf32>
    %163 = vector.broadcast %162 : vector<16x1xf32> to vector<16x64xf32>
    %164 = arith.mulf %159, %163 : vector<16x64xf32>
    %165 = vector.broadcast %145 : vector<1x64xf32> to vector<16x64xf32>
    %166 = arith.mulf %164, %165 : vector<16x64xf32>
    %167 = vector.broadcast %146 : vector<1x64xf32> to vector<16x64xf32>
    %168 = arith.addf %166, %167 : vector<16x64xf32>
    %169 = vector.shape_cast %168 : vector<16x64xf32> to vector<2x8x64xf32>
    %170 = vector.extract_strided_slice %169 {offsets = [0, 0, 0], sizes = [2, 1, 64], strides = [1, 1, 1]} : vector<2x8x64xf32> to vector<2x1x64xf32>
    %171 = vector.shape_cast %170 : vector<2x1x64xf32> to vector<2x64xf32>
    %c0_60 = arith.constant 0 : index
    %c0_61 = arith.constant 0 : index
    %172 = vector.load %arg2[%c0_60, %c0_61] : memref<16x1xi32, #tpu.memory_space<vmem>>, vector<16x1xi32>
    %173 = tpu.iota {dimensions = array<i32: 1>} : vector<16x32xi32>
    %174 = vector.broadcast %172 : vector<16x1xi32> to vector<16x32xi32>
    %175 = arith.cmpi eq, %174, %173 : vector<16x32xi32>
    %176 = arith.extui %175 : vector<16x32xi1> to vector<16x32xi32>
    %177 = arith.sitofp %176 : vector<16x32xi32> to vector<16x32xf32>
    %178 = arith.truncf %177 : vector<16x32xf32> to vector<16x32xbf16>
    %c0_62 = arith.constant 0 : index
    %c0_63 = arith.constant 0 : index
    %179 = vector.load %arg19[%c0_62, %c0_63] : memref<32x32xbf16, #tpu.memory_space<vmem>>, vector<32x32xbf16>
    %cst_64 = arith.constant dense<0.000000e+00> : vector<16x32xf32>
    %180 = tpu.matmul %178, %179, %cst_64 {dimension_numbers = #tpu.dot_dimension_numbers<[1], [0], [0], [1], [0, 0, 1, 1], [], []>} : vector<16x32xbf16>, vector<32x32xbf16>, vector<16x32xf32> -> vector<16x32xf32>
    %c0_65 = arith.constant 0 : index
    %c0_66 = arith.constant 0 : index
    %181 = vector.load %arg20[%c0_65, %c0_66] : memref<32x96xbf16, #tpu.memory_space<vmem>>, vector<32x96xbf16>
    %182 = arith.truncf %180 : vector<16x32xf32> to vector<16x32xbf16>
    %cst_67 = arith.constant dense<0.000000e+00> : vector<16x96xf32>
    %183 = tpu.matmul %182, %181, %cst_67 {dimension_numbers = #tpu.dot_dimension_numbers<[1], [0], [0], [1], [0, 0, 1, 1], [], []>} : vector<16x32xbf16>, vector<32x96xbf16>, vector<16x96xf32> -> vector<16x96xf32>
    %c0_68 = arith.constant 0 : index
    %c0_69 = arith.constant 0 : index
    %184 = vector.load %arg21[%c0_68, %c0_69] : memref<1x96xf32, #tpu.memory_space<vmem>>, vector<1x96xf32>
    %185 = vector.broadcast %184 : vector<1x96xf32> to vector<16x96xf32>
    %186 = arith.addf %183, %185 : vector<16x96xf32>
    %187 = vector.shape_cast %186 : vector<16x96xf32> to vector<2x8x96xf32>
    %188 = tpu.transpose %187, [1, 0, 2] : vector<2x8x96xf32> -> vector<8x2x96xf32>
    %189 = vector.shape_cast %188 : vector<8x2x96xf32> to vector<16x96xf32>
    %c0_70 = arith.constant 0 : index
    %c0_71 = arith.constant 0 : index
    %190 = vector.load %arg22[%c0_70, %c0_71] : memref<32x32xbf16, #tpu.memory_space<vmem>>, vector<32x32xbf16>
    %c0_72 = arith.constant 0 : index
    %c0_73 = arith.constant 0 : index
    %191 = vector.load %arg23[%c0_72, %c0_73] : memref<1x32xf32, #tpu.memory_space<vmem>>, vector<1x32xf32>
    %192 = vector.extract_strided_slice %189 {offsets = [0, 0], sizes = [16, 32], strides = [1, 1]} : vector<16x96xf32> to vector<16x32xf32>
    %193 = vector.shape_cast %192 : vector<16x32xf32> to vector<8x2x32xf32>
    %194 = vector.extract_strided_slice %189 {offsets = [0, 32], sizes = [16, 32], strides = [1, 1]} : vector<16x96xf32> to vector<16x32xf32>
    %195 = vector.shape_cast %194 : vector<16x32xf32> to vector<8x2x32xf32>
    %196 = vector.extract_strided_slice %189 {offsets = [0, 64], sizes = [16, 32], strides = [1, 1]} : vector<16x96xf32> to vector<16x32xf32>
    %197 = vector.shape_cast %196 : vector<16x32xf32> to vector<8x2x32xf32>
    %198 = vector.extract_strided_slice %193 {offsets = [0, 0, 0], sizes = [8, 2, 8], strides = [1, 1, 1]} : vector<8x2x32xf32> to vector<8x2x8xf32>
    %199 = vector.extract_strided_slice %193 {offsets = [0, 0, 8], sizes = [8, 2, 8], strides = [1, 1, 1]} : vector<8x2x32xf32> to vector<8x2x8xf32>
    %200 = vector.extract_strided_slice %193 {offsets = [0, 0, 16], sizes = [8, 2, 8], strides = [1, 1, 1]} : vector<8x2x32xf32> to vector<8x2x8xf32>
    %201 = vector.extract_strided_slice %193 {offsets = [0, 0, 24], sizes = [8, 2, 8], strides = [1, 1, 1]} : vector<8x2x32xf32> to vector<8x2x8xf32>
    %202 = tpu.concatenate %198, %199, %200, %201 in 0 : vector<8x2x8xf32>, vector<8x2x8xf32>, vector<8x2x8xf32>, vector<8x2x8xf32> -> vector<32x2x8xf32>
    %203 = arith.truncf %202 : vector<32x2x8xf32> to vector<32x2x8xbf16>
    %204 = vector.extract_strided_slice %195 {offsets = [0, 0, 0], sizes = [8, 2, 8], strides = [1, 1, 1]} : vector<8x2x32xf32> to vector<8x2x8xf32>
    %205 = vector.extract_strided_slice %195 {offsets = [0, 0, 8], sizes = [8, 2, 8], strides = [1, 1, 1]} : vector<8x2x32xf32> to vector<8x2x8xf32>
    %206 = vector.extract_strided_slice %195 {offsets = [0, 0, 16], sizes = [8, 2, 8], strides = [1, 1, 1]} : vector<8x2x32xf32> to vector<8x2x8xf32>
    %207 = vector.extract_strided_slice %195 {offsets = [0, 0, 24], sizes = [8, 2, 8], strides = [1, 1, 1]} : vector<8x2x32xf32> to vector<8x2x8xf32>
    %208 = tpu.concatenate %204, %205, %206, %207 in 0 : vector<8x2x8xf32>, vector<8x2x8xf32>, vector<8x2x8xf32>, vector<8x2x8xf32> -> vector<32x2x8xf32>
    %209 = arith.truncf %208 : vector<32x2x8xf32> to vector<32x2x8xbf16>
    %210 = vector.extract_strided_slice %197 {offsets = [0, 0, 0], sizes = [8, 2, 8], strides = [1, 1, 1]} : vector<8x2x32xf32> to vector<8x2x8xf32>
    %211 = vector.extract_strided_slice %197 {offsets = [0, 0, 8], sizes = [8, 2, 8], strides = [1, 1, 1]} : vector<8x2x32xf32> to vector<8x2x8xf32>
    %212 = vector.extract_strided_slice %197 {offsets = [0, 0, 16], sizes = [8, 2, 8], strides = [1, 1, 1]} : vector<8x2x32xf32> to vector<8x2x8xf32>
    %213 = vector.extract_strided_slice %197 {offsets = [0, 0, 24], sizes = [8, 2, 8], strides = [1, 1, 1]} : vector<8x2x32xf32> to vector<8x2x8xf32>
    %214 = tpu.concatenate %210, %211, %212, %213 in 0 : vector<8x2x8xf32>, vector<8x2x8xf32>, vector<8x2x8xf32>, vector<8x2x8xf32> -> vector<32x2x8xf32>
    %215 = arith.truncf %214 : vector<32x2x8xf32> to vector<32x2x8xbf16>
    "tpu.trace_start"() <{level = 10 : i32, message = "nqd,nkd->nqk"}> : () -> ()
    %cst_74 = arith.constant dense<0.000000e+00> : vector<32x2x2xf32>
    %216 = tpu.matmul %203, %209, %cst_74 {dimension_numbers = #tpu.dot_dimension_numbers<[2], [2], [1], [1], [0, 0, 0, 1, 1, 1], [0], [0]>} : vector<32x2x8xbf16>, vector<32x2x8xbf16>, vector<32x2x2xf32> -> vector<32x2x2xf32>
    "tpu.trace_stop"() : () -> ()
    %cst_75 = arith.constant dense<0xFF800000> : vector<32x2xf32>
    %217 = vector.multi_reduction <maximumf>, %216, %cst_75 [2] : vector<32x2x2xf32> to vector<32x2xf32>
    %218 = vector.shape_cast %217 : vector<32x2xf32> to vector<32x2x1xf32>
    %219 = vector.broadcast %218 : vector<32x2x1xf32> to vector<32x2x2xf32>
    %220 = arith.subf %216, %219 : vector<32x2x2xf32>
    %221 = math.exp %220 : vector<32x2x2xf32>
    %cst_76 = arith.constant dense<0.000000e+00> : vector<32x2xf32>
    %222 = vector.multi_reduction <add>, %221, %cst_76 [2] : vector<32x2x2xf32> to vector<32x2xf32>
    %223 = vector.shape_cast %222 : vector<32x2xf32> to vector<32x2x1xf32>
    %224 = tpu.reciprocal %223 {approx = true} : vector<32x2x1xf32> -> vector<32x2x1xf32>
    %225 = vector.broadcast %224 : vector<32x2x1xf32> to vector<32x2x2xf32>
    %226 = arith.mulf %221, %225 : vector<32x2x2xf32>
    %227 = arith.truncf %226 : vector<32x2x2xf32> to vector<32x2x2xbf16>
    "tpu.trace_start"() <{level = 10 : i32, message = "nqk,nkd->nqd"}> : () -> ()
    %cst_77 = arith.constant dense<0.000000e+00> : vector<32x2x8xf32>
    %228 = tpu.matmul %227, %215, %cst_77 {dimension_numbers = #tpu.dot_dimension_numbers<[2], [1], [1], [2], [0, 0, 0, 1, 1, 2], [0], [0]>} : vector<32x2x2xbf16>, vector<32x2x8xbf16>, vector<32x2x8xf32> -> vector<32x2x8xf32>
    "tpu.trace_stop"() : () -> ()
    %229 = vector.extract_strided_slice %228 {offsets = [0, 0, 0], sizes = [8, 2, 8], strides = [1, 1, 1]} : vector<32x2x8xf32> to vector<8x2x8xf32>
    %230 = vector.extract_strided_slice %228 {offsets = [8, 0, 0], sizes = [8, 2, 8], strides = [1, 1, 1]} : vector<32x2x8xf32> to vector<8x2x8xf32>
    %231 = vector.extract_strided_slice %228 {offsets = [16, 0, 0], sizes = [8, 2, 8], strides = [1, 1, 1]} : vector<32x2x8xf32> to vector<8x2x8xf32>
    %232 = vector.extract_strided_slice %228 {offsets = [24, 0, 0], sizes = [8, 2, 8], strides = [1, 1, 1]} : vector<32x2x8xf32> to vector<8x2x8xf32>
    %233 = tpu.concatenate %229, %230, %231, %232 in 2 : vector<8x2x8xf32>, vector<8x2x8xf32>, vector<8x2x8xf32>, vector<8x2x8xf32> -> vector<8x2x32xf32>
    %234 = vector.shape_cast %233 : vector<8x2x32xf32> to vector<16x32xf32>
    %235 = arith.truncf %234 : vector<16x32xf32> to vector<16x32xbf16>
    %cst_78 = arith.constant dense<0.000000e+00> : vector<16x32xf32>
    %236 = tpu.matmul %235, %190, %cst_78 {dimension_numbers = #tpu.dot_dimension_numbers<[1], [0], [0], [1], [0, 0, 1, 1], [], []>} : vector<16x32xbf16>, vector<32x32xbf16>, vector<16x32xf32> -> vector<16x32xf32>
    %237 = vector.broadcast %191 : vector<1x32xf32> to vector<16x32xf32>
    %238 = arith.addf %236, %237 : vector<16x32xf32>
    %239 = vector.shape_cast %238 : vector<16x32xf32> to vector<8x2x32xf32>
    %240 = tpu.transpose %239, [1, 0, 2] : vector<8x2x32xf32> -> vector<2x8x32xf32>
    %241 = vector.shape_cast %240 : vector<2x8x32xf32> to vector<16x32xf32>
    %c0_79 = arith.constant 0 : index
    %c0_80 = arith.constant 0 : index
    %242 = vector.load %arg24[%c0_79, %c0_80] : memref<32x32xbf16, #tpu.memory_space<vmem>>, vector<32x32xbf16>
    %243 = arith.truncf %241 : vector<16x32xf32> to vector<16x32xbf16>
    %cst_81 = arith.constant dense<0.000000e+00> : vector<16x32xf32>
    %244 = tpu.matmul %243, %242, %cst_81 {dimension_numbers = #tpu.dot_dimension_numbers<[1], [0], [0], [1], [0, 0, 1, 1], [], []>} : vector<16x32xbf16>, vector<32x32xbf16>, vector<16x32xf32> -> vector<16x32xf32>
    %c0_82 = arith.constant 0 : index
    %c0_83 = arith.constant 0 : index
    %245 = vector.load %arg25[%c0_82, %c0_83] : memref<1x32xf32, #tpu.memory_space<vmem>>, vector<1x32xf32>
    %246 = vector.broadcast %245 : vector<1x32xf32> to vector<16x32xf32>
    %247 = arith.addf %244, %246 : vector<16x32xf32>
    %248 = math.tanh %247 : vector<16x32xf32>
    %249 = vector.shape_cast %248 : vector<16x32xf32> to vector<2x8x32xf32>
    %c0_84 = arith.constant 0 : index
    %c0_85 = arith.constant 0 : index
    %250 = vector.load %arg26[%c0_84, %c0_85] : memref<1x32xf32, #tpu.memory_space<vmem>>, vector<1x32xf32>
    %251 = vector.shape_cast %250 : vector<1x32xf32> to vector<1x1x32xf32>
    %252 = vector.broadcast %251 : vector<1x1x32xf32> to vector<2x8x32xf32>
    %253 = arith.mulf %249, %252 : vector<2x8x32xf32>
    %cst_86 = arith.constant dense<0.000000e+00> : vector<2x8xf32>
    %254 = vector.multi_reduction <add>, %253, %cst_86 [2] : vector<2x8x32xf32> to vector<2x8xf32>
    %cst_87 = arith.constant dense<0xFF800000> : vector<2xf32>
    %255 = vector.multi_reduction <maximumf>, %254, %cst_87 [1] : vector<2x8xf32> to vector<2xf32>
    %256 = vector.shape_cast %255 : vector<2xf32> to vector<2x1xf32>
    %257 = vector.broadcast %256 : vector<2x1xf32> to vector<2x8xf32>
    %258 = arith.subf %254, %257 : vector<2x8xf32>
    %259 = math.exp %258 : vector<2x8xf32>
    %cst_88 = arith.constant dense<0.000000e+00> : vector<2xf32>
    %260 = vector.multi_reduction <add>, %259, %cst_88 [1] : vector<2x8xf32> to vector<2xf32>
    %261 = vector.shape_cast %260 : vector<2xf32> to vector<2x1xf32>
    %262 = tpu.reciprocal %261 {approx = true} : vector<2x1xf32> -> vector<2x1xf32>
    %263 = vector.broadcast %262 : vector<2x1xf32> to vector<2x8xf32>
    %264 = arith.mulf %259, %263 : vector<2x8xf32>
    %265 = vector.shape_cast %264 : vector<2x8xf32> to vector<2x8x1xf32>
    %266 = vector.broadcast %265 : vector<2x8x1xf32> to vector<2x8x32xf32>
    %267 = arith.mulf %266, %240 : vector<2x8x32xf32>
    %cst_89 = arith.constant dense<0.000000e+00> : vector<2x32xf32>
    %268 = vector.multi_reduction <add>, %267, %cst_89 [1] : vector<2x8x32xf32> to vector<2x32xf32>
    %c0_90 = arith.constant 0 : index
    %c0_91 = arith.constant 0 : index
    %269 = vector.load %arg27[%c0_90, %c0_91] : memref<64x128xbf16, #tpu.memory_space<vmem>>, vector<64x128xbf16>
    %270 = arith.truncf %171 : vector<2x64xf32> to vector<2x64xbf16>
    %cst_92 = arith.constant dense<0.000000e+00> : vector<2x128xf32>
    %271 = tpu.matmul %270, %269, %cst_92 {dimension_numbers = #tpu.dot_dimension_numbers<[1], [0], [0], [1], [0, 0, 1, 1], [], []>} : vector<2x64xbf16>, vector<64x128xbf16>, vector<2x128xf32> -> vector<2x128xf32>
    %c0_93 = arith.constant 0 : index
    %c0_94 = arith.constant 0 : index
    %272 = vector.load %arg28[%c0_93, %c0_94] : memref<32x128xbf16, #tpu.memory_space<vmem>>, vector<32x128xbf16>
    %273 = arith.truncf %268 : vector<2x32xf32> to vector<2x32xbf16>
    %cst_95 = arith.constant dense<0.000000e+00> : vector<2x128xf32>
    %274 = tpu.matmul %273, %272, %cst_95 {dimension_numbers = #tpu.dot_dimension_numbers<[1], [0], [0], [1], [0, 0, 1, 1], [], []>} : vector<2x32xbf16>, vector<32x128xbf16>, vector<2x128xf32> -> vector<2x128xf32>
    %275 = arith.addf %271, %274 : vector<2x128xf32>
    %c0_96 = arith.constant 0 : index
    %c0_97 = arith.constant 0 : index
    %276 = vector.load %arg29[%c0_96, %c0_97] : memref<1x128xf32, #tpu.memory_space<vmem>>, vector<1x128xf32>
    %277 = vector.broadcast %276 : vector<1x128xf32> to vector<2x128xf32>
    %278 = arith.addf %275, %277 : vector<2x128xf32>
    %c0_98 = arith.constant 0 : index
    %c0_99 = arith.constant 0 : index
    %279 = vector.load %arg30[%c0_98, %c0_99] : memref<2x128xf32, #tpu.memory_space<vmem>>, vector<2x128xf32>
    tpu.vector_store %arg30[%c0_98, %c0_99], %278 {strides = array<i32>} : memref<2x128xf32, #tpu.memory_space<vmem>>, vector<2x128xf32>,
    return
  }
  func.func @transform_0(%arg0: i32) -> (i32, i32) {
    %c0_i32 = arith.constant 0 : i32
    %c0_i32_0 = arith.constant 0 : i32
    %c0_i32_1 = arith.constant 0 : i32
    return %c0_i32, %c0_i32_0 : i32, i32
  }
  func.func @transform_1(%arg0: i32) -> (i32, i32) {
    %c0_i32 = arith.constant 0 : i32
    %c0_i32_0 = arith.constant 0 : i32
    %c0_i32_1 = arith.constant 0 : i32
    return %c0_i32, %c0_i32_0 : i32, i32
  }
  func.func @transform_2(%arg0: i32) -> (i32, i32) {
    %c0_i32 = arith.constant 0 : i32
    %c0_i32_0 = arith.constant 0 : i32
    %c0_i32_1 = arith.constant 0 : i32
    return %c0_i32, %c0_i32_0 : i32, i32
  }
  func.func @transform_3(%arg0: i32) -> (i32, i32) {
    %c0_i32 = arith.constant 0 : i32
    %c0_i32_0 = arith.constant 0 : i32
    %c0_i32_1 = arith.constant 0 : i32
    return %c0_i32, %c0_i32_0 : i32, i32
  }
  func.func @transform_4(%arg0: i32) -> (i32, i32) {
    %c0_i32 = arith.constant 0 : i32
    %c0_i32_0 = arith.constant 0 : i32
    %c0_i32_1 = arith.constant 0 : i32
    return %c0_i32, %c0_i32_0 : i32, i32
  }
  func.func @transform_5(%arg0: i32) -> (i32, i32) {
    %c0_i32 = arith.constant 0 : i32
    %c0_i32_0 = arith.constant 0 : i32
    %c0_i32_1 = arith.constant 0 : i32
    return %c0_i32, %c0_i32_0 : i32, i32
  }
  func.func @transform_6(%arg0: i32) -> (i32, i32) {
    %c0_i32 = arith.constant 0 : i32
    %c0_i32_0 = arith.constant 0 : i32
    %c0_i32_1 = arith.constant 0 : i32
    return %c0_i32, %c0_i32_0 : i32, i32
  }
  func.func @transform_7(%arg0: i32) -> (i32, i32) {
    %c0_i32 = arith.constant 0 : i32
    %c0_i32_0 = arith.constant 0 : i32
    %c0_i32_1 = arith.constant 0 : i32
    return %c0_i32, %c0_i32_0 : i32, i32
  }
  func.func @transform_8(%arg0: i32) -> (i32, i32) {
    %c0_i32 = arith.constant 0 : i32
    %c0_i32_0 = arith.constant 0 : i32
    %c0_i32_1 = arith.constant 0 : i32
    return %c0_i32, %c0_i32_0 : i32, i32
  }
  func.func @transform_9(%arg0: i32) -> (i32, i32) {
    %c0_i32 = arith.constant 0 : i32
    %c0_i32_0 = arith.constant 0 : i32
    %c0_i32_1 = arith.constant 0 : i32
    return %c0_i32, %c0_i32_0 : i32, i32
  }
  func.func @transform_10(%arg0: i32) -> (i32, i32) {
    %c0_i32 = arith.constant 0 : i32
    %c0_i32_0 = arith.constant 0 : i32
    %c0_i32_1 = arith.constant 0 : i32
    return %c0_i32, %c0_i32_0 : i32, i32
  }
  func.func @transform_11(%arg0: i32) -> (i32, i32) {
    %c0_i32 = arith.constant 0 : i32
    %c0_i32_0 = arith.constant 0 : i32
    %c0_i32_1 = arith.constant 0 : i32
    return %c0_i32, %c0_i32_0 : i32, i32
  }
  func.func @transform_12(%arg0: i32) -> (i32, i32) {
    %c0_i32 = arith.constant 0 : i32
    %c0_i32_0 = arith.constant 0 : i32
    %c0_i32_1 = arith.constant 0 : i32
    return %c0_i32, %c0_i32_0 : i32, i32
  }
  func.func @transform_13(%arg0: i32) -> (i32, i32) {
    %c0_i32 = arith.constant 0 : i32
    %c0_i32_0 = arith.constant 0 : i32
    %c0_i32_1 = arith.constant 0 : i32
    return %c0_i32, %c0_i32_0 : i32, i32
  }
  func.func @transform_14(%arg0: i32) -> (i32, i32) {
    %c0_i32 = arith.constant 0 : i32
    %c0_i32_0 = arith.constant 0 : i32
    %c0_i32_1 = arith.constant 0 : i32
    return %c0_i32, %c0_i32_0 : i32, i32
  }
  func.func @transform_15(%arg0: i32) -> (i32, i32) {
    %c0_i32 = arith.constant 0 : i32
    %c0_i32_0 = arith.constant 0 : i32
    %c0_i32_1 = arith.constant 0 : i32
    return %c0_i32, %c0_i32_0 : i32, i32
  }
  func.func @transform_16(%arg0: i32) -> (i32, i32) {
    %c0_i32 = arith.constant 0 : i32
    %c0_i32_0 = arith.constant 0 : i32
    %c0_i32_1 = arith.constant 0 : i32
    return %c0_i32, %c0_i32_0 : i32, i32
  }
  func.func @transform_17(%arg0: i32) -> (i32, i32) {
    %c0_i32 = arith.constant 0 : i32
    %c0_i32_0 = arith.constant 0 : i32
    %c0_i32_1 = arith.constant 0 : i32
    return %c0_i32, %c0_i32_0 : i32, i32
  }
  func.func @transform_18(%arg0: i32) -> (i32, i32) {
    %c0_i32 = arith.constant 0 : i32
    %c0_i32_0 = arith.constant 0 : i32
    %c0_i32_1 = arith.constant 0 : i32
    return %c0_i32, %c0_i32_0 : i32, i32
  }
  func.func @transform_19(%arg0: i32) -> (i32, i32) {
    %c0_i32 = arith.constant 0 : i32
    %c0_i32_0 = arith.constant 0 : i32
    %c0_i32_1 = arith.constant 0 : i32
    return %c0_i32, %c0_i32_0 : i32, i32
  }
  func.func @transform_20(%arg0: i32) -> (i32, i32) {
    %c0_i32 = arith.constant 0 : i32
    %c0_i32_0 = arith.constant 0 : i32
    %c0_i32_1 = arith.constant 0 : i32
    return %c0_i32, %c0_i32_0 : i32, i32
  }
  func.func @transform_21(%arg0: i32) -> (i32, i32) {
    %c0_i32 = arith.constant 0 : i32
    %c0_i32_0 = arith.constant 0 : i32
    %c0_i32_1 = arith.constant 0 : i32
    return %c0_i32, %c0_i32_0 : i32, i32
  }
  func.func @transform_22(%arg0: i32) -> (i32, i32) {
    %c0_i32 = arith.constant 0 : i32
    %c0_i32_0 = arith.constant 0 : i32
    %c0_i32_1 = arith.constant 0 : i32
    return %c0_i32, %c0_i32_0 : i32, i32
  }
  func.func @transform_23(%arg0: i32) -> (i32, i32) {
    %c0_i32 = arith.constant 0 : i32
    %c0_i32_0 = arith.constant 0 : i32
    %c0_i32_1 = arith.constant 0 : i32
    return %c0_i32, %c0_i32_0 : i32, i32
  }
  func.func @transform_24(%arg0: i32) -> (i32, i32) {
    %c0_i32 = arith.constant 0 : i32
    %c0_i32_0 = arith.constant 0 : i32
    %c0_i32_1 = arith.constant 0 : i32
    return %c0_i32, %c0_i32_0 : i32, i32
  }
  func.func @transform_25(%arg0: i32) -> (i32, i32) {
    %c0_i32 = arith.constant 0 : i32
    %c0_i32_0 = arith.constant 0 : i32
    %c0_i32_1 = arith.constant 0 : i32
    return %c0_i32, %c0_i32_0 : i32, i32
  }
  func.func @transform_26(%arg0: i32) -> (i32, i32) {
    %c0_i32 = arith.constant 0 : i32
    %c0_i32_0 = arith.constant 0 : i32
    %c0_i32_1 = arith.constant 0 : i32
    return %c0_i32, %c0_i32_0 : i32, i32
  }
  func.func @transform_27(%arg0: i32) -> (i32, i32) {
    %c0_i32 = arith.constant 0 : i32
    %c0_i32_0 = arith.constant 0 : i32
    %c0_i32_1 = arith.constant 0 : i32
    return %c0_i32, %c0_i32_0 : i32, i32
  }
  func.func @transform_28(%arg0: i32) -> (i32, i32) {
    %c0_i32 = arith.constant 0 : i32
    %c0_i32_0 = arith.constant 0 : i32
    %c0_i32_1 = arith.constant 0 : i32
    return %c0_i32, %c0_i32_0 : i32, i32
  }
  func.func @transform_29(%arg0: i32) -> (i32, i32) {
    %c0_i32 = arith.constant 0 : i32
    %c0_i32_0 = arith.constant 0 : i32
    %c0_i32_1 = arith.constant 0 : i32
    return %c0_i32, %c0_i32_0 : i32, i32
  }
}

</mosaic_0001>

<bundles_post_ra>
// kernel: tpu_custom_call.1
= control target key start
LH: loop header
LB: loop body
LE: loop exit
PB: predicated region body
PF: predicated region fallthrough
CT: control target
= control target key end

     0   :  { %s8293_s6 = smov 1   ;;  %s8294_s10 = smov 2   ;;  %s9951_s0 = inlined_call_operand.smem [shape: u32[30], index: -1, kind: input, shape index: {}] }
   0x1   :  { %s8364_s5 = sld [smem:[%s9951_s0]]   ;;  %s8295_s14 = smov 3  }
   0x2   :  { %s8369_s9 = sld [smem:[%s9951_s0 + %s8293_s6]]   ;;  %s8296_s18 = smov 4  }
   0x3   :  { %s8374_s13 = sld [smem:[%s9951_s0 + %s8294_s10]]   ;;  %s8297_s22 = smov 5  }
   0x4   :  { %s8379_s17 = sld [smem:[%s9951_s0 + %s8295_s14]]   ;;  %s8298_s26 = smov 6  }
   0x5   :  { %s8384_s21 = sld [smem:[%s9951_s0 + %s8296_s18]]   ;;  %s8299_s30 = smov 7  }
   0x6   :  { %s8389_s25 = sld [smem:[%s9951_s0 + %s8297_s22]]   ;;  %s8300_s4 = smov 8  }
   0x7   :  { %9976 = sst [smem:[#allocation39_spill]] %s8364_s5  ;;  %s8301_s10 = smov 9  }
   0x8   :  { %9977 = sst [smem:[#allocation40_spill]] %s8369_s9  ;;  %s8302_s15 = smov 10  }
   0x9   :  { %9978 = sst [smem:[#allocation41_spill]] %s8374_s13  ;;  %s8303_s20 = smov 11  }
   0xa   :  { %s8394_s29 = sld [smem:[%s9951_s0 + %s8298_s26]]   ;;  %s8304_s26 = smov 12  }
   0xb   :  { %s8399_s3 = sld [smem:[%s9951_s0 + %s8299_s30]]   ;;  %s8305_s1 = smov 13  }
   0xc   :  { %s8404_s8 = sld [smem:[%s9951_s0 + %s8300_s4]]   ;;  %s8306_s7 = smov 14  }
   0xd   :  { %s8409_s14 = sld [smem:[%s9951_s0 + %s8301_s10]]   ;;  %s8308_s22 = smov 16  }
   0xe   :  { %s8414_s19 = sld [smem:[%s9951_s0 + %s8302_s15]]   ;;  %s8307_s15 = smov 15  }
   0xf   :  { %s8419_s24 = sld [smem:[%s9951_s0 + %s8303_s20]]   ;;  %s8309_s28 = smov 17  }
  0x10   :  { %9979 = sst [smem:[#allocation42_spill]] %s8394_s29 }
  0x11   :  { %s8424_s30 = sld [smem:[%s9951_s0 + %s8304_s26]]  }
  0x12   :  { %9980 = sst [smem:[#allocation43_spill]] %s8404_s8 }
  0x13   :  { %s8429_s6 = sld [smem:[%s9951_s0 + %s8305_s1]]  }
  0x14   :  { %9981 = sst [smem:[#allocation44_spill]] %s8414_s19 }
  0x15   :  { %s8434_s12 = sld [smem:[%s9951_s0 + %s8306_s7]]   ;;  %s8310_s7 = smov 18  }
  0x16   :  { %s8439_s20 = sld [smem:[%s9951_s0 + %s8307_s15]]   ;;  %s8311_s15 = smov 19  }
  0x17   :  { %9982 = sst [smem:[#allocation45_spill]] %s8424_s30 }
  0x18   :  { %s8444_s27 = sld [smem:[%s9951_s0 + %s8308_s22]]   ;;  %s8312_s22 = smov 20  }
  0x19   :  { %s8449_s4 = sld [smem:[%s9951_s0 + %s8309_s28]]   ;;  %s8313_s28 = smov 21  }
  0x1a   :  { %s8459_s19 = sld [smem:[%s9951_s0 + %s8311_s15]]   ;;  %s8315_s15 = smov 23  }
  0x1b   :  { %9983 = sst [smem:[#allocation46_spill]] %s8434_s12 }
  0x1c   :  { %s8454_s12 = sld [smem:[%s9951_s0 + %s8310_s7]]   ;;  %s8314_s7 = smov 22  }
  0x1d   :  { %s8464_s30 = sld [smem:[%s9951_s0 + %s8312_s22]]   ;;  %s8316_s22 = smov 24  }
  0x1e   :  { %s8469_s9 = sld [smem:[%s9951_s0 + %s8313_s28]]   ;;  %s8317_s28 = smov 25  }
  0x1f   :  { %s8484_s8 = sld [smem:[%s9951_s0 + %s8316_s22]]   ;;  %s8320_s22 = smov 28  }
  0x20   :  { %9985 = sst [smem:[#allocation48_spill]] %s8459_s19 }
  0x21   :  { %s8479_s19 = sld [smem:[%s9951_s0 + %s8315_s15]]   ;;  %s8319_s15 = smov 27  }
  0x22   :  { %9984 = sst [smem:[#allocation47_spill]] %s8454_s12 }
  0x23   :  { %s8474_s12 = sld [smem:[%s9951_s0 + %s8314_s7]]   ;;  %s8318_s7 = smov 26  }
  0x24   :  { %s8489_s29 = sld [smem:[%s9951_s0 + %s8317_s28]]   ;;  %s8321_s28 = smov 29  }
  0x25   :  { %9986 = sst [smem:[#allocation49_spill]] %s8484_s8 }
  0x26   :  { %s8494_s13 = sld [smem:[%s9951_s0 + %s8318_s7]]  }
  0x27   :  { %s8499_s5 = sld [smem:[%s9951_s0 + %s8319_s15]]  }
  0x28   :  { %s8504_s8 = sld [smem:[%s9951_s0 + %s8320_s22]]  }
  0x2a   :  { %9987 = sst [smem:[#allocation50_spill]] %s8489_s29 }
  0x2b   :  { %s8509_s29 = sld [smem:[%s9951_s0 + %s8321_s28]]  }
  0x2c   :  { %64 = vsyncpa [#allocation3], 0 }
  0x2d   :  { %65 = vsyncpa [#allocation6], 0 }
  0x2e   :  { %66 = vsyncpa [#allocation9], 0 }
  0x2f   :  { %67 = vsyncpa [#allocation12], 0 }
  0x30   :  { %68 = vsyncpa [#allocation15], 0 }
  0x31   :  { %69 = vsyncpa [#allocation18], 0 }
  0x32   :  { %70 = vsyncpa [#allocation21], 0 }
  0x33   :  { %71 = vsyncpa [#allocation24], 0 }
  0x34   :  { %72 = vsyncpa [#allocation27], 0 }
  0x35   :  { %73 = vsyncpa [#allocation4], 0  ;;  %s8322_s7 = smov [#allocation5]   ;;  %s8323_s11 = smov [#allocation8]  }
  0x36   :  { %s96_s10 = sshll.u32 %s8322_s7, 4  ;;  %s118_s15 = sshll.u32 %s8323_s11, 4  ;;  %s97_s10 = int_to_ptr.vmem [resolvable:$true] %s96_s10  ;;  %s119_s15 = int_to_ptr.vmem [resolvable:$true] %s118_s15 }
  0x37   :  { %s7941_s16 = scalar_lea.vmem %s97_s10, 16  ;;  %s7945_s0 = scalar_lea.vmem %s97_s10, 32 }
  0x38   :  { %p7942_p0 = scmp.ne.s32.totalorder %s97_s10, %s7941_s16  ;;  %p7946_p1 = scmp.lt.s32.totalorder %s97_s10, %s97_s10 }
  0x39   :  { %p7947_p2 = scmp.lt.s32.totalorder %s7945_s0, %s7941_s16 }
  0x3b   :  { %p7948_p3 = por %p7947_p2, %p7946_p1 }
  0x3d   :  { %p7949_p4 = pnand %p7948_p3, %p7942_p0 }
  0x3f   :  { %7952 = shalt.err (!%p7949_p4)
}
  0x40   :  { %99 = dma.hbm_to_vmem [thread:$0]  %s8384_s21, 16, %s97_s10, [#allocation6]  }
  0x41   :  { %s7961_s18 = scalar_lea.vmem %s119_s15, 32  ;;  %p7966_p6 = scmp.lt.s32.totalorder %s119_s15, %s119_s15 }
  0x42   :  { %p7962_p5 = scmp.ne.s32.totalorder %s119_s15, %s7961_s18  ;;  %p7967_p7 = scmp.lt.s32.totalorder %s7961_s18, %s7961_s18 }
  0x44   :  { %p7968_p8 = por %p7967_p7, %p7966_p6 }
  0x46   :  { %p7969_p9 = pnand %p7968_p8, %p7962_p5 }
  0x48   :  { %7972 = shalt.err (!%p7969_p9)
}
  0x49   :  { %121 = dma.hbm_to_vmem [thread:$0]  %s8399_s3, 32, %s119_s15, [#allocation9]  }
  0x4a   :  { %s8324_s22 = smov [#allocation11]   ;;  %s8325_s26 = smov [#allocation14]  }
  0x4b   :  { %s142_s23 = sshll.u32 %s8324_s22, 4  ;;  %s166_s28 = sshll.u32 %s8325_s26, 4  ;;  %s143_s23 = int_to_ptr.vmem [resolvable:$true] %s142_s23  ;;  %s167_s28 = int_to_ptr.vmem [resolvable:$true] %s166_s28 }
  0x4c   :  { %s7981_s1 = scalar_lea.vmem %s143_s23, 16  ;;  %s7985_s2 = scalar_lea.vmem %s143_s23, 32 }
  0x4d   :  { %p7982_p10 = scmp.ne.s32.totalorder %s143_s23, %s7981_s1  ;;  %p7986_p11 = scmp.lt.s32.totalorder %s143_s23, %s143_s23 }
  0x4e   :  { %p7987_p12 = scmp.lt.s32.totalorder %s7985_s2, %s7981_s1 }
  0x50   :  { %p7988_p13 = por %p7987_p12, %p7986_p11 }
  0x52   :  { %p7989_p0 = pnand %p7988_p13, %p7982_p10 }
  0x54   :  { %7992 = shalt.err (!%p7989_p0)
}
  0x55   :  { %145 = dma.hbm_to_vmem [thread:$0]  %s8419_s24, 16, %s143_s23, [#allocation12]  }
  0x56   :  { %s8001_s21 = scalar_lea.vmem %s167_s28, 16  ;;  %s8005_s7 = scalar_lea.vmem %s167_s28, 32 }
  0x57   :  { %p8002_p1 = scmp.ne.s32.totalorder %s167_s28, %s8001_s21  ;;  %p8006_p2 = scmp.lt.s32.totalorder %s167_s28, %s167_s28 }
  0x58   :  { %p8007_p3 = scmp.lt.s32.totalorder %s8005_s7, %s8001_s21 }
  0x5a   :  { %p8008_p4 = por %p8007_p3, %p8006_p2 }
  0x5c   :  { %p8009_p5 = pnand %p8008_p4, %p8002_p1 }
  0x5e   :  { %8012 = shalt.err (!%p8009_p5)
}
  0x5f   :  { %169 = dma.hbm_to_vmem [thread:$0]  %s8439_s20, 16, %s167_s28, [#allocation15]  }
  0x60   :  { %s8326_s3 = smov [#allocation17]   ;;  %s8327_s11 = smov [#allocation20]  }
  0x61   :  { %s186_s10 = sshll.u32 %s8326_s3, 4  ;;  %s209_s15 = sshll.u32 %s8327_s11, 4  ;;  %s187_s10 = int_to_ptr.vmem [resolvable:$true] %s186_s10  ;;  %s210_s15 = int_to_ptr.vmem [resolvable:$true] %s209_s15 }
  0x62   :  { %s8021_s16 = scalar_lea.vmem %s187_s10, 16  ;;  %s8025_s0 = scalar_lea.vmem %s187_s10, 32 }
  0x63   :  { %p8022_p6 = scmp.ne.s32.totalorder %s187_s10, %s8021_s16  ;;  %p8026_p7 = scmp.lt.s32.totalorder %s187_s10, %s187_s10 }
  0x64   :  { %p8027_p8 = scmp.lt.s32.totalorder %s8025_s0, %s8021_s16 }
  0x66   :  { %p8028_p9 = por %p8027_p8, %p8026_p7 }
  0x68   :  { %p8029_p10 = pnand %p8028_p9, %p8022_p6 }
  0x6a   :  { %8032 = shalt.err (!%p8029_p10)
}
  0x6b   :  { %189 = dma.hbm_to_vmem [thread:$0]  %s8449_s4, 16, %s187_s10, [#allocation18]  }
  0x6c   :  { %s8041_s24 = scalar_lea.vmem %s210_s15, 256  ;;  %p8046_p12 = scmp.lt.s32.totalorder %s210_s15, %s210_s15 }
  0x6d   :  { %p8042_p11 = scmp.ne.s32.totalorder %s210_s15, %s8041_s24  ;;  %p8047_p13 = scmp.lt.s32.totalorder %s8041_s24, %s8041_s24 }
  0x6f   :  { %p8048_p0 = por %p8047_p13, %p8046_p12 }
  0x71   :  { %p8049_p1 = pnand %p8048_p0, %p8042_p11 }
  0x73   :  { %8052 = shalt.err (!%p8049_p1)
}
  0x74   :  { %s8328_s20 = smov 64   ;;  %s8329_s18 = smov 4  }
  0x75   :  { %215 = dma.hbm_to_vmem [thread:$0]  %s8469_s9, 256, %s210_s15, [#allocation21], %s8328_s20, %s8328_s20, %s8329_s18  }
  0x76   :  { %s8330_s22 = smov [#allocation23]   ;;  %s8331_s26 = smov [#allocation2]  }
  0x77   :  { %s231_s23 = sshll.u32 %s8330_s22, 4  ;;  %s86_s28 = sshll.u32 %s8331_s26, 4  ;;  %s232_s23 = int_to_ptr.vmem [resolvable:$true] %s231_s23  ;;  %s87_s28 = int_to_ptr.vmem [resolvable:$true] %s86_s28 }
  0x78   :  { %s8061_s4 = scalar_lea.vmem %s232_s23, 256  ;;  %p8066_p3 = scmp.lt.s32.totalorder %s232_s23, %s232_s23 }
  0x79   :  { %p8062_p2 = scmp.ne.s32.totalorder %s232_s23, %s8061_s4  ;;  %p8067_p4 = scmp.lt.s32.totalorder %s8061_s4, %s8061_s4 }
  0x7b   :  { %p8068_p5 = por %p8067_p4, %p8066_p3 }
  0x7d   :  { %p8069_p6 = pnand %p8068_p5, %p8062_p2 }
  0x7f   :  { %8072 = shalt.err (!%p8069_p6)
}
  0x80   :  { %237 = dma.hbm_to_vmem [thread:$0]  %s8479_s19, 256, %s232_s23, [#allocation24], %s8328_s20, %s8328_s20, %s8329_s18  }
  0x81   :  { %s8081_s1 = scalar_lea.vmem %s87_s28, 128  ;;  %p8086_p8 = scmp.lt.s32.totalorder %s87_s28, %s87_s28 }
  0x82   :  { %p8082_p7 = scmp.ne.s32.totalorder %s87_s28, %s8081_s1  ;;  %p8087_p9 = scmp.lt.s32.totalorder %s8081_s1, %s8081_s1 }
  0x84   :  { %p8088_p10 = por %p8087_p9, %p8086_p8 }
  0x86   :  { %p8089_p11 = pnand %p8088_p10, %p8082_p7 }
  0x88   :  { %8092 = shalt.err (!%p8089_p11)
}
  0x89   :  { %89 = dma.hbm_to_vmem [thread:$0]  %s8379_s17, 128, %s87_s28, [#allocation3]  }
  0x8a   :  { %s8332_s9 = smov [#allocation7]   ;;  %s8333_s21 = smov [#allocation10]  }
  0x8b   :  { %s106_s2 = sshll.u32 %s8332_s9, 4  ;;  %s130_s7 = sshll.u32 %s8333_s21, 4  ;;  %s107_s2 = int_to_ptr.vmem [resolvable:$true] %s106_s2  ;;  %s131_s7 = int_to_ptr.vmem [resolvable:$true] %s130_s7 }
  0x8c   :  { %s8101_s3 = scalar_lea.vmem %s107_s2, 16  ;;  %s8105_s10 = scalar_lea.vmem %s107_s2, 32 }
  0x8d   :  { %p8102_p12 = scmp.ne.s32.totalorder %s107_s2, %s8101_s3  ;;  %p8106_p13 = scmp.lt.s32.totalorder %s107_s2, %s107_s2 }
  0x8e   :  { %p8107_p0 = scmp.lt.s32.totalorder %s8105_s10, %s8101_s3 }
  0x90   :  { %p8108_p1 = por %p8107_p0, %p8106_p13 }
  0x92   :  { %p8109_p2 = pnand %p8108_p1, %p8102_p12 }
  0x94   :  { %8112 = shalt.err (!%p8109_p2)
}
  0x95   :  { %109 = dma.hbm_to_vmem [thread:$0]  %s8389_s25, 16, %s107_s2, [#allocation6]  }
  0x96   :  { %s8121_s19 = scalar_lea.vmem %s131_s7, 16  ;;  %s8125_s11 = scalar_lea.vmem %s131_s7, 32 }
  0x97   :  { %p8122_p3 = scmp.ne.s32.totalorder %s131_s7, %s8121_s19  ;;  %p8126_p4 = scmp.lt.s32.totalorder %s131_s7, %s131_s7 }
  0x98   :  { %p8127_p5 = scmp.lt.s32.totalorder %s8125_s11, %s8121_s19 }
  0x9a   :  { %p8128_p6 = por %p8127_p5, %p8126_p4 }
  0x9c   :  { %p8129_p7 = pnand %p8128_p6, %p8122_p3 }
  0x9e   :  { %8132 = shalt.err (!%p8129_p7)
}
  0x9f   :  { %133 = dma.hbm_to_vmem [thread:$0]  %s8409_s14, 16, %s131_s7, [#allocation9]  }
  0xa0   :  { %s8334_s17 = smov [#allocation13]   ;;  %s8335_s16 = smov [#allocation16]  }
  0xa1   :  { %s154_s15 = sshll.u32 %s8334_s17, 4  ;;  %s176_s0 = sshll.u32 %s8335_s16, 4  ;;  %s155_s15 = int_to_ptr.vmem [resolvable:$true] %s154_s15  ;;  %s177_s0 = int_to_ptr.vmem [resolvable:$true] %s176_s0 }
  0xa2   :  { %s8141_s24 = scalar_lea.vmem %s155_s15, 32  ;;  %p8146_p9 = scmp.lt.s32.totalorder %s155_s15, %s155_s15 }
  0xa3   :  { %p8142_p8 = scmp.ne.s32.totalorder %s155_s15, %s8141_s24  ;;  %p8147_p10 = scmp.lt.s32.totalorder %s8141_s24, %s8141_s24 }
  0xa5   :  { %p8148_p11 = por %p8147_p10, %p8146_p9 }
  0xa7   :  { %p8149_p12 = pnand %p8148_p11, %p8142_p8 }
  0xa9   :  { %8152 = shalt.err (!%p8149_p12)
}
  0xaa   :  { %157 = dma.hbm_to_vmem [thread:$0]  %s8429_s6, 32, %s155_s15, [#allocation12]  }
  0xab   :  { %s8161_s25 = scalar_lea.vmem %s177_s0, 16  ;;  %s8165_s18 = scalar_lea.vmem %s177_s0, 32 }
  0xac   :  { %p8162_p13 = scmp.ne.s32.totalorder %s177_s0, %s8161_s25  ;;  %p8166_p0 = scmp.lt.s32.totalorder %s177_s0, %s177_s0 }
  0xad   :  { %p8167_p1 = scmp.lt.s32.totalorder %s8165_s18, %s8161_s25 }
  0xaf   :  { %p8168_p2 = por %p8167_p1, %p8166_p0 }
  0xb1   :  { %p8169_p3 = pnand %p8168_p2, %p8162_p13 }
  0xb3   :  { %8172 = shalt.err (!%p8169_p3)
}
  0xb4   :  { %179 = dma.hbm_to_vmem [thread:$0]  %s8444_s27, 16, %s177_s0, [#allocation15]  }
  0xb5   :  { %s8336_s14 = smov [#allocation19]   ;;  %s8337_s23 = smov [#allocation22]  }
  0xb6   :  { %s200_s22 = sshll.u32 %s8336_s14, 4  ;;  %s222_s26 = sshll.u32 %s8337_s23, 4  ;;  %s201_s22 = int_to_ptr.vmem [resolvable:$true] %s200_s22  ;;  %s223_s26 = int_to_ptr.vmem [resolvable:$true] %s222_s26 }
  0xb7   :  { %s8181_s28 = scalar_lea.vmem %s201_s22, 16  ;;  %s8185_s4 = scalar_lea.vmem %s201_s22, 32 }
  0xb8   :  { %p8182_p4 = scmp.ne.s32.totalorder %s201_s22, %s8181_s28  ;;  %p8186_p5 = scmp.lt.s32.totalorder %s201_s22, %s201_s22 }
  0xb9   :  { %p8187_p6 = scmp.lt.s32.totalorder %s8185_s4, %s8181_s28 }
  0xbb   :  { %p8188_p7 = por %p8187_p6, %p8186_p5 }
  0xbd   :  { %p8189_p8 = pnand %p8188_p7, %p8182_p4 }
  0xbf   :  { %8192 = shalt.err (!%p8189_p8)
}
  0xc0   :  { %203 = dma.hbm_to_vmem [thread:$0]  %s8464_s30, 16, %s201_s22, [#allocation18]  }
  0xc1   :  { %s8201_s6 = scalar_lea.vmem %s223_s26, 16  ;;  %s8205_s1 = scalar_lea.vmem %s223_s26, 32 }
  0xc2   :  { %p8202_p9 = scmp.ne.s32.totalorder %s223_s26, %s8201_s6  ;;  %p8206_p10 = scmp.lt.s32.totalorder %s223_s26, %s223_s26 }
  0xc3   :  { %p8207_p11 = scmp.lt.s32.totalorder %s8205_s1, %s8201_s6 }
  0xc5   :  { %p8208_p12 = por %p8207_p11, %p8206_p10 }
  0xc7   :  { %p8209_p13 = pnand %p8208_p12, %p8202_p9 }
  0xc9   :  { %8212 = shalt.err (!%p8209_p13)
}
  0xca   :  { %225 = dma.hbm_to_vmem [thread:$0]  %s8474_s12, 16, %s223_s26, [#allocation21]  }
  0xcb   :  { %s8338_s27 = smov [#allocation25]   ;;  %s8339_s2 = smov [#allocation26]  }
  0xcc   :  { %s244_s9 = sshll.u32 %s8338_s27, 4  ;;  %s254_s21 = sshll.u32 %s8339_s2, 4  ;;  %s245_s9 = int_to_ptr.vmem [resolvable:$true] %s244_s9  ;;  %s255_s21 = int_to_ptr.vmem [resolvable:$true] %s254_s21 }
  0xcd   :  { %s8221_s7 = scalar_lea.vmem %s245_s9, 16  ;;  %s8225_s3 = scalar_lea.vmem %s245_s9, 32 }
  0xce   :  { %p8222_p0 = scmp.ne.s32.totalorder %s245_s9, %s8221_s7  ;;  %p8226_p1 = scmp.lt.s32.totalorder %s245_s9, %s245_s9 }
  0xcf   :  { %p8227_p2 = scmp.lt.s32.totalorder %s8225_s3, %s8221_s7 }
  0xd1   :  { %p8228_p3 = por %p8227_p2, %p8226_p1 }
  0xd3   :  { %p8229_p4 = pnand %p8228_p3, %p8222_p0 }
  0xd5   :  { %8232 = shalt.err (!%p8229_p4)
}
  0xd6   :  { %s9988_s30 = sld [smem:[#allocation49_spill]]  ;;  %s8241_s10 = scalar_lea.vmem %s255_s21, 16 }
  0xd7   :  { %p8242_p5 = scmp.ne.s32.totalorder %s255_s21, %s8241_s10  ;;  %s8245_s19 = scalar_lea.vmem %s255_s21, 32 }
  0xd8   :  { %p8246_p6 = scmp.lt.s32.totalorder %s255_s21, %s255_s21  ;;  %p8247_p7 = scmp.lt.s32.totalorder %s8245_s19, %s8241_s10 }
  0xda   :  { %p8248_p8 = por %p8247_p7, %p8246_p6 }
  0xdc   :  { %247 = dma.hbm_to_vmem [thread:$0]  %s9988_s30, 16, %s245_s9, [#allocation24]  }
  0xdd   :  { %p8249_p9 = pnand %p8248_p8, %p8242_p5 }
  0xdf   :  { %8252 = shalt.err (!%p8249_p9)
}
  0xe0   :  { %s9989_s12 = sld [smem:[#allocation50_spill]] }
  0xe6   :  { %257 = dma.hbm_to_vmem [thread:$0]  %s9989_s12, 16, %s255_s21, [#allocation27]  }
  0xe7   :  { %8273 = dma.done.wait [#allocation3], 128  }
  0xe8   :  { %8274 = vsyncadd [#allocation3], 4294967168 }
  0xe9   :  { %8275 = dma.done.wait [#allocation6], 32  }
  0xea   :  { %8276 = vsyncadd [#allocation6], 4294967264 }
  0xeb   :  { %8277 = dma.done.wait [#allocation9], 48  }
  0xec   :  { %8278 = vsyncadd [#allocation9], 4294967248 }
  0xed   :  { %8279 = dma.done.wait [#allocation12], 48  }
  0xee   :  { %8280 = vsyncadd [#allocation12], 4294967248 }
  0xef   :  { %8281 = dma.done.wait [#allocation15], 32  }
  0xf0   :  { %8282 = vsyncadd [#allocation15], 4294967264 }
  0xf1   :  { %8283 = dma.done.wait [#allocation18], 32  }
  0xf2   :  { %8284 = vsyncadd [#allocation18], 4294967264 }
  0xf3   :  { %8285 = dma.done.wait [#allocation21], 272  }
  0xf4   :  { %8286 = vsyncadd [#allocation21], 4294967024 }
  0xf5   :  { %8287 = dma.done.wait [#allocation24], 272  }
  0xf6   :  { %8288 = vsyncadd [#allocation24], 4294967024 }
  0xf7   :  { %8289 = dma.done.wait [#allocation27], 16  }
  0xf8   :  { %8290 = vsyncadd [#allocation27], 4294967280  ;;  %s9990_s11 = sld [smem:[#allocation39_spill]]  ;;  %v8340_v0 = vmov 0   ;;  %v9961_v1 = vmov 0.0   ;;  %vm8342_vm0 = vmmov 0   ;;  %v315_v8 = vlaneseq }
  0xf9   :  { %s9991_s17 = sld [smem:[#allocation41_spill]]  ;;  %7573 = vset.pattern.permute.xlu0 %v8340_v0  ;;  %6954 = vmatprep.subr.bf16.mxu0 %v9961_v1  ;;  %vm362_vm3 = vcmask 523264   ;;  %v407_v15 = vld [vmem:[#allocation2] sm:$0xff]  ;;  %v6586_v53 = vld [vmem:[#allocation5] ss:$0 sm:$0xff]  ;;  %s8343_s16 = smov 112  }
  0xfa   :  { %555 = vmatprep.mubr.bf16.mxu1 %v8340_v0  ;;  %7619 = vset.pattern.permute.xlu1 %v8340_v0  ;;  %v8548_v9 = vand.u32 127, %v315_v8  ;;  %s9993_s15 = sld [smem:[#allocation42_spill]]  ;;  %v6587_v58 = vld [vmem:[#allocation7] ss:$0 sm:$0xff]  ;;  %v8580_v63 = vshrl.u32 %v315_v8, 7  ;;  %s8344_s0 = smov 96  }
  0xfb   :  { %6962 = vmatprep.mubr.msk.bf16.mxu0 %vm8342_vm0, %v9961_v1  ;;  %s8345_s24 = smov 80   ;;  %vm634_vm4 = vcmask 130048   ;;  %vm1124_vm5 = vcmask 1043456   ;;  %vm1024_vm6 = vcmask 64512   ;;  %s9997_s25 = sld [smem:[#allocation43_spill]]  ;;  %vm1516_vm7 = vcmask 261120  }
  0xfc   :  { %9992 = vst [vmem:[#allocation51_spill] sm:$0xff] %v8548_v9  ;;  %9994 = vst [vmem:[#allocation52_spill] sm:$0xff] %v8580_v63  ;;  %s8346_s18 = smov 16   ;;  %s8347_s14 = smov 32   ;;  %vm1519_vm8 = vcmask 392192   ;;  %vm3912_vm11 = vcmask 9216  }
  0xfd   :  { %s8348_s22 = smov 48   ;;  %s9998_s23 = sld [smem:[#allocation40_spill]]  ;;  %vm4303_vm12 = vcmask 1040384   ;;  %vm4299_vm13 = vcmask 15360   ;;  %vm5947_vm14 = vcmask 195584   ;;  %vm6282_vm15 = vcmask 1041409  }
  0xfe   :  { %v313_v2 = vld [vmem:[%s9990_s11] sm:$0xff]  ;;  %v314_v4 = vld [vmem:[%s9990_s11 + $0x8] sm:$0xff]  ;;  %s9999_s26 = sld [smem:[#allocation45_spill]]  ;;  %s8351_s27 = smov 120  }
  0xff   :  { %318 = vperm.xlu0 %7573, %v313_v2   ;;  %v7680_v3 = vld [vmem:[%s9991_s17 + $0x18] sm:$0xff]   ;;  %v7681_v5 = vld [vmem:[%s9991_s17 + $0x10] sm:$0xff]   ;;  %v7682_v6 = vld [vmem:[%s9991_s17 + $0x8] sm:$0xff]   ;;  %v8583_v2 = vsub.s32 0, %v8580_v63  ;;  %s10000_s28 = sld [smem:[#allocation44_spill]]  ;;  %s8352_s9 = smov 104  }
 0x100   :  { %6955 = vmatpush3.bf16.msra.mxu0 %v7680_v3  ;;  %v7683_v7 = vld [vmem:[%s9991_s17] sm:$0xff]   ;;  %v7684_v28 = vld [vmem:[%s9993_s15 + $0x34] ss:$8 sps:$4 sm:$0xff]   ;;  %v7686_v29 = vld [vmem:[%s9993_s15 + $0x30] ss:$8 sps:$4 sm:$0xff]   ;;  %s10001_s4 = sld [smem:[#allocation47_spill]] }
 0x101   :  { %6956 = vmatprep.subr.bf16.mxu0 %v9961_v1  ;;  %v7687_v30 = vld [vmem:[%s9993_s15 + $0x24] ss:$8 sps:$4 sm:$0xff]   ;;  %531 = vmatprep.subr.bf16.mxu1 %v7684_v28  ;;  %v7689_v31 = vld [vmem:[%s9993_s15 + $0x20] ss:$8 sps:$4 sm:$0xff]   ;;  %v7690_v32 = vld [vmem:[%s9993_s15 + $0x14] ss:$8 sps:$4 sm:$0xff]  }
 0x102   :  { %532 = vmatpush1.bf16.msra.mxu1 %v7686_v29  ;;  %v7692_v33 = vld [vmem:[%s9993_s15 + $0x10] ss:$8 sps:$4 sm:$0xff]   ;;  %v7693_v34 = vld [vmem:[%s9993_s15 + $0x4] ss:$8 sps:$4 sm:$0xff]   ;;  %v7695_v35 = vld [vmem:[%s9993_s15] ss:$8 sps:$4 sm:$0xff]  }
 0x103   :  { %321 = vperm.xlu0 %7573, %v314_v4   ;;  %533 = vmatprep.subr.bf16.mxu1 %v7687_v30  ;;  %9995 = vst [vmem:[#allocation53_spill] sm:$0xff] %v8583_v2  ;;  %v468_v3 = vld [vmem:[#allocation8] sm:$0x3]  ;;  %v8586_v4 = vsub.s32 1, %v8580_v63  ;;  %s10004_s6 = sld [smem:[#allocation46_spill]]  ;;  %s8354_s2 = smov 24  }
 0x104   :  { %6957 = vmatpush3.bf16.msra.mxu0 %v7681_v5  ;;  %s10005_s1 = sld [smem:[#allocation48_spill]] }
 0x105   :  { %6958 = vmatprep.subr.bf16.mxu0 %v9961_v1  ;;  %9996 = vst [vmem:[#allocation54_spill] sm:$0xff] %v8586_v4 }
 0x106   :  { %534 = vmatpush1.bf16.msra.mxu1 %v7689_v31 }
 0x107   :  { %535 = vmatprep.subr.bf16.mxu1 %v7690_v32 }
 0x108   :  { %6959 = vmatpush3.bf16.msra.mxu0 %v7682_v6  ;;  %v473_v6 = vrot.slane %v468_v3, %v8583_v2 }
 0x109   :  { %6960 = vmatprep.subr.bf16.mxu0 %v9961_v1 }
 0x10a   :  { %536 = vmatpush1.bf16.msra.mxu1 %v7692_v33 }
 0x10b   :  { %537 = vmatprep.subr.bf16.mxu1 %v7693_v34 }
 0x10c   :  { %6961 = vmatpush3.bf16.msra.mxu0 %v7683_v7 }
 0x10d   :  { %6966 = vmatprep.subr.bf16.mxu0 %v9961_v1 }
 0x10e   :  { %538 = vmatpush1.bf16.msra.mxu1 %v7695_v35 }
 0x10f   :  { %6972 = vmatprep.subr.bf16.mxu1 %v9961_v1 }
 0x17a   :  { %v319_v10 = vpop.permute.xlu0 %318 }
 0x17b   :  { %vm323_vm1 = vcmp.eq.s32.totalorder %v319_v10, %v8548_v9  ;;  %v477_v10 = vrot.slane %v468_v3, %v8586_v4 }
 0x17c   :  { %v6579_v12 = vsel %vm323_vm1, 1.0, %v9961_v1 }
 0x17e   :  { %v322_v11 = vpop.permute.xlu0 %321 }
 0x17f   :  { %vm324_vm2 = vcmp.eq.s32.totalorder %v322_v11, %v8548_v9 }
 0x180   :  { %v6580_v13 = vsel %vm324_vm2, 1.0, %v9961_v1 }
 0x181   :  { %v329_v14 = vpack.c.bf16 %v6580_v13, %v6579_v12 }
 0x183   :  { %6963 = vmatmul.mubr.msk.bf16.vlgmr.msra.gmra.mxu0 %vm362_vm3, %v329_v14 }
 0x184   :  { %6968 = vmatprep.mubr.msk.bf16.mxu0 %vm8342_vm0, %v9961_v1 }
 0x243   :  { %v400_v16 = vpop.f32.mrf.mxu0 }
 0x244   :  { %v408_v17 = vadd.f32 %v407_v15, %v400_v16 }
 0x245   :  { %v6964_v18 = vpop.f32.mrf.mxu0 }
 0x246   :  { %v412_v19 = vsel %vm362_vm3, %v408_v17, 0.0  ;;  %v421_v20 = vmul.f32 %v408_v17, %v408_v17 }
 0x247   :  { %413 = vadd.xlane.f32.xlu1 %v412_v19  ;;  %v403_v21 = vpop.f32.mrf.mxu0 }
 0x248   :  { %v409_v22 = vadd.f32 %v407_v15, %v403_v21  ;;  %v423_v23 = vsel %vm362_vm3, %v421_v20, 0.0 }
 0x249   :  { %424 = vadd.xlane.f32.xlu0 %v423_v23  ;;  %v6965_v24 = vpop.f32.mrf.mxu0 }
 0x24a   :  { %v415_v25 = vsel %vm362_vm3, %v409_v22, 0.0  ;;  %v422_v26 = vmul.f32 %v409_v22, %v409_v22 }
 0x24b   :  { %416 = vadd.xlane.f32.xlu1 %v415_v25 }
 0x24c   :  { %v426_v27 = vsel %vm362_vm3, %v422_v26, 0.0 }
 0x24f   :  { %427 = vadd.xlane.f32.xlu1 %v426_v27 }
 0x2d0   :  { %v414_v36 = vpop.xlane.xlu1 %413 }
 0x2d1   :  { %v419_v37 = vmul.f32 0.015625, %v414_v36 }
 0x2d2   :  { %v425_v38 = vpop.xlane.xlu0 %424 }
 0x2d3   :  { %v431_v39 = vmul.f32 %v419_v37, %v419_v37  ;;  %v429_v40 = vmul.f32 0.015625, %v425_v38  ;;  %v435_v51 = vsub.f32 %v408_v17, %v419_v37 }
 0x2d4   :  { %v417_v41 = vpop.xlane.xlu1 %416 }
 0x2d5   :  { %v433_v42 = vsub.f32 %v429_v40, %v431_v39  ;;  %v420_v43 = vmul.f32 0.015625, %v417_v41 }
 0x2d7   :  { %v437_v44 = vadd.f32 1e-05, %v433_v42  ;;  %v432_v46 = vmul.f32 %v420_v43, %v420_v43  ;;  %v436_v54 = vsub.f32 %v409_v22, %v420_v43 }
 0x2d8   :  { %v428_v45 = vpop.xlane.xlu1 %427 }
 0x2d9   :  { %7742 = vrsqrt.f32 %v437_v44  ;;  %v430_v47 = vmul.f32 0.015625, %v428_v45 }
 0x2db   :  { %v434_v48 = vsub.f32 %v430_v47, %v432_v46 }
 0x2dd   :  { %v438_v49 = vadd.f32 1e-05, %v434_v48 }
 0x2df   :  { %7744 = vrsqrt.f32 %v438_v49 }
 0x2e6   :  { %v7743_v50 = vpop.eup %7742 }
 0x2e7   :  { %v441_v52 = vmul.f32 %v7743_v50, %v435_v51 }
 0x2e9   :  { %v449_v57 = vmul.f32 %v6586_v53, %v441_v52 }
 0x2eb   :  { %v8570_v60 = vadd.f32 %v6587_v58, %v449_v57 }
 0x2ec   :  { %v7745_v55 = vpop.eup %7744 }
 0x2ed   :  { %v442_v56 = vmul.f32 %v7745_v55, %v436_v54 }
 0x2ef   :  { %v450_v59 = vmul.f32 %v6586_v53, %v442_v56 }
 0x2f1   :  { %v8572_v61 = vadd.f32 %v6587_v58, %v450_v59 }
 0x2f3   :  { %v467_v62 = vpack.c.bf16 %v8572_v61, %v8570_v60 }
 0x2f5   :  { %6596 = vmatmul.mubr.msk.bf16.vlgmr.msra.gmra.mxu1 %vm362_vm3, %v467_v62 }
 0x2f6   :  { %6974 = vmatprep.mubr.msk.bf16.mxu1 %vm8342_vm0, %v9961_v1 }
 0x3b5   :  { %v557_v5 = vpop.f32.mrf.mxu1 }
 0x3b6   :  { %v558_v12 = vadd.f32 %v557_v5, %v473_v6 }
 0x3b7   :  { %v559_v7 = vpop.f32.mrf.mxu1 }
 0x3b8   :  { %v8590_v15 = vadd.f32 %v559_v7, %v477_v10  ;;  %v595_v19 = vpack.c.bf16 %v558_v12, %v558_v12 }
 0x3b9   :  { %v561_v11 = vpop.f32.mrf.mxu1 }
 0x3ba   :  { %v562_v13 = vadd.f32 %v561_v11, %v473_v6  ;;  %v623_v51 = vpack.c.bf16 %v8590_v15, %v8590_v15 }
 0x3bb   :  { %v563_v14 = vpop.f32.mrf.mxu1 }
 0x3bc   :  { %v8592_v8 = vadd.f32 %v563_v14, %v477_v10  ;;  %v596_v16 = vpack.c.bf16 %v562_v13, %v562_v13  ;;  %v7574_v17 = vpack.i.bf16 %v562_v13, %v558_v12  ;;  %v1126_v52 = vsel %vm1124_vm5, %v623_v51, 0 }
 0x3be   :  { %682 = vrot.lane.b32.xlu0 %v596_v16, %s8328_s20  ;;  %7575 = vrot.lane.b32.xlu1 %v7574_v17, %s8343_s16  ;;  %v8598_v18 = vpack.i.bf16 %v8592_v8, %v8590_v15  ;;  %v624_v53 = vpack.c.bf16 %v8592_v8, %v8592_v8 }
 0x3c0   :  { %v1172_v54 = vsel %vm1124_vm5, %v624_v53, 0 }
 0x3c2   :  { %7580 = vrot.lane.b32.xlu1 %v7574_v17, %s8344_s0 }
 0x3c6   :  { %7585 = vrot.lane.b32.xlu1 %v7574_v17, %s8345_s24 }
 0x3ca   :  { %632 = vrot.lane.b32.xlu1 %v595_v19, %s8328_s20 }
 0x430   :  { %v683_v20 = vpop.permute.xlu0 %682  ;;  %v7576_v21 = vpop.permute.xlu1 %7575 }
 0x431   :  { %v688_v22 = vsel %vm634_vm4, %v683_v20, 0  ;;  %v7577_v23 = vunpack.i.l.bf16 %v7576_v21  ;;  %v7578_v25 = vunpack.i.h.bf16 %v7576_v21 }
 0x432   :  { %6973 = vmatpush3.bf16.xpose.msra.mxu1 %v688_v22 }
 0x433   :  { %v597_v24 = vpack.c.bf16 %v7577_v23, %v7577_v23  ;;  %6984 = vmatprep.subr.bf16.mxu1 %v9961_v1  ;;  %v598_v27 = vpack.c.bf16 %v7578_v25, %v7578_v25 }
 0x434   :  { %v7581_v26 = vpop.permute.xlu1 %7580 }
 0x435   :  { %731 = vrot.lane.b32.xlu1 %v597_v24, %s8328_s20  ;;  %v7582_v28 = vunpack.i.l.bf16 %v7581_v26  ;;  %v7583_v33 = vunpack.i.h.bf16 %v7581_v26 }
 0x437   :  { %v599_v32 = vpack.c.bf16 %v7582_v28, %v7582_v28  ;;  %v600_v36 = vpack.c.bf16 %v7583_v33, %v7583_v33 }
 0x438   :  { %v7586_v29 = vpop.permute.xlu1 %7585 }
 0x439   :  { %6975 = vmatmul.mubr.msk.bf16.vlgmr.msra.gmra.mxu1 %vm634_vm4, %v596_v16  ;;  %780 = vrot.lane.b32.xlu1 %v598_v27, %s8328_s20  ;;  %v7588_v30 = vunpack.i.h.bf16 %v7586_v29  ;;  %v7587_v37 = vunpack.i.l.bf16 %v7586_v29 }
 0x43a   :  { %6986 = vmatprep.mubr.msk.bf16.mxu1 %vm8342_vm0, %v9961_v1 }
 0x43b   :  { %v602_v31 = vpack.c.bf16 %v7588_v30, %v7588_v30  ;;  %v601_v38 = vpack.c.bf16 %v7587_v37, %v7587_v37 }
 0x43c   :  { %v633_v34 = vpop.permute.xlu1 %632 }
 0x43d   :  { %v639_v35 = vsel %vm634_vm4, %v633_v34, 0  ;;  %976 = vrot.lane.b32.xlu0 %v602_v31, %s8328_s20  ;;  %829 = vrot.lane.b32.xlu1 %v599_v32, %s8328_s20 }
 0x43e   :  { %6967 = vmatpush3.bf16.xpose.msra.mxu0 %v639_v35 }
 0x43f   :  { %6978 = vmatprep.subr.bf16.mxu0 %v9961_v1 }
 0x441   :  { %878 = vrot.lane.b32.xlu1 %v600_v36, %s8328_s20 }
 0x445   :  { %927 = vrot.lane.b32.xlu1 %v601_v38, %s8328_s20  ;;  %6969 = vmatmul.mubr.msk.bf16.vlgmr.msra.gmra.mxu0 %vm634_vm4, %v595_v19 }
 0x446   :  { %6980 = vmatprep.mubr.msk.bf16.mxu0 %vm8342_vm0, %v9961_v1 }
 0x4a7   :  { %v732_v39 = vpop.permute.xlu1 %731 }
 0x4a8   :  { %v737_v40 = vsel %vm634_vm4, %v732_v39, 0 }
 0x4a9   :  { %6979 = vmatpush3.bf16.xpose.msra.mxu0 %v737_v40 }
 0x4aa   :  { %6990 = vmatprep.subr.bf16.mxu0 %v9961_v1 }
 0x4ab   :  { %v781_v41 = vpop.permute.xlu1 %780 }
 0x4ac   :  { %v786_v42 = vsel %vm634_vm4, %v781_v41, 0 }
 0x4ad   :  { %6985 = vmatpush3.bf16.xpose.msra.mxu1 %v786_v42 }
 0x4ae   :  { %6996 = vmatprep.subr.bf16.mxu1 %v9961_v1 }
 0x4af   :  { %v830_v43 = vpop.permute.xlu1 %829  ;;  %v977_v49 = vpop.permute.xlu0 %976 }
 0x4b0   :  { %v835_v44 = vsel %vm634_vm4, %v830_v43, 0  ;;  %6981 = vmatmul.mubr.msk.bf16.vlgmr.msra.gmra.mxu0 %vm634_vm4, %v597_v24  ;;  %v982_v50 = vsel %vm634_vm4, %v977_v49, 0 }
 0x4b1   :  { %6991 = vmatpush3.bf16.xpose.msra.mxu0 %v835_v44  ;;  %6992 = vmatprep.mubr.msk.bf16.mxu0 %vm8342_vm0, %v9961_v1 }
 0x4b2   :  { %7002 = vmatprep.subr.bf16.mxu0 %v9961_v1 }
 0x4b3   :  { %v879_v45 = vpop.permute.xlu1 %878 }
 0x4b4   :  { %v884_v46 = vsel %vm634_vm4, %v879_v45, 0  ;;  %6987 = vmatmul.mubr.msk.bf16.vlgmr.msra.gmra.mxu1 %vm634_vm4, %v598_v27 }
 0x4b5   :  { %6997 = vmatpush3.bf16.xpose.msra.mxu1 %v884_v46  ;;  %6998 = vmatprep.mubr.msk.bf16.mxu1 %vm8342_vm0, %v9961_v1 }
 0x4b6   :  { %7008 = vmatprep.subr.bf16.mxu1 %v9961_v1 }
 0x4b7   :  { %v928_v47 = vpop.permute.xlu1 %927 }
 0x4b8   :  { %v933_v48 = vsel %vm634_vm4, %v928_v47, 0  ;;  %6993 = vmatmul.mubr.msk.bf16.vlgmr.msra.gmra.mxu0 %vm634_vm4, %v599_v32 }
 0x4b9   :  { %7003 = vmatpush3.bf16.xpose.msra.mxu0 %v933_v48  ;;  %7004 = vmatprep.mubr.msk.bf16.mxu0 %vm8342_vm0, %v9961_v1 }
 0x4ba   :  { %7014 = vmatprep.subr.bf16.mxu0 %v9961_v1 }
 0x4bc   :  { %6999 = vmatmul.mubr.msk.bf16.vlgmr.msra.gmra.mxu1 %vm634_vm4, %v600_v36 }
 0x4bd   :  { %7009 = vmatpush3.bf16.xpose.msra.mxu1 %v982_v50  ;;  %7010 = vmatprep.mubr.msk.bf16.mxu1 %vm8342_vm0, %v9961_v1 }
 0x4be   :  { %7020 = vmatprep.subr.bf16.mxu1 %v9961_v1 }
 0x4c0   :  { %7005 = vmatmul.mubr.msk.bf16.vlgmr.msra.gmra.mxu0 %vm634_vm4, %v601_v38 }
 0x4c1   :  { %7015 = vmatpush3.bf16.msra.mxu0 %v1126_v52  ;;  %7016 = vmatprep.mubr.msk.bf16.mxu0 %vm8342_vm0, %v9961_v1 }
 0x4c2   :  { %7026 = vmatprep.subr.bf16.mxu0 %v9961_v1 }
 0x4c4   :  { %7011 = vmatmul.mubr.msk.bf16.vlgmr.msra.gmra.mxu1 %vm634_vm4, %v602_v31 }
 0x4c5   :  { %7021 = vmatpush3.bf16.msra.mxu1 %v1172_v54  ;;  %7022 = vmatprep.mubr.msk.bf16.mxu1 %vm8342_vm0, %v9961_v1 }
 0x4c6   :  { %7032 = vmatprep.subr.bf16.mxu1 %v9961_v1 }
 0x4f9   :  { %v724_v55 = vpop.f32.mrf.mxu1 }
 0x4fa   :  { %v1028_v56 = vsel %vm1024_vm6, %v724_v55, -inf }
 0x4fb   :  { %v6976_v57 = vpop.f32.mrf.mxu1  ;;  %1029 = vmax.xlane.f32.xlu0 %v1028_v56 }
 0x4fd   :  { %v727_v58 = vpop.f32.mrf.mxu1 }
 0x4ff   :  { %v6977_v59 = vpop.f32.mrf.mxu1 }
 0x505   :  { %v675_v62 = vpop.f32.mrf.mxu0 }
 0x506   :  { %v1025_v3 = vsel %vm1024_vm6, %v675_v62, -inf }
 0x507   :  { %1026 = vmax.xlane.f32.xlu1 %v1025_v3  ;;  %v6970_v5 = vpop.f32.mrf.mxu0 }
 0x509   :  { %v678_v6 = vpop.f32.mrf.mxu0 }
 0x50b   :  { %v6971_v7 = vpop.f32.mrf.mxu0 }
 0x570   :  { %v773_v10 = vpop.f32.mrf.mxu0 }
 0x571   :  { %v1031_v11 = vsel %vm1024_vm6, %v773_v10, -inf }
 0x572   :  { %1032 = vmax.xlane.f32.xlu0 %v1031_v11  ;;  %v6982_v12 = vpop.f32.mrf.mxu0 }
 0x574   :  { %v776_v13 = vpop.f32.mrf.mxu0  ;;  %v822_v14 = vpop.f32.mrf.mxu1 }
 0x575   :  { %v1034_v15 = vsel %vm1024_vm6, %v822_v14, -inf }
 0x576   :  { %v6988_v8 = vpop.f32.mrf.mxu1  ;;  %1035 = vmax.xlane.f32.xlu1 %v1034_v15  ;;  %v6983_v16 = vpop.f32.mrf.mxu0 }
 0x578   :  { %v825_v17 = vpop.f32.mrf.mxu1  ;;  %v871_v19 = vpop.f32.mrf.mxu0 }
 0x579   :  { %v1037_v20 = vsel %vm1024_vm6, %v871_v19, -inf }
 0x57a   :  { %v6989_v21 = vpop.f32.mrf.mxu1  ;;  %1038 = vmax.xlane.f32.xlu0 %v1037_v20  ;;  %v6994_v22 = vpop.f32.mrf.mxu0 }
 0x57c   :  { %v874_v23 = vpop.f32.mrf.mxu0  ;;  %v920_v24 = vpop.f32.mrf.mxu1 }
 0x57d   :  { %v1040_v25 = vsel %vm1024_vm6, %v920_v24, -inf }
 0x57e   :  { %v7000_v26 = vpop.f32.mrf.mxu1  ;;  %1041 = vmax.xlane.f32.xlu1 %v1040_v25  ;;  %v6995_v27 = vpop.f32.mrf.mxu0 }
 0x580   :  { %v923_v28 = vpop.f32.mrf.mxu1  ;;  %v969_v29 = vpop.f32.mrf.mxu0 }
 0x581   :  { %v1043_v30 = vsel %vm1024_vm6, %v969_v29, -inf }
 0x582   :  { %v7001_v31 = vpop.f32.mrf.mxu1  ;;  %1044 = vmax.xlane.f32.xlu0 %v1043_v30  ;;  %v7006_v32 = vpop.f32.mrf.mxu0 }
 0x584   :  { %v1030_v33 = vpop.xlane.xlu0 %1029  ;;  %v972_v34 = vpop.f32.mrf.mxu0 }
 0x585   :  { %v1050_v35 = vsub.f32 %v724_v55, %v1030_v33  ;;  %v8664_v36 = vpop.f32.mrf.mxu1 }
 0x586   :  { %v1046_v37 = vsel %vm1024_vm6, %v8664_v36, -inf  ;;  %v7007_v38 = vpop.f32.mrf.mxu0 }
 0x587   :  { %v1059_v39 = vmul.f32 1.442695, %v1050_v35  ;;  %v7012_v40 = vpop.f32.mrf.mxu1  ;;  %1047 = vmax.xlane.f32.xlu1 %v1046_v37 }
 0x589   :  { %7746 = vpow2.f32 %v1059_v39  ;;  %v1021_v41 = vpop.f32.mrf.mxu1 }
 0x58b   :  { %v7013_v42 = vpop.f32.mrf.mxu1 }
 0x590   :  { %v1027_v43 = vpop.xlane.xlu1 %1026 }
 0x591   :  { %v1049_v44 = vsub.f32 %v675_v62, %v1027_v43 }
 0x593   :  { %v1057_v45 = vmul.f32 1.442695, %v1049_v44 }
 0x595   :  { %7748 = vpow2.f32 %v1057_v45 }
 0x596   :  { %v7747_v46 = vpop.eup %7746 }
 0x597   :  { %v1076_v47 = vsel %vm1024_vm6, %v7747_v46, 0.0 }
 0x598   :  { %1077 = vadd.xlane.f32.xlu1 %v1076_v47 }
 0x5a2   :  { %v7749_v48 = vpop.eup %7748 }
 0x5a3   :  { %v1073_v49 = vsel %vm1024_vm6, %v7749_v48, 0.0 }
 0x5a4   :  { %1074 = vadd.xlane.f32.xlu0 %v1073_v49 }
 0x5fb   :  { %v1033_v50 = vpop.xlane.xlu0 %1032 }
 0x5fc   :  { %v1051_v51 = vsub.f32 %v773_v10, %v1033_v50 }
 0x5fe   :  { %v1061_v52 = vmul.f32 1.442695, %v1051_v51 }
 0x5ff   :  { %v1036_v53 = vpop.xlane.xlu1 %1035 }
 0x600   :  { %7750 = vpow2.f32 %v1061_v52  ;;  %v1052_v54 = vsub.f32 %v822_v14, %v1036_v53 }
 0x602   :  { %v1063_v55 = vmul.f32 1.442695, %v1052_v54 }
 0x603   :  { %v1039_v56 = vpop.xlane.xlu0 %1038 }
 0x604   :  { %7752 = vpow2.f32 %v1063_v55  ;;  %v1053_v57 = vsub.f32 %v871_v19, %v1039_v56 }
 0x606   :  { %v1065_v58 = vmul.f32 1.442695, %v1053_v57 }
 0x607   :  { %v1042_v59 = vpop.xlane.xlu1 %1041 }
 0x608   :  { %7754 = vpow2.f32 %v1065_v58  ;;  %v1054_v62 = vsub.f32 %v920_v24, %v1042_v59 }
 0x60a   :  { %v1067_v3 = vmul.f32 1.442695, %v1054_v62 }
 0x60b   :  { %v1045_v5 = vpop.xlane.xlu0 %1044 }
 0x60c   :  { %7756 = vpow2.f32 %v1067_v3  ;;  %v1055_v6 = vsub.f32 %v969_v29, %v1045_v5 }
 0x60d   :  { %v7751_v7 = vpop.eup %7750 }
 0x60e   :  { %v1069_v11 = vmul.f32 1.442695, %v1055_v6  ;;  %v1079_v10 = vsel %vm1024_vm6, %v7751_v7, 0.0 }
 0x60f   :  { %1080 = vadd.xlane.f32.xlu0 %v1079_v10 }
 0x610   :  { %7758 = vpow2.f32 %v1069_v11  ;;  %v1048_v19 = vpop.xlane.xlu1 %1047 }
 0x611   :  { %v7753_v12 = vpop.eup %7752  ;;  %v1056_v26 = vsub.f32 %v8664_v36, %v1048_v19 }
 0x612   :  { %v1082_v13 = vsel %vm1024_vm6, %v7753_v12, 0.0 }
 0x613   :  { %1083 = vadd.xlane.f32.xlu1 %v1082_v13  ;;  %v1071_v28 = vmul.f32 1.442695, %v1056_v26 }
 0x615   :  { %v8672_v14 = vpop.eup %7754 }
 0x616   :  { %v1085_v15 = vsel %vm1024_vm6, %v8672_v14, 0.0 }
 0x617   :  { %1086 = vadd.xlane.f32.xlu0 %v1085_v15 }
 0x619   :  { %v8676_v8 = vpop.eup %7756 }
 0x61a   :  { %v1088_v16 = vsel %vm1024_vm6, %v8676_v8, 0.0 }
 0x61b   :  { %1089 = vadd.xlane.f32.xlu1 %v1088_v16 }
 0x61d   :  { %v8680_v17 = vpop.eup %7758 }
 0x61e   :  { %v1091_v20 = vsel %vm1024_vm6, %v8680_v17, 0.0 }
 0x61f   :  { %1092 = vadd.xlane.f32.xlu0 %v1091_v20 }
 0x621   :  { %v1078_v21 = vpop.xlane.xlu1 %1077 }
 0x622   :  { %7760 = vrcp.f32 %v1078_v21 }
 0x62c   :  { %7595 = vrot.lane.b32.xlu1 %v8598_v18, %s8344_s0 }
 0x62d   :  { %v1075_v22 = vpop.xlane.xlu0 %1074 }
 0x62e   :  { %7762 = vrcp.f32 %v1075_v22 }
 0x62f   :  { %v7761_v23 = vpop.eup %7760  ;;  %7764 = vpow2.f32 %v1071_v28 }
 0x630   :  { %v1106_v24 = vmul.f32 %v7761_v23, %v7747_v46 }
 0x632   :  { %v1114_v25 = vpack.c.bf16 %v1106_v24, %v1106_v24 }
 0x634   :  { %7023 = vmatmul.mubr.msk.bf16.vlgmr.msra.gmra.mxu1 %vm1024_vm6, %v1114_v25 }
 0x635   :  { %7590 = vrot.lane.b32.xlu0 %v8598_v18, %s8343_s16  ;;  %7034 = vmatprep.mubr.msk.bf16.mxu1 %vm8342_vm0, %v9961_v1 }
 0x63b   :  { %v7763_v27 = vpop.eup %7762 }
 0x63c   :  { %v1105_v29 = vmul.f32 %v7763_v27, %v7749_v48  ;;  %v8695_v31 = vpop.eup %7764 }
 0x63d   :  { %v1094_v32 = vsel %vm1024_vm6, %v8695_v31, 0.0 }
 0x63e   :  { %v1113_v30 = vpack.c.bf16 %v1105_v29, %v1105_v29 }
 0x640   :  { %7017 = vmatmul.mubr.msk.bf16.vlgmr.msra.gmra.mxu0 %vm1024_vm6, %v1113_v30 }
 0x641   :  { %7028 = vmatprep.mubr.msk.bf16.mxu0 %vm8342_vm0, %v9961_v1 }
 0x650   :  { %1095 = vadd.xlane.f32.xlu1 %v1094_v32 }
 0x661   :  { %7600 = vrot.lane.b32.xlu1 %v8598_v18, %s8345_s24 }
 0x698   :  { %v1081_v33 = vpop.xlane.xlu0 %1080 }
 0x699   :  { %7766 = vrcp.f32 %v1081_v33  ;;  %v7696_v33 = vld [vmem:[%s9997_s25 + $0x18] sm:$0xff]  }
 0x69c   :  { %v1084_v34 = vpop.xlane.xlu1 %1083 }
 0x69d   :  { %7768 = vrcp.f32 %v1084_v34 }
 0x6a0   :  { %v1087_v35 = vpop.xlane.xlu0 %1086 }
 0x6a1   :  { %7770 = vrcp.f32 %v1087_v35 }
 0x6a4   :  { %v1090_v36 = vpop.xlane.xlu1 %1089 }
 0x6a5   :  { %7772 = vrcp.f32 %v1090_v36  ;;  %v7697_v36 = vld [vmem:[%s9997_s25 + $0x10] sm:$0xff]  }
 0x6a6   :  { %v7767_v39 = vpop.eup %7766 }
 0x6a7   :  { %v1107_v18 = vmul.f32 %v7767_v39, %v7751_v7 }
 0x6a8   :  { %v1093_v37 = vpop.xlane.xlu0 %1092  ;;  %v7596_v38 = vpop.permute.xlu1 %7595 }
 0x6a9   :  { %v7598_v42 = vunpack.i.h.bf16 %v7596_v38  ;;  %v7597_v43 = vunpack.i.l.bf16 %v7596_v38  ;;  %v1115_v54 = vpack.c.bf16 %v1107_v18, %v1107_v18  ;;  %7774 = vrcp.f32 %v1093_v37 }
 0x6aa   :  { %v7769_v40 = vpop.eup %7768 }
 0x6ab   :  { %v1108_v48 = vmul.f32 %v7769_v40, %v7753_v12  ;;  %v628_v49 = vpack.c.bf16 %v7598_v42, %v7598_v42  ;;  %v627_v50 = vpack.c.bf16 %v7597_v43, %v7597_v43  ;;  %v7698_v40 = vld [vmem:[%s9997_s25 + $0x8] sm:$0xff]  }
 0x6ac   :  { %v7591_v41 = vpop.permute.xlu0 %7590 }
 0x6ad   :  { %v7593_v44 = vunpack.i.h.bf16 %v7591_v41  ;;  %v7592_v45 = vunpack.i.l.bf16 %v7591_v41  ;;  %v1116_v55 = vpack.c.bf16 %v1108_v48, %v1108_v48  ;;  %v1310_v57 = vsel %vm1124_vm5, %v627_v50, 0 }
 0x6ae   :  { %v7771_v53 = vpop.eup %7770  ;;  %v1356_v58 = vsel %vm1124_vm5, %v628_v49, 0  ;;  %v7699_v49 = vld [vmem:[%s9997_s25] sm:$0xff]  }
 0x6af   :  { %v626_v46 = vpack.c.bf16 %v7593_v44, %v7593_v44  ;;  %v625_v47 = vpack.c.bf16 %v7592_v45, %v7592_v45  ;;  %v1109_v59 = vmul.f32 %v7771_v53, %v8672_v14 }
 0x6b1   :  { %v1218_v51 = vsel %vm1124_vm5, %v625_v47, 0  ;;  %v1264_v52 = vsel %vm1124_vm5, %v626_v46, 0  ;;  %v1117_v3 = vpack.c.bf16 %v1109_v59, %v1109_v59 }
 0x6b2   :  { %7027 = vmatpush3.bf16.msra.mxu0 %v1218_v51  ;;  %7033 = vmatpush3.bf16.msra.mxu1 %v1264_v52  ;;  %v7773_v56 = vpop.eup %7772 }
 0x6b3   :  { %7038 = vmatprep.subr.bf16.mxu0 %v9961_v1  ;;  %7044 = vmatprep.subr.bf16.mxu1 %v9961_v1  ;;  %v1110_v62 = vmul.f32 %v7773_v56, %v8676_v8 }
 0x6b5   :  { %7029 = vmatmul.mubr.msk.bf16.vlgmr.msra.gmra.mxu0 %vm1024_vm6, %v1115_v54  ;;  %7035 = vmatmul.mubr.msk.bf16.vlgmr.msra.gmra.mxu1 %vm1024_vm6, %v1116_v55  ;;  %v1118_v5 = vpack.c.bf16 %v1110_v62, %v1110_v62 }
 0x6b6   :  { %7039 = vmatpush3.bf16.msra.mxu0 %v1310_v57  ;;  %7045 = vmatpush3.bf16.msra.mxu1 %v1356_v58  ;;  %v7775_v7 = vpop.eup %7774 }
 0x6b7   :  { %7040 = vmatprep.mubr.msk.bf16.mxu0 %vm8342_vm0, %v9961_v1  ;;  %7046 = vmatprep.mubr.msk.bf16.mxu1 %vm8342_vm0, %v9961_v1  ;;  %v1111_v15 = vmul.f32 %v7775_v7, %v8680_v17 }
 0x6b8   :  { %7050 = vmatprep.subr.bf16.mxu0 %v9961_v1  ;;  %7056 = vmatprep.subr.bf16.mxu1 %v9961_v1 }
 0x6b9   :  { %v1119_v19 = vpack.c.bf16 %v1111_v15, %v1111_v15 }
 0x6bd   :  { %7041 = vmatmul.mubr.msk.bf16.vlgmr.msra.gmra.mxu0 %vm1024_vm6, %v1117_v3  ;;  %7047 = vmatmul.mubr.msk.bf16.vlgmr.msra.gmra.mxu1 %vm1024_vm6, %v1118_v5 }
 0x6be   :  { %7052 = vmatprep.mubr.msk.bf16.mxu0 %vm8342_vm0, %v9961_v1  ;;  %7058 = vmatprep.mubr.msk.bf16.mxu1 %vm8342_vm0, %v9961_v1 }
 0x6d9   :  { %v1096_v6 = vpop.xlane.xlu1 %1095 }
 0x6da   :  { %7776 = vrcp.f32 %v1096_v6 }
 0x6dd   :  { %v7601_v11 = vpop.permute.xlu1 %7600 }
 0x6de   :  { %v7603_v10 = vunpack.i.h.bf16 %v7601_v11  ;;  %v7602_v12 = vunpack.i.l.bf16 %v7601_v11 }
 0x6e0   :  { %v630_v13 = vpack.c.bf16 %v7603_v10, %v7603_v10  ;;  %v629_v14 = vpack.c.bf16 %v7602_v12, %v7602_v12 }
 0x6e2   :  { %v1402_v8 = vsel %vm1124_vm5, %v629_v14, 0  ;;  %v1448_v16 = vsel %vm1124_vm5, %v630_v13, 0 }
 0x6e3   :  { %7051 = vmatpush3.bf16.msra.mxu0 %v1402_v8  ;;  %7057 = vmatpush3.bf16.msra.mxu1 %v1448_v16 }
 0x6e4   :  { %7062 = vmatprep.subr.bf16.mxu0 %v9961_v1 }
 0x6e6   :  { %7053 = vmatmul.mubr.msk.bf16.vlgmr.msra.gmra.mxu0 %vm1024_vm6, %v1119_v19 }
 0x6e7   :  { %v7777_v20 = vpop.eup %7776  ;;  %7070 = vmatprep.mubr.msk.bf16.mxu0 %vm8342_vm0, %v9961_v1  ;;  %7063 = vmatpush3.bf16.msra.mxu0 %v7696_v33 }
 0x6e8   :  { %v1112_v21 = vmul.f32 %v7777_v20, %v8695_v31  ;;  %7064 = vmatprep.subr.bf16.mxu0 %v9961_v1 }
 0x6ea   :  { %v1120_v22 = vpack.c.bf16 %v1112_v21, %v1112_v21  ;;  %v6613_v21 = vld [vmem:[#allocation10] ss:$0 sm:$0xff] }
 0x6eb   :  { %7065 = vmatpush3.bf16.msra.mxu0 %v7697_v36  ;;  %v7702_v36 = vld [vmem:[%s9999_s26 + $0x34] ss:$8 sps:$4 sm:$0xff]  }
 0x6ec   :  { %7059 = vmatmul.mubr.msk.bf16.vlgmr.msra.gmra.mxu1 %vm1024_vm6, %v1120_v22  ;;  %7066 = vmatprep.subr.bf16.mxu0 %v9961_v1 }
 0x6ed   :  { %1743 = vmatprep.mubr.bf16.mxu1 %v8340_v0  ;;  %1719 = vmatprep.subr.bf16.mxu1 %v7702_v36  ;;  %v1656_v36 = vld [vmem:[#allocation13] sm:$0x3] }
 0x6ef   :  { %7067 = vmatpush3.bf16.msra.mxu0 %v7698_v40  ;;  %v7711_v40 = vld [vmem:[%s9999_s26 + $0x4] ss:$8 sps:$4 sm:$0xff]  }
 0x6f0   :  { %7068 = vmatprep.subr.bf16.mxu0 %v9961_v1 }
 0x6f3   :  { %7069 = vmatpush3.bf16.msra.mxu0 %v7699_v49 }
 0x6f4   :  { %v1208_v17 = vpop.f32.mrf.mxu1 }
 0x6f6   :  { %v7024_v23 = vpop.f32.mrf.mxu1 }
 0x6f8   :  { %v1211_v24 = vpop.f32.mrf.mxu1 }
 0x6fa   :  { %v7025_v25 = vpop.f32.mrf.mxu1 }
 0x700   :  { %v1162_v26 = vpop.f32.mrf.mxu0 }
 0x702   :  { %v7018_v27 = vpop.f32.mrf.mxu0 }
 0x704   :  { %v1165_v28 = vpop.f32.mrf.mxu0 }
 0x706   :  { %v7019_v29 = vpop.f32.mrf.mxu0 }
 0x775   :  { %v1254_v30 = vpop.f32.mrf.mxu0  ;;  %v1300_v32 = vpop.f32.mrf.mxu1 }
 0x776   :  { %v7604_v34 = vpack.i.bf16 %v1300_v32, %v1254_v30 }
 0x777   :  { %v7030_v31 = vpop.f32.mrf.mxu0  ;;  %v7036_v35 = vpop.f32.mrf.mxu1 }
 0x778   :  { %7605 = vrot.lane.b32.xlu0 %v7604_v34, %s8346_s18  ;;  %v2019_v31 = vld [vmem:[%s9998_s23 + $0x8] sm:$0xff]  ;;  %v2018_v35 = vld [vmem:[%s9998_s23] sm:$0xff] }
 0x779   :  { %v1257_v0 = vpop.f32.mrf.mxu0  ;;  %v1303_v37 = vpop.f32.mrf.mxu1 }
 0x77a   :  { %v7705_v0 = vld [vmem:[%s9999_s26 + $0x24] ss:$8 sps:$4 sm:$0xff]   ;;  %v7703_v37 = vld [vmem:[%s9999_s26 + $0x20] ss:$8 sps:$4 sm:$0xff]  }
 0x77b   :  { %v7031_v38 = vpop.f32.mrf.mxu0  ;;  %v7037_v39 = vpop.f32.mrf.mxu1 }
 0x77c   :  { %v7708_v38 = vld [vmem:[%s9999_s26 + $0x14] ss:$8 sps:$4 sm:$0xff]   ;;  %v7706_v39 = vld [vmem:[%s9999_s26 + $0x10] ss:$8 sps:$4 sm:$0xff]  }
 0x77d   :  { %v1346_v41 = vpop.f32.mrf.mxu0  ;;  %v1392_v42 = vpop.f32.mrf.mxu1 }
 0x77e   :  { %v7609_v43 = vpack.i.bf16 %v1392_v42, %v1346_v41  ;;  %v7709_v41 = vld [vmem:[%s9999_s26] ss:$8 sps:$4 sm:$0xff]  }
 0x77f   :  { %v7042_v44 = vpop.f32.mrf.mxu0  ;;  %v7048_v45 = vpop.f32.mrf.mxu1 }
 0x780   :  { %7610 = vrot.lane.b32.xlu1 %v7609_v43, %s8347_s14 }
 0x781   :  { %v1349_v46 = vpop.f32.mrf.mxu0  ;;  %v1395_v47 = vpop.f32.mrf.mxu1 }
 0x783   :  { %v7043_v18 = vpop.f32.mrf.mxu0  ;;  %v7049_v48 = vpop.f32.mrf.mxu1 }
 0x7a6   :  { %v1438_v50 = vpop.f32.mrf.mxu0 }
 0x7a8   :  { %v7054_v51 = vpop.f32.mrf.mxu0 }
 0x7aa   :  { %v1441_v52 = vpop.f32.mrf.mxu0 }
 0x7ac   :  { %v7055_v53 = vpop.f32.mrf.mxu0  ;;  %v1484_v54 = vpop.f32.mrf.mxu1 }
 0x7ad   :  { %v7614_v55 = vpack.i.bf16 %v1484_v54, %v1438_v50 }
 0x7ae   :  { %v7060_v56 = vpop.f32.mrf.mxu1 }
 0x7af   :  { %7615 = vrot.lane.b32.xlu0 %v7614_v55, %s8348_s22 }
 0x7b0   :  { %v1487_v57 = vpop.f32.mrf.mxu1 }
 0x7b1   :  { %v6619_v57 = vld [vmem:[%s10000_s28] ss:$0 sm:$0xff] }
 0x7b2   :  { %v7061_v58 = vpop.f32.mrf.mxu1 }
 0x7ea   :  { %v7606_v59 = vpop.permute.xlu0 %7605 }
 0x7eb   :  { %v7608_v3 = vunpack.i.h.bf16 %v7606_v59  ;;  %v7607_v5 = vunpack.i.l.bf16 %v7606_v59 }
 0x7ed   :  { %v1515_v10 = vsel %vm634_vm4, %v1208_v17, %v7608_v3  ;;  %v1514_v12 = vsel %vm634_vm4, %v1162_v26, %v7607_v5 }
 0x7f2   :  { %v7611_v62 = vpop.permute.xlu1 %7610 }
 0x7f3   :  { %v7613_v6 = vunpack.i.h.bf16 %v7611_v62  ;;  %v7612_v7 = vunpack.i.l.bf16 %v7611_v62 }
 0x7f5   :  { %v1518_v15 = vsel %vm1516_vm7, %v1515_v10, %v7613_v6  ;;  %v1517_v8 = vsel %vm1516_vm7, %v1514_v12, %v7612_v7  ;;  %v6620_v6 = vld [vmem:[#allocation11] ss:$0 sm:$0xff] }
 0x821   :  { %v7616_v11 = vpop.permute.xlu0 %7615 }
 0x822   :  { %v7618_v13 = vunpack.i.h.bf16 %v7616_v11  ;;  %v7617_v14 = vunpack.i.l.bf16 %v7616_v11 }
 0x824   :  { %v1521_v16 = vsel %vm1519_vm8, %v1518_v15, %v7618_v13  ;;  %v1520_v19 = vsel %vm1519_vm8, %v1517_v8, %v7617_v14  ;;  %v7712_v14 = vld [vmem:[%s10001_s4 + $0x8] sm:$0xff]   ;;  %v7713_v8 = vld [vmem:[%s10001_s4] sm:$0xff]  }
 0x825   :  { %v1522_v20 = vpack.c.bf16 %v1521_v16, %v1520_v19 }
 0x827   :  { %7071 = vmatmul.mubr.msk.bf16.vlgmr.msra.gmra.mxu0 %vm362_vm3, %v1522_v20 }
 0x8e7   :  { %v1590_v22 = vpop.f32.mrf.mxu0 }
 0x8e8   :  { %v1591_v23 = vadd.f32 %v6613_v21, %v1590_v22  ;;  %v7715_v22 = vld [vmem:[%s10005_s1 + $0x8] sm:$0xff]  }
 0x8e9   :  { %v7072_v24 = vpop.f32.mrf.mxu0 }
 0x8ea   :  { %v1597_v17 = vadd.f32 %v1591_v23, %v8570_v60  ;;  %v7716_v23 = vld [vmem:[%s10004_s6 + $0x38] sm:$0xff]   ;;  %v7717_v24 = vld [vmem:[%s10004_s6 + $0x70] sm:$0xff]  }
 0x8eb   :  { %v1593_v25 = vpop.f32.mrf.mxu0 }
 0x8ec   :  { %v1594_v26 = vadd.f32 %v6613_v21, %v1593_v25  ;;  %v1601_v27 = vsel %vm362_vm3, %v1597_v17, 0.0  ;;  %v1609_v33 = vmul.f32 %v1597_v17, %v1597_v17  ;;  %v7714_v21 = vld [vmem:[%s10004_s6 + $0x78] sm:$0xff]   ;;  %v7719_v25 = vld [vmem:[%s10004_s6 + $0x30] sm:$0xff]  }
 0x8ed   :  { %1602 = vadd.xlane.f32.xlu1 %v1601_v27  ;;  %v7073_v28 = vpop.f32.mrf.mxu0  ;;  %6784 = vmatprep.subr.bf16.mxu0 %v7714_v21  ;;  %v7721_v27 = vld [vmem:[%s10004_s6 + $0x28] sm:$0xff]  }
 0x8ee   :  { %v1598_v29 = vadd.f32 %v1594_v26, %v8572_v61  ;;  %v1611_v34 = vsel %vm362_vm3, %v1609_v33, 0.0  ;;  %v7700_v61 = vld [vmem:[%s9999_s26 + $0x30] ss:$8 sps:$4 sm:$0xff]   ;;  %6785 = vmatpush3.bf16.msra.mxu0 %v7716_v23  ;;  %v7720_v26 = vld [vmem:[%s10004_s6 + $0x68] sm:$0xff]   ;;  %v7722_v28 = vld [vmem:[%s10004_s6 + $0x60] sm:$0xff]  }
 0x8ef   :  { %1720 = vmatpush1.bf16.msra.mxu1 %v7700_v61  ;;  %6786 = vmatprep.subr.bf16.mxu0 %v7717_v24  ;;  %v7726_v33 = vld [vmem:[%s10004_s6 + $0x50] sm:$0xff]   ;;  %v7731_v61 = vld [vmem:[%s10004_s6] sm:$0xff]  }
 0x8f0   :  { %v1604_v30 = vsel %vm362_vm3, %v1598_v29, 0.0  ;;  %v1610_v32 = vmul.f32 %v1598_v29, %v1598_v29  ;;  %1721 = vmatprep.subr.bf16.mxu1 %v7705_v0  ;;  %v1661_v0 = vrot.slane %v1656_v36, %v8583_v2 }
 0x8f1   :  { %1605 = vadd.xlane.f32.xlu0 %v1604_v30  ;;  %v7724_v30 = vld [vmem:[%s10004_s6 + $0x58] sm:$0xff]  }
 0x8f2   :  { %v1614_v60 = vsel %vm362_vm3, %v1610_v32, 0.0  ;;  %6787 = vmatpush3.bf16.msra.mxu0 %v7719_v25  ;;  %v7725_v32 = vld [vmem:[%s10004_s6 + $0x18] sm:$0xff]  }
 0x8f3   :  { %1615 = vadd.xlane.f32.xlu1 %v1614_v60  ;;  %1722 = vmatpush1.bf16.msra.mxu1 %v7703_v37  ;;  %v7727_v60 = vld [vmem:[%s10004_s6 + $0x10] sm:$0xff]   ;;  %v1665_v37 = vrot.slane %v1656_v36, %v8586_v4 }
 0x8f4   :  { %1723 = vmatprep.subr.bf16.mxu1 %v7708_v38  ;;  %6788 = vmatprep.subr.bf16.mxu0 %v7720_v26 }
 0x8f5   :  { %1612 = vadd.xlane.f32.xlu0 %v1611_v34  ;;  %v7728_v34 = vld [vmem:[%s10004_s6 + $0x48] sm:$0xff]  }
 0x8f6   :  { %6789 = vmatpush3.bf16.msra.mxu0 %v7721_v27 }
 0x8f7   :  { %1724 = vmatpush1.bf16.msra.mxu1 %v7706_v39  ;;  %6790 = vmatprep.subr.bf16.mxu0 %v7722_v28 }
 0x8f8   :  { %1725 = vmatprep.subr.bf16.mxu1 %v7711_v40 }
 0x8fb   :  { %1726 = vmatpush1.bf16.msra.mxu1 %v7709_v41 }
 0x8fc   :  { %7074 = vmatprep.subr.bf16.mxu1 %v9961_v1 }
 0x904   :  { %2024 = vperm.xlu1 %7619, %v2019_v31   ;;  %v7729_v31 = vld [vmem:[%s10004_s6 + $0x8] sm:$0xff]  }
 0x90b   :  { %2021 = vperm.xlu0 %7573, %v2018_v35   ;;  %v7730_v35 = vld [vmem:[%s10004_s6 + $0x40] sm:$0xff]  }
 0x976   :  { %v1603_v42 = vpop.xlane.xlu1 %1602 }
 0x977   :  { %v1607_v44 = vmul.f32 0.015625, %v1603_v42 }
 0x979   :  { %v1619_v49 = vmul.f32 %v1607_v44, %v1607_v44  ;;  %v1623_v58 = vsub.f32 %v1597_v17, %v1607_v44  ;;  %v7718_v17 = vld [vmem:[%s10005_s1] sm:$0xff]  }
 0x97a   :  { %v1606_v43 = vpop.xlane.xlu0 %1605 }
 0x97b   :  { %v1608_v45 = vmul.f32 0.015625, %v1606_v43 }
 0x97c   :  { %v1616_v46 = vpop.xlane.xlu1 %1615 }
 0x97d   :  { %v1620_v47 = vmul.f32 %v1608_v45, %v1608_v45  ;;  %v1618_v18 = vmul.f32 0.015625, %v1616_v46  ;;  %v1624_v55 = vsub.f32 %v1598_v29, %v1608_v45  ;;  %v7723_v29 = vld [vmem:[%s10004_s6 + $0x20] sm:$0xff]  }
 0x97e   :  { %v1613_v48 = vpop.xlane.xlu0 %1612  ;;  %6791 = vmatpush3.bf16.msra.mxu0 %v7723_v29 }
 0x97f   :  { %v1622_v50 = vsub.f32 %v1618_v18, %v1620_v47  ;;  %v1617_v51 = vmul.f32 0.015625, %v1613_v48  ;;  %6792 = vmatprep.subr.bf16.mxu0 %v7724_v30 }
 0x980   :  { %v2025_v12 = vpop.permute.xlu1 %2024 }
 0x981   :  { %v1626_v52 = vadd.f32 1e-05, %v1622_v50  ;;  %v1621_v53 = vsub.f32 %v1617_v51, %v1619_v49  ;;  %vm2027_vm9 = vcmp.eq.s32.totalorder %v2025_v12, %v8548_v9 }
 0x982   :  { %v6650_v16 = vsel %vm2027_vm9, 1.0, %v9961_v1  ;;  %6793 = vmatpush3.bf16.msra.mxu0 %v7725_v32 }
 0x983   :  { %7778 = vrsqrt.f32 %v1626_v52  ;;  %v1625_v54 = vadd.f32 1e-05, %v1621_v53  ;;  %6794 = vmatprep.subr.bf16.mxu0 %v7726_v33 }
 0x985   :  { %7780 = vrsqrt.f32 %v1625_v54 }
 0x986   :  { %v2022_v13 = vpop.permute.xlu0 %2021  ;;  %6795 = vmatpush3.bf16.msra.mxu0 %v7727_v60 }
 0x987   :  { %vm2026_vm10 = vcmp.eq.s32.totalorder %v2022_v13, %v8548_v9  ;;  %6796 = vmatprep.subr.bf16.mxu0 %v7728_v34 }
 0x988   :  { %v6649_v19 = vsel %vm2026_vm10, 1.0, %v9961_v1 }
 0x989   :  { %v2032_v20 = vpack.c.bf16 %v6650_v16, %v6649_v19 }
 0x98a   :  { %6797 = vmatpush3.bf16.msra.mxu0 %v7729_v31  ;;  %v8349_v31 = vmov 1983009808  }
 0x98b   :  { %6798 = vmatprep.subr.bf16.mxu0 %v7730_v35  ;;  %v2163_v35 = vunpack.c.l.s4 %v8349_v31 }
 0x98d   :  { %v2164_v36 = vunpack.c.0.s8 %v2163_v35 }
 0x98e   :  { %6799 = vmatpush3.bf16.msra.mxu0 %v7731_v61  ;;  %v6654_v61 = vld [vmem:[#allocation19] ss:$0 sm:$0xff] }
 0x98f   :  { %7102 = vmatprep.subr.bf16.mxu0 %v9961_v1 }
 0x990   :  { %v7779_v56 = vpop.eup %7778 }
 0x991   :  { %v1630_v59 = vmul.f32 %v7779_v56, %v1624_v55 }
 0x992   :  { %v7781_v62 = vpop.eup %7780 }
 0x993   :  { %v1629_v3 = vmul.f32 %v7781_v62, %v1623_v58  ;;  %v1638_v5 = vmul.f32 %v6619_v57, %v1630_v59 }
 0x995   :  { %v1637_v7 = vmul.f32 %v6619_v57, %v1629_v3  ;;  %v8766_v10 = vadd.f32 %v6620_v6, %v1638_v5 }
 0x997   :  { %v8764_v11 = vadd.f32 %v6620_v6, %v1637_v7  ;;  %10003 = vst [vmem:[#allocation56_spill] sm:$0xff] %v8766_v10 }
 0x999   :  { %10002 = vst [vmem:[#allocation55_spill] sm:$0xff] %v8764_v11  ;;  %v1655_v15 = vpack.c.bf16 %v8766_v10, %v8764_v11 }
 0x99b   :  { %6629 = vmatmul.mubr.msk.bf16.vlgmr.msra.gmra.mxu1 %vm362_vm3, %v1655_v15 }
 0x99c   :  { %7075 = vmatpush3.bf16.msra.mxu1 %v7712_v14  ;;  %7078 = vmatprep.mubr.msk.bf16.mxu1 %vm8342_vm0, %v9961_v1 }
 0x99d   :  { %7076 = vmatprep.subr.bf16.mxu1 %v9961_v1 }
 0x9a0   :  { %7077 = vmatpush3.bf16.msra.mxu1 %v7713_v8 }
 0x9a1   :  { %7082 = vmatprep.subr.bf16.mxu1 %v9961_v1 }
 0x9a3   :  { %7079 = vmatmul.mubr.msk.bf16.vlgmr.msra.gmra.mxu1 %vm1516_vm7, %v2032_v20 }
 0x9a4   :  { %7086 = vmatprep.mubr.msk.bf16.mxu1 %vm8342_vm0, %v9961_v1  ;;  %7083 = vmatpush3.bf16.msra.mxu1 %v7715_v22 }
 0x9a5   :  { %7084 = vmatprep.subr.bf16.mxu1 %v9961_v1 }
 0x9a8   :  { %7085 = vmatpush3.bf16.msra.mxu1 %v7718_v17 }
 0x9a9   :  { %7090 = vmatprep.subr.bf16.mxu1 %v9961_v1 }
 0xa5b   :  { %v1745_v38 = vpop.f32.mrf.mxu1 }
 0xa5c   :  { %v1746_v39 = vadd.f32 %v1745_v38, %v1661_v0 }
 0xa5d   :  { %v1747_v40 = vpop.f32.mrf.mxu1 }
 0xa5e   :  { %v1758_v41 = vmul.f32 0.044715, %v1746_v39  ;;  %v1748_v42 = vadd.f32 %v1747_v40, %v1665_v37  ;;  %v1754_v28 = vmul.f32 0.5, %v1746_v39 }
 0xa5f   :  { %v1749_v43 = vpop.f32.mrf.mxu1 }
 0xa60   :  { %v1762_v44 = vmul.f32 %v1758_v41, %v1746_v39  ;;  %v1759_v45 = vmul.f32 0.044715, %v1748_v42  ;;  %v1750_v46 = vadd.f32 %v1749_v43, %v1661_v0  ;;  %v1755_v25 = vmul.f32 0.5, %v1748_v42 }
 0xa61   :  { %v1751_v47 = vpop.f32.mrf.mxu1  ;;  %v8350_v0 = vmov 1934713408   ;;  %v8813_v41 = vsub.s32 %v2164_v36, %v8580_v63 }
 0xa62   :  { %v1766_v18 = vmul.f32 %v1762_v44, %v1746_v39  ;;  %v1763_v48 = vmul.f32 %v1759_v45, %v1748_v42  ;;  %v1760_v49 = vmul.f32 0.044715, %v1750_v46  ;;  %v1752_v50 = vadd.f32 %v1751_v47, %v1665_v37 }
 0xa63   :  { %v2086_v51 = vpop.f32.mrf.mxu1  ;;  %v1756_v24 = vmul.f32 0.5, %v1750_v46  ;;  %v2194_v37 = vunpack.c.l.s4 %v8350_v0  ;;  %10006 = vst [vmem:[#allocation57_spill] sm:$0xff] %v8813_v41 }
 0xa64   :  { %v1770_v52 = vadd.f32 %v1766_v18, %v1746_v39  ;;  %v1767_v53 = vmul.f32 %v1763_v48, %v1748_v42  ;;  %v1764_v54 = vmul.f32 %v1760_v49, %v1750_v46  ;;  %v1761_v55 = vmul.f32 0.044715, %v1752_v50 }
 0xa65   :  { %v7080_v56 = vpop.f32.mrf.mxu1  ;;  %v1757_v26 = vmul.f32 0.5, %v1752_v50 }
 0xa66   :  { %v1774_v57 = vmul.f32 0.7978846, %v1770_v52  ;;  %v1768_v58 = vmul.f32 %v1764_v54, %v1750_v46  ;;  %v1765_v59 = vmul.f32 %v1761_v55, %v1752_v50  ;;  %v1771_v62 = vadd.f32 %v1767_v53, %v1748_v42 }
 0xa67   :  { %v2089_v3 = vpop.f32.mrf.mxu1  ;;  %v2195_v42 = vunpack.c.0.s8 %v2194_v37 }
 0xa68   :  { %v1772_v5 = vadd.f32 %v1768_v58, %v1750_v46  ;;  %v1769_v6 = vmul.f32 %v1765_v59, %v1752_v50  ;;  %v2097_v7 = vpack.c.bf16 %v2089_v3, %v2086_v51  ;;  %v1775_v13 = vmul.f32 0.7978846, %v1771_v62 }
 0xa69   :  { %v7081_v12 = vpop.f32.mrf.mxu1  ;;  %7782 = vtanh.f32 %v1774_v57  ;;  %v8817_v47 = vsub.s32 %v2195_v42, %v8580_v63 }
 0xa6a   :  { %v1776_v14 = vmul.f32 0.7978846, %v1772_v5  ;;  %7087 = vmatmul.mubr.msk.bf16.vlgmr.msra.gmra.mxu1 %vm1516_vm7, %v2097_v7  ;;  %v1773_v15 = vadd.f32 %v1769_v6, %v1752_v50  ;;  %7784 = vtanh.f32 %v1775_v13 }
 0xa6b   :  { %7092 = vmatprep.mubr.msk.bf16.mxu1 %vm8342_vm0, %v9961_v1  ;;  %10007 = vst [vmem:[#allocation58_spill] sm:$0xff] %v8817_v47 }
 0xa6c   :  { %7786 = vtanh.f32 %v1776_v14  ;;  %v1777_v8 = vmul.f32 0.7978846, %v1773_v15 }
 0xa6e   :  { %7788 = vtanh.f32 %v1777_v8 }
 0xa76   :  { %v7783_v16 = vpop.eup %7782 }
 0xa77   :  { %v7785_v19 = vpop.eup %7784  ;;  %v1782_v17 = vadd.f32 1.0, %v7783_v16 }
 0xa78   :  { %v1783_v21 = vadd.f32 1.0, %v7785_v19  ;;  %v6630_v19 = vld [vmem:[#allocation14] ss:$0 sm:$0xff] }
 0xa79   :  { %v7787_v20 = vpop.eup %7786  ;;  %v1786_v33 = vmul.f32 %v1782_v17, %v1754_v28 }
 0xa7a   :  { %v1784_v22 = vadd.f32 1.0, %v7787_v20  ;;  %v1787_v30 = vmul.f32 %v1783_v21, %v1755_v25 }
 0xa7b   :  { %v7789_v23 = vpop.eup %7788 }
 0xa7c   :  { %v1785_v27 = vadd.f32 1.0, %v7789_v23  ;;  %v1788_v29 = vmul.f32 %v1784_v22, %v1756_v24 }
 0xa7e   :  { %v1789_v32 = vmul.f32 %v1785_v27, %v1757_v26  ;;  %v1822_v34 = vpack.c.bf16 %v1788_v29, %v1786_v33 }
 0xa80   :  { %v1823_v60 = vpack.c.bf16 %v1789_v32, %v1787_v30 }
 0xa82   :  { %1959 = vmatprep.mubr.bf16.mxu0 %v1823_v60 }
 0xa83   :  { %1960 = vmatmul.mubr.bf16.vlgmr.msra.gmra.mxu0 %v1822_v34 }
 0xa84   :  { %7104 = vmatprep.mubr.msk.bf16.mxu0 %vm8342_vm0, %v9961_v1 }
 0xb2a   :  { %v2154_v38 = vpop.f32.mrf.mxu1 }
 0xb2b   :  { %v2155_v40 = vadd.f32 %v6654_v61, %v2154_v38 }
 0xb2c   :  { %v7088_v39 = vpop.f32.mrf.mxu1 }
 0xb2d   :  { %v2161_v44 = vcombine.high %v2155_v40, %v9961_v1  ;;  %v2168_v18 = vrot.slane %v2155_v40, %v8813_v41 }
 0xb2e   :  { %v2157_v43 = vpop.f32.mrf.mxu1 }
 0xb2f   :  { %v2158_v45 = vadd.f32 %v6654_v61, %v2157_v43  ;;  %v2175_v50 = vrot.slane %v2161_v44, %v8813_v41 }
 0xb30   :  { %v7089_v46 = vpop.f32.mrf.mxu1 }
 0xb31   :  { %v2176_v48 = vcombine.high %v2158_v45, %v9961_v1  ;;  %v2183_v49 = vrot.slane %v2158_v45, %v8813_v41 }
 0xb33   :  { %v2190_v51 = vrot.slane %v2176_v48, %v8813_v41  ;;  %v2191_v52 = vcombine.low %v2168_v18, %v2183_v49  ;;  %v2192_v53 = vcombine.high %v2168_v18, %v2183_v49 }
 0xb35   :  { %v2199_v54 = vrot.slane %v2191_v52, %v8817_v47  ;;  %v2206_v55 = vrot.slane %v2192_v53, %v8817_v47  ;;  %v2207_v56 = vcombine.low %v2175_v50, %v2190_v51  ;;  %v2208_v57 = vcombine.high %v2175_v50, %v2190_v51 }
 0xb37   :  { %v2215_v58 = vrot.slane %v2207_v56, %v8817_v47  ;;  %v2222_v59 = vrot.slane %v2208_v57, %v8817_v47  ;;  %v2224_v62 = vcombine.high %v2206_v55, %v9961_v1  ;;  %v2223_v3 = vcombine.high %v2199_v54, %v9961_v1 }
 0xb38   :  { %v8835_v13 = vpack.c.bf16 %v2199_v54, %v2199_v54  ;;  %v8849_v21 = vpack.c.bf16 %v2206_v55, %v2206_v55 }
 0xb39   :  { %v8830_v5 = vpack.i.bf16 %v2224_v62, %v2206_v55  ;;  %v7620_v6 = vpack.i.bf16 %v2223_v3, %v2199_v54  ;;  %v2225_v7 = vcombine.high %v2215_v58, %v9961_v1  ;;  %v2226_v12 = vcombine.high %v2222_v59, %v9961_v1 }
 0xb3a   :  { %v8844_v8 = vpack.c.bf16 %v2223_v3, %v2223_v3  ;;  %v8856_v24 = vpack.c.bf16 %v2224_v62, %v2224_v62  ;;  %v8862_v17 = vpack.c.bf16 %v2215_v58, %v2215_v58  ;;  %v8870_v26 = vpack.c.bf16 %v2222_v59, %v2222_v59 }
 0xb3b   :  { %7626 = vrot.lane.b32.xlu0 %v8830_v5, %s8351_s27  ;;  %7621 = vrot.lane.b32.xlu1 %v7620_v6, %s8351_s27  ;;  %v8837_v14 = vpack.i.bf16 %v2225_v7, %v2215_v58  ;;  %v8839_v15 = vpack.i.bf16 %v2226_v12, %v2222_v59  ;;  %v8864_v25 = vpack.c.bf16 %v2225_v7, %v2225_v7 }
 0xb3c   :  { %v8876_v27 = vpack.c.bf16 %v2226_v12, %v2226_v12 }
 0xb3f   :  { %2345 = vrot.lane.b32.xlu0 %v8835_v13, %s8344_s0  ;;  %7631 = vrot.lane.b32.xlu1 %v8837_v14, %s8351_s27 }
 0xb43   :  { %2394 = vrot.lane.b32.xlu0 %v8844_v8, %s8344_s0  ;;  %7636 = vrot.lane.b32.xlu1 %v8839_v15, %s8351_s27  ;;  %v6800_v16 = vpop.f32.mrf.mxu0 }
 0xb45   :  { %v6801_v20 = vpop.f32.mrf.mxu0 }
 0xb46   :  { %v6802_v22 = vadd.f32 %v6801_v20, %v6800_v16 }
 0xb47   :  { %2443 = vrot.lane.b32.xlu0 %v8849_v21, %s8344_s0  ;;  %7641 = vrot.lane.b32.xlu1 %v7620_v6, %s8343_s16 }
 0xb48   :  { %v8854_v23 = vadd.f32 %v6802_v22, %v6630_v19 }
 0xb4a   :  { %10008 = vst [vmem:[#allocation59_spill] sm:$0xff] %v8854_v23 }
 0xb4b   :  { %7646 = vrot.lane.b32.xlu0 %v8830_v5, %s8343_s16  ;;  %2492 = vrot.lane.b32.xlu1 %v8856_v24, %s8344_s0 }
 0xb4f   :  { %2541 = vrot.lane.b32.xlu1 %v8862_v17, %s8344_s0  ;;  %2590 = vrot.lane.b32.xlu0 %v8864_v25, %s8344_s0 }
 0xb53   :  { %7651 = vrot.lane.b32.xlu1 %v8837_v14, %s8343_s16  ;;  %2639 = vrot.lane.b32.xlu0 %v8870_v26, %s8344_s0 }
 0xb57   :  { %2688 = vrot.lane.b32.xlu1 %v8876_v27, %s8344_s0  ;;  %7656 = vrot.lane.b32.xlu0 %v8839_v15, %s8343_s16 }
 0xbad   :  { %v7627_v28 = vpop.permute.xlu0 %7626  ;;  %v7622_v29 = vpop.permute.xlu1 %7621 }
 0xbae   :  { %v7624_v30 = vunpack.i.h.bf16 %v7622_v29  ;;  %v7623_v32 = vunpack.i.l.bf16 %v7622_v29  ;;  %v7628_v33 = vunpack.i.l.bf16 %v7627_v28  ;;  %v7629_v36 = vunpack.i.h.bf16 %v7627_v28 }
 0xbb0   :  { %v8882_v60 = vpack.c.bf16 %v7623_v32, %v7623_v32  ;;  %v8884_v34 = vpack.c.bf16 %v7624_v30, %v7624_v30  ;;  %v8891_v0 = vpack.c.bf16 %v7628_v33, %v7628_v33  ;;  %v8897_v39 = vpack.c.bf16 %v7629_v36, %v7629_v36 }
 0xbb1   :  { %v2346_v31 = vpop.permute.xlu0 %2345  ;;  %v7632_v35 = vpop.permute.xlu1 %7631 }
 0xbb2   :  { %v2351_v61 = vsel %vm1024_vm6, %v2346_v31, 0  ;;  %2737 = vrot.lane.b32.xlu1 %v8882_v60, %s8344_s0  ;;  %2786 = vrot.lane.b32.xlu0 %v8884_v34, %s8344_s0  ;;  %v7633_v40 = vunpack.i.l.bf16 %v7632_v35  ;;  %v7634_v42 = vunpack.i.h.bf16 %v7632_v35 }
 0xbb3   :  { %7091 = vmatpush3.bf16.xpose.msra.mxu1 %v2351_v61 }
 0xbb4   :  { %7096 = vmatprep.subr.bf16.mxu1 %v9961_v1  ;;  %v8907_v18 = vpack.c.bf16 %v7633_v40, %v7633_v40  ;;  %v8911_v51 = vpack.c.bf16 %v7634_v42, %v7634_v42 }
 0xbb5   :  { %v2395_v37 = vpop.permute.xlu0 %2394  ;;  %v7637_v38 = vpop.permute.xlu1 %7636 }
 0xbb6   :  { %7661 = vrot.lane.b32.xlu1 %v7620_v6, %s8352_s9  ;;  %2835 = vrot.lane.b32.xlu0 %v8891_v0, %s8344_s0  ;;  %v2400_v45 = vsel %vm1024_vm6, %v2395_v37, 0  ;;  %v7638_v48 = vunpack.i.l.bf16 %v7637_v38  ;;  %v7639_v52 = vunpack.i.h.bf16 %v7637_v38 }
 0xbb8   :  { %v8919_v55 = vpack.c.bf16 %v7638_v48, %v7638_v48  ;;  %v8931_v59 = vpack.c.bf16 %v7639_v52, %v7639_v52 }
 0xbb9   :  { %v2444_v43 = vpop.permute.xlu0 %2443  ;;  %v7642_v44 = vpop.permute.xlu1 %7641 }
 0xbba   :  { %v2449_v46 = vsel %vm1024_vm6, %v2444_v43, 0  ;;  %7093 = vmatmul.mubr.msk.bf16.vlgmr.msra.gmra.mxu1 %vm1024_vm6, %v8835_v13  ;;  %2884 = vrot.lane.b32.xlu1 %v8897_v39, %s8344_s0  ;;  %v7643_v58 = vunpack.i.l.bf16 %v7642_v44  ;;  %v7644_v62 = vunpack.i.h.bf16 %v7642_v44 }
 0xbbb   :  { %7666 = vrot.lane.b32.xlu0 %v8830_v5, %s8352_s9  ;;  %7097 = vmatpush3.bf16.xpose.msra.mxu1 %v2400_v45 }
 0xbbc   :  { %7103 = vmatpush3.bf16.xpose.msra.mxu0 %v2449_v46  ;;  %7098 = vmatprep.mubr.msk.bf16.mxu1 %vm8342_vm0, %v9961_v1  ;;  %v8943_v6 = vpack.c.bf16 %v7643_v58, %v7643_v58 }
 0xbbd   :  { %v7647_v49 = vpop.permute.xlu0 %7646  ;;  %v2493_v50 = vpop.permute.xlu1 %2492  ;;  %7108 = vmatprep.subr.bf16.mxu1 %v9961_v1  ;;  %7114 = vmatprep.subr.bf16.mxu0 %v9961_v1 }
 0xbbe   :  { %2933 = vrot.lane.b32.xlu1 %v8907_v18, %s8344_s0  ;;  %v2498_v57 = vsel %vm1024_vm6, %v2493_v50, 0  ;;  %v7648_v5 = vunpack.i.l.bf16 %v7647_v49  ;;  %v7649_v12 = vunpack.i.h.bf16 %v7647_v49 }
 0xbbf   :  { %2982 = vrot.lane.b32.xlu0 %v8911_v51, %s8344_s0 }
 0xbc0   :  { %v8957_v20 = vpack.c.bf16 %v7648_v5, %v7648_v5  ;;  %v8963_v29 = vpack.c.bf16 %v7649_v12, %v7649_v12 }
 0xbc1   :  { %v2542_v53 = vpop.permute.xlu1 %2541  ;;  %v2591_v54 = vpop.permute.xlu0 %2590 }
 0xbc2   :  { %v2547_v56 = vsel %vm1024_vm6, %v2542_v53, 0  ;;  %7099 = vmatmul.mubr.msk.bf16.vlgmr.msra.gmra.mxu1 %vm1024_vm6, %v8844_v8  ;;  %7671 = vrot.lane.b32.xlu1 %v8837_v14, %s8352_s9  ;;  %v8947_v14 = vpack.c.bf16 %v7644_v62, %v7644_v62  ;;  %v2596_v16 = vsel %vm1024_vm6, %v2591_v54, 0 }
 0xbc3   :  { %7105 = vmatmul.mubr.msk.bf16.vlgmr.msra.gmra.mxu0 %vm1024_vm6, %v8849_v21  ;;  %3031 = vrot.lane.b32.xlu0 %v8919_v55, %s8344_s0 }
 0xbc4   :  { %7109 = vmatpush3.bf16.xpose.msra.mxu1 %v2498_v57  ;;  %7115 = vmatpush3.bf16.xpose.msra.mxu0 %v2547_v56 }
 0xbc5   :  { %7110 = vmatprep.mubr.msk.bf16.mxu1 %vm8342_vm0, %v9961_v1  ;;  %7116 = vmatprep.mubr.msk.bf16.mxu0 %vm8342_vm0, %v9961_v1  ;;  %v2640_v3 = vpop.permute.xlu0 %2639  ;;  %v7652_v7 = vpop.permute.xlu1 %7651 }
 0xbc6   :  { %3080 = vrot.lane.b32.xlu1 %v8931_v59, %s8344_s0  ;;  %7120 = vmatprep.subr.bf16.mxu1 %v9961_v1  ;;  %v2645_v19 = vsel %vm1024_vm6, %v2640_v3, 0  ;;  %v7654_v28 = vunpack.i.h.bf16 %v7652_v7 }
 0xbc7   :  { %7676 = vrot.lane.b32.xlu0 %v8839_v15, %s8352_s9  ;;  %7126 = vmatprep.subr.bf16.mxu0 %v9961_v1  ;;  %v7653_v15 = vunpack.i.l.bf16 %v7652_v7 }
 0xbc8   :  { %v8975_v35 = vpack.c.bf16 %v7654_v28, %v7654_v28 }
 0xbc9   :  { %v7657_v22 = vpop.permute.xlu0 %7656  ;;  %v8971_v32 = vpack.c.bf16 %v7653_v15, %v7653_v15  ;;  %v2689_v33 = vpop.permute.xlu1 %2688 }
 0xbca   :  { %3129 = vrot.lane.b32.xlu1 %v8943_v6, %s8344_s0  ;;  %v7658_v30 = vunpack.i.l.bf16 %v7657_v22  ;;  %v7659_v31 = vunpack.i.h.bf16 %v7657_v22  ;;  %v2694_v61 = vsel %vm1024_vm6, %v2689_v33, 0 }
 0xbcb   :  { %7111 = vmatmul.mubr.msk.bf16.vlgmr.msra.gmra.mxu1 %vm1024_vm6, %v8856_v24  ;;  %7117 = vmatmul.mubr.msk.bf16.vlgmr.msra.gmra.mxu0 %vm1024_vm6, %v8862_v17 }
 0xbcc   :  { %3178 = vrot.lane.b32.xlu0 %v8947_v14, %s8344_s0  ;;  %7121 = vmatpush3.bf16.xpose.msra.mxu1 %v2596_v16  ;;  %v8984_v36 = vpack.c.bf16 %v7658_v30, %v7658_v30  ;;  %v8988_v37 = vpack.c.bf16 %v7659_v31, %v7659_v31 }
 0xbcd   :  { %7127 = vmatpush3.bf16.xpose.msra.mxu0 %v2645_v19  ;;  %7122 = vmatprep.mubr.msk.bf16.mxu1 %vm8342_vm0, %v9961_v1 }
 0xbce   :  { %3227 = vrot.lane.b32.xlu1 %v8957_v20, %s8344_s0  ;;  %7128 = vmatprep.mubr.msk.bf16.mxu0 %vm8342_vm0, %v9961_v1 }
 0xbcf   :  { %7132 = vmatprep.subr.bf16.mxu1 %v9961_v1  ;;  %7138 = vmatprep.subr.bf16.mxu0 %v9961_v1 }
 0xbd0   :  { %3276 = vrot.lane.b32.xlu0 %v8963_v29, %s8344_s0 }
 0xbd2   :  { %3325 = vrot.lane.b32.xlu1 %v8971_v32, %s8344_s0 }
 0xbd3   :  { %7123 = vmatmul.mubr.msk.bf16.vlgmr.msra.gmra.mxu1 %vm1024_vm6, %v8864_v25 }
 0xbd4   :  { %3374 = vrot.lane.b32.xlu0 %v8975_v35, %s8344_s0  ;;  %7129 = vmatmul.mubr.msk.bf16.vlgmr.msra.gmra.mxu0 %vm1024_vm6, %v8870_v26 }
 0xbd5   :  { %7133 = vmatpush3.bf16.xpose.msra.mxu1 %v2694_v61  ;;  %7134 = vmatprep.mubr.msk.bf16.mxu1 %vm8342_vm0, %v9961_v1 }
 0xbd6   :  { %3423 = vrot.lane.b32.xlu1 %v8984_v36, %s8344_s0  ;;  %7144 = vmatprep.subr.bf16.mxu1 %v9961_v1 }
 0xbd7   :  { %7140 = vmatprep.mubr.msk.bf16.mxu0 %vm8342_vm0, %v9961_v1 }
 0xbd8   :  { %3472 = vrot.lane.b32.xlu0 %v8988_v37, %s8344_s0 }
 0xbdc   :  { %7135 = vmatmul.mubr.msk.bf16.vlgmr.msra.gmra.mxu1 %vm1024_vm6, %v8876_v27 }
 0xbdd   :  { %7146 = vmatprep.mubr.msk.bf16.mxu1 %vm8342_vm0, %v9961_v1 }
 0xc24   :  { %v2738_v38 = vpop.permute.xlu1 %2737  ;;  %v2787_v40 = vpop.permute.xlu0 %2786 }
 0xc25   :  { %v2743_v42 = vsel %vm1024_vm6, %v2738_v38, 0  ;;  %v2792_v43 = vsel %vm1024_vm6, %v2787_v40, 0 }
 0xc26   :  { %7139 = vmatpush3.bf16.xpose.msra.mxu0 %v2743_v42  ;;  %7145 = vmatpush3.bf16.xpose.msra.mxu1 %v2792_v43 }
 0xc27   :  { %7150 = vmatprep.subr.bf16.mxu0 %v9961_v1  ;;  %7156 = vmatprep.subr.bf16.mxu1 %v9961_v1 }
 0xc28   :  { %v7662_v44 = vpop.permute.xlu1 %7661  ;;  %v2836_v45 = vpop.permute.xlu0 %2835 }
 0xc29   :  { %v7664_v46 = vunpack.i.h.bf16 %v7662_v44  ;;  %v7663_v48 = vunpack.i.l.bf16 %v7662_v44  ;;  %v2841_v56 = vsel %vm1024_vm6, %v2836_v45, 0 }
 0xc2b   :  { %v9005_v49 = vpack.c.bf16 %v7664_v46, %v7664_v46  ;;  %v9007_v50 = vpack.c.bf16 %v7663_v48, %v7663_v48 }
 0xc2c   :  { %v2885_v52 = vpop.permute.xlu1 %2884 }
 0xc2d   :  { %v2890_v53 = vsel %vm1024_vm6, %v2885_v52, 0  ;;  %v7667_v54 = vpop.permute.xlu0 %7666  ;;  %7141 = vmatmul.mubr.msk.bf16.vlgmr.msra.gmra.mxu0 %vm1024_vm6, %v8882_v60  ;;  %7147 = vmatmul.mubr.msk.bf16.vlgmr.msra.gmra.mxu1 %vm1024_vm6, %v8884_v34 }
 0xc2e   :  { %v7669_v57 = vunpack.i.h.bf16 %v7667_v54  ;;  %v7668_v58 = vunpack.i.l.bf16 %v7667_v54  ;;  %3570 = vrot.lane.b32.xlu0 %v9005_v49, %s8344_s0  ;;  %3521 = vrot.lane.b32.xlu1 %v9007_v50, %s8344_s0 }
 0xc2f   :  { %7151 = vmatpush3.bf16.xpose.msra.mxu0 %v2841_v56  ;;  %7157 = vmatpush3.bf16.xpose.msra.mxu1 %v2890_v53 }
 0xc30   :  { %v2934_v62 = vpop.permute.xlu1 %2933  ;;  %v9019_v3 = vpack.c.bf16 %v7669_v57, %v7669_v57  ;;  %v9021_v5 = vpack.c.bf16 %v7668_v58, %v7668_v58  ;;  %7152 = vmatprep.mubr.msk.bf16.mxu0 %vm8342_vm0, %v9961_v1  ;;  %7158 = vmatprep.mubr.msk.bf16.mxu1 %vm8342_vm0, %v9961_v1 }
 0xc31   :  { %v2983_v7 = vpop.permute.xlu0 %2982  ;;  %7162 = vmatprep.subr.bf16.mxu0 %v9961_v1  ;;  %7168 = vmatprep.subr.bf16.mxu1 %v9961_v1  ;;  %v2939_v22 = vsel %vm1024_vm6, %v2934_v62, 0 }
 0xc32   :  { %3668 = vrot.lane.b32.xlu0 %v9019_v3, %s8344_s0  ;;  %3619 = vrot.lane.b32.xlu1 %v9021_v5, %s8344_s0  ;;  %v2988_v28 = vsel %vm1024_vm6, %v2983_v7, 0 }
 0xc34   :  { %v7672_v12 = vpop.permute.xlu1 %7671 }
 0xc35   :  { %v7674_v16 = vunpack.i.h.bf16 %v7672_v12  ;;  %v7673_v15 = vunpack.i.l.bf16 %v7672_v12  ;;  %v3032_v19 = vpop.permute.xlu0 %3031 }
 0xc36   :  { %7153 = vmatmul.mubr.msk.bf16.vlgmr.msra.gmra.mxu0 %vm1024_vm6, %v8891_v0  ;;  %7159 = vmatmul.mubr.msk.bf16.vlgmr.msra.gmra.mxu1 %vm1024_vm6, %v8897_v39  ;;  %v3037_v44 = vsel %vm1024_vm6, %v3032_v19, 0 }
 0xc37   :  { %7163 = vmatpush3.bf16.xpose.msra.mxu0 %v2939_v22  ;;  %7169 = vmatpush3.bf16.xpose.msra.mxu1 %v2988_v28  ;;  %v9039_v30 = vpack.c.bf16 %v7674_v16, %v7674_v16  ;;  %v9041_v33 = vpack.c.bf16 %v7673_v15, %v7673_v15 }
 0xc38   :  { %7164 = vmatprep.mubr.msk.bf16.mxu0 %vm8342_vm0, %v9961_v1  ;;  %7170 = vmatprep.mubr.msk.bf16.mxu1 %vm8342_vm0, %v9961_v1  ;;  %v3081_v40 = vpop.permute.xlu1 %3080 }
 0xc39   :  { %v7677_v31 = vpop.permute.xlu0 %7676  ;;  %3766 = vrot.lane.b32.xlu0 %v9039_v30, %s8344_s0  ;;  %3717 = vrot.lane.b32.xlu1 %v9041_v33, %s8344_s0  ;;  %v3086_v45 = vsel %vm1024_vm6, %v3081_v40, 0 }
 0xc3a   :  { %v7679_v61 = vunpack.i.h.bf16 %v7677_v31  ;;  %v7678_v38 = vunpack.i.l.bf16 %v7677_v31  ;;  %7174 = vmatprep.subr.bf16.mxu0 %v9961_v1  ;;  %7180 = vmatprep.subr.bf16.mxu1 %v9961_v1 }
 0xc3c   :  { %v9053_v42 = vpack.c.bf16 %v7679_v61, %v7679_v61  ;;  %v9055_v43 = vpack.c.bf16 %v7678_v38, %v7678_v38  ;;  %v3130_v46 = vpop.permute.xlu1 %3129 }
 0xc3d   :  { %v3135_v52 = vsel %vm1024_vm6, %v3130_v46, 0 }
 0xc3e   :  { %10009 = vst [vmem:[#allocation60_spill] sm:$0xff] %v9053_v42  ;;  %7165 = vmatmul.mubr.msk.bf16.vlgmr.msra.gmra.mxu0 %vm1024_vm6, %v8907_v18  ;;  %7171 = vmatmul.mubr.msk.bf16.vlgmr.msra.gmra.mxu1 %vm1024_vm6, %v8911_v51  ;;  %v3179_v48 = vpop.permute.xlu0 %3178 }
 0xc3f   :  { %3864 = vrot.lane.b32.xlu0 %v9053_v42, %s8344_s0  ;;  %3815 = vrot.lane.b32.xlu1 %v9055_v43, %s8344_s0  ;;  %v3184_v53 = vsel %vm1024_vm6, %v3179_v48, 0 }
 0xc40   :  { %7175 = vmatpush3.bf16.xpose.msra.mxu0 %v3037_v44  ;;  %7181 = vmatpush3.bf16.xpose.msra.mxu1 %v3086_v45 }
 0xc41   :  { %7176 = vmatprep.mubr.msk.bf16.mxu0 %vm8342_vm0, %v9961_v1  ;;  %7182 = vmatprep.mubr.msk.bf16.mxu1 %vm8342_vm0, %v9961_v1 }
 0xc42   :  { %7186 = vmatprep.subr.bf16.mxu0 %v9961_v1  ;;  %7192 = vmatprep.subr.bf16.mxu1 %v9961_v1 }
 0xc43   :  { %4297 = vrot.lane.b32.xlu0 %v8835_v13, %s8328_s20  ;;  %4347 = vrot.lane.b32.xlu1 %v8844_v8, %s8328_s20  ;;  %v3228_v13 = vpop.permute.xlu1 %3227  ;;  %v3277_v8 = vpop.permute.xlu0 %3276 }
 0xc47   :  { %7177 = vmatmul.mubr.msk.bf16.vlgmr.msra.gmra.mxu0 %vm1024_vm6, %v8919_v55  ;;  %7183 = vmatmul.mubr.msk.bf16.vlgmr.msra.gmra.mxu1 %vm1024_vm6, %v8931_v59 }
 0xc48   :  { %4395 = vrot.lane.b32.xlu0 %v8849_v21, %s8328_s20  ;;  %4443 = vrot.lane.b32.xlu1 %v8856_v24, %s8328_s20  ;;  %v3233_v21 = vsel %vm1024_vm6, %v3228_v13, 0  ;;  %v3282_v24 = vsel %vm1024_vm6, %v3277_v8, 0 }
 0xc49   :  { %7187 = vmatpush3.bf16.xpose.msra.mxu0 %v3135_v52  ;;  %7193 = vmatpush3.bf16.xpose.msra.mxu1 %v3184_v53 }
 0xc4a   :  { %7188 = vmatprep.mubr.msk.bf16.mxu0 %vm8342_vm0, %v9961_v1  ;;  %7194 = vmatprep.mubr.msk.bf16.mxu1 %vm8342_vm0, %v9961_v1 }
 0xc4b   :  { %7198 = vmatprep.subr.bf16.mxu0 %v9961_v1  ;;  %7204 = vmatprep.subr.bf16.mxu1 %v9961_v1 }
 0xc4c   :  { %4491 = vrot.lane.b32.xlu0 %v8862_v17, %s8328_s20  ;;  %4539 = vrot.lane.b32.xlu1 %v8864_v25, %s8328_s20  ;;  %v3326_v17 = vpop.permute.xlu1 %3325  ;;  %v3375_v25 = vpop.permute.xlu0 %3374 }
 0xc50   :  { %7189 = vmatmul.mubr.msk.bf16.vlgmr.msra.gmra.mxu0 %vm1024_vm6, %v8943_v6  ;;  %7195 = vmatmul.mubr.msk.bf16.vlgmr.msra.gmra.mxu1 %vm1024_vm6, %v8947_v14 }
 0xc51   :  { %4587 = vrot.lane.b32.xlu0 %v8870_v26, %s8328_s20  ;;  %4635 = vrot.lane.b32.xlu1 %v8876_v27, %s8328_s20  ;;  %v3331_v26 = vsel %vm1024_vm6, %v3326_v17, 0  ;;  %v3380_v27 = vsel %vm1024_vm6, %v3375_v25, 0 }
 0xc52   :  { %7199 = vmatpush3.bf16.xpose.msra.mxu0 %v3233_v21  ;;  %7205 = vmatpush3.bf16.xpose.msra.mxu1 %v3282_v24 }
 0xc53   :  { %7200 = vmatprep.mubr.msk.bf16.mxu0 %vm8342_vm0, %v9961_v1  ;;  %7206 = vmatprep.mubr.msk.bf16.mxu1 %vm8342_vm0, %v9961_v1 }
 0xc54   :  { %7210 = vmatprep.subr.bf16.mxu0 %v9961_v1  ;;  %7216 = vmatprep.subr.bf16.mxu1 %v9961_v1 }
 0xc55   :  { %4683 = vrot.lane.b32.xlu0 %v8882_v60, %s8328_s20  ;;  %4731 = vrot.lane.b32.xlu1 %v8884_v34, %s8328_s20  ;;  %v3473_v60 = vpop.permute.xlu0 %3472  ;;  %v3424_v34 = vpop.permute.xlu1 %3423 }
 0xc59   :  { %7201 = vmatmul.mubr.msk.bf16.vlgmr.msra.gmra.mxu0 %vm1024_vm6, %v8957_v20  ;;  %7207 = vmatmul.mubr.msk.bf16.vlgmr.msra.gmra.mxu1 %vm1024_vm6, %v8963_v29 }
 0xc5a   :  { %4779 = vrot.lane.b32.xlu0 %v8891_v0, %s8328_s20  ;;  %4827 = vrot.lane.b32.xlu1 %v8897_v39, %s8328_s20  ;;  %v3478_v0 = vsel %vm1024_vm6, %v3473_v60, 0  ;;  %v3429_v39 = vsel %vm1024_vm6, %v3424_v34, 0 }
 0xc5b   :  { %7211 = vmatpush3.bf16.xpose.msra.mxu0 %v3331_v26  ;;  %7217 = vmatpush3.bf16.xpose.msra.mxu1 %v3380_v27 }
 0xc5c   :  { %7212 = vmatprep.mubr.msk.bf16.mxu0 %vm8342_vm0, %v9961_v1  ;;  %7218 = vmatprep.mubr.msk.bf16.mxu1 %vm8342_vm0, %v9961_v1 }
 0xc5d   :  { %7222 = vmatprep.subr.bf16.mxu0 %v9961_v1  ;;  %7228 = vmatprep.subr.bf16.mxu1 %v9961_v1 }
 0xc5e   :  { %4875 = vrot.lane.b32.xlu0 %v8907_v18, %s8328_s20  ;;  %5115 = vrot.lane.b32.xlu1 %v8947_v14, %s8328_s20 }
 0xc62   :  { %7213 = vmatmul.mubr.msk.bf16.vlgmr.msra.gmra.mxu0 %vm1024_vm6, %v8971_v32  ;;  %7219 = vmatmul.mubr.msk.bf16.vlgmr.msra.gmra.mxu1 %vm1024_vm6, %v8975_v35 }
 0xc63   :  { %4971 = vrot.lane.b32.xlu0 %v8919_v55, %s8328_s20  ;;  %5211 = vrot.lane.b32.xlu1 %v8963_v29, %s8328_s20  ;;  %v9183_v55 = vpop.f32.mrf.mxu0 }
 0xc64   :  { %7223 = vmatpush3.bf16.xpose.msra.mxu0 %v3429_v39  ;;  %7229 = vmatpush3.bf16.xpose.msra.mxu1 %v3478_v0  ;;  %10010 = vst [vmem:[#allocation61_spill] sm:$0xff] %v9183_v55 }
 0xc65   :  { %7224 = vmatprep.mubr.msk.bf16.mxu0 %vm8342_vm0, %v9961_v1  ;;  %7230 = vmatprep.mubr.msk.bf16.mxu1 %vm8342_vm0, %v9961_v1 }
 0xc66   :  { %7234 = vmatprep.subr.bf16.mxu0 %v9961_v1  ;;  %7240 = vmatprep.subr.bf16.mxu1 %v9961_v1 }
 0xc67   :  { %5067 = vrot.lane.b32.xlu0 %v8943_v6, %s8328_s20  ;;  %5499 = vrot.lane.b32.xlu1 %v9005_v49, %s8328_s20 }
 0xc6b   :  { %5163 = vrot.lane.b32.xlu0 %v8957_v20, %s8328_s20  ;;  %7231 = vmatmul.mubr.msk.bf16.vlgmr.msra.gmra.mxu1 %vm1024_vm6, %v8988_v37 }
 0xc6c   :  { %4923 = vrot.lane.b32.xlu1 %v8911_v51, %s8328_s20  ;;  %7225 = vmatmul.mubr.msk.bf16.vlgmr.msra.gmra.mxu0 %vm1024_vm6, %v8984_v36 }
 0xc6d   :  { %7236 = vmatprep.mubr.msk.bf16.mxu0 %vm8342_vm0, %v9961_v1  ;;  %7242 = vmatprep.mubr.msk.bf16.mxu1 %vm8342_vm0, %v9961_v1 }
 0xc6f   :  { %5259 = vrot.lane.b32.xlu0 %v8971_v32, %s8328_s20 }
 0xc70   :  { %5019 = vrot.lane.b32.xlu1 %v8931_v59, %s8328_s20  ;;  %v9185_v59 = vpop.f32.mrf.mxu0 }
 0xc71   :  { %10011 = vst [vmem:[#allocation62_spill] sm:$0xff] %v9185_v59 }
 0xc73   :  { %5355 = vrot.lane.b32.xlu0 %v8984_v36, %s8328_s20 }
 0xc74   :  { %5307 = vrot.lane.b32.xlu1 %v8975_v35, %s8328_s20 }
 0xc77   :  { %5451 = vrot.lane.b32.xlu0 %v9007_v50, %s8328_s20 }
 0xc78   :  { %5403 = vrot.lane.b32.xlu1 %v8988_v37, %s8328_s20 }
 0xc7a   :  { %v9181_v18 = vpop.f32.mrf.mxu1 }
 0xc7b   :  { %v3913_v52 = vsel %vm3912_vm11, %v9181_v18, -inf }
 0xc7c   :  { %v7094_v51 = vpop.f32.mrf.mxu1 }
 0xc7e   :  { %v2390_v6 = vpop.f32.mrf.mxu1 }
 0xc80   :  { %v7095_v14 = vpop.f32.mrf.mxu1 }
 0xc82   :  { %v9187_v20 = vpop.f32.mrf.mxu1 }
 0xc83   :  { %v9189_v29 = vpop.f32.mrf.mxu0  ;;  %v3916_v45 = vsel %vm3912_vm11, %v9187_v20, -inf }
 0xc84   :  { %v7100_v32 = vpop.f32.mrf.mxu1  ;;  %v3919_v31 = vsel %vm3912_vm11, %v9189_v29, -inf }
 0xc85   :  { %v7106_v35 = vpop.f32.mrf.mxu0 }
 0xc86   :  { %v2439_v36 = vpop.f32.mrf.mxu1 }
 0xc87   :  { %v2488_v54 = vpop.f32.mrf.mxu0 }
 0xc88   :  { %v7101_v56 = vpop.f32.mrf.mxu1 }
 0xc89   :  { %v7107_v57 = vpop.f32.mrf.mxu0 }
 0xc8b   :  { %v9191_v37 = vpop.f32.mrf.mxu1  ;;  %v9193_v58 = vpop.f32.mrf.mxu0 }
 0xc8c   :  { %v3925_v13 = vsel %vm3912_vm11, %v9193_v58, -inf  ;;  %v3922_v21 = vsel %vm3912_vm11, %v9191_v37, -inf }
 0xc8d   :  { %v7112_v62 = vpop.f32.mrf.mxu1  ;;  %v7118_v7 = vpop.f32.mrf.mxu0 }
 0xc8f   :  { %v2537_v12 = vpop.f32.mrf.mxu1  ;;  %v2586_v16 = vpop.f32.mrf.mxu0 }
 0xc91   :  { %v7113_v15 = vpop.f32.mrf.mxu1  ;;  %v7119_v19 = vpop.f32.mrf.mxu0 }
 0xc93   :  { %v9195_v22 = vpop.f32.mrf.mxu1 }
 0xc94   :  { %v9197_v28 = vpop.f32.mrf.mxu0  ;;  %v3928_v0 = vsel %vm3912_vm11, %v9195_v22, -inf }
 0xc95   :  { %v7124_v61 = vpop.f32.mrf.mxu1  ;;  %v3931_v25 = vsel %vm3912_vm11, %v9197_v28, -inf }
 0xc96   :  { %3920 = vmax.xlane.f32.xlu0 %v3919_v31  ;;  %v7130_v38 = vpop.f32.mrf.mxu0 }
 0xc97   :  { %v2635_v40 = vpop.f32.mrf.mxu1 }
 0xc98   :  { %v2684_v44 = vpop.f32.mrf.mxu0 }
 0xc99   :  { %v7125_v46 = vpop.f32.mrf.mxu1 }
 0xc9a   :  { %3917 = vmax.xlane.f32.xlu0 %v3916_v45  ;;  %v7131_v48 = vpop.f32.mrf.mxu0 }
 0xc9c   :  { %3914 = vmax.xlane.f32.xlu1 %v3913_v52  ;;  %v9205_v53 = vpop.f32.mrf.mxu1 }
 0xc9d   :  { %v3934_v51 = vsel %vm3912_vm11, %v9205_v53, -inf }
 0xc9e   :  { %3926 = vmax.xlane.f32.xlu0 %v3925_v13  ;;  %v7136_v8 = vpop.f32.mrf.mxu1 }
 0xca0   :  { %3923 = vmax.xlane.f32.xlu1 %v3922_v21  ;;  %v2733_v24 = vpop.f32.mrf.mxu1  ;;  %v3571_v17 = vpop.permute.xlu0 %3570 }
 0xca1   :  { %v3576_v26 = vsel %vm1024_vm6, %v3571_v17, 0  ;;  %v3522_v27 = vpop.permute.xlu1 %3521 }
 0xca2   :  { %3932 = vmax.xlane.f32.xlu0 %v3931_v25  ;;  %v3527_v60 = vsel %vm1024_vm6, %v3522_v27, 0  ;;  %v7137_v34 = vpop.f32.mrf.mxu1  ;;  %7241 = vmatpush3.bf16.xpose.msra.mxu1 %v3576_v26 }
 0xca3   :  { %7235 = vmatpush3.bf16.xpose.msra.mxu0 %v3527_v60  ;;  %7252 = vmatprep.subr.bf16.mxu1 %v9961_v1 }
 0xca4   :  { %3929 = vmax.xlane.f32.xlu1 %v3928_v0  ;;  %7246 = vmatprep.subr.bf16.mxu0 %v9961_v1  ;;  %v3669_v39 = vpop.permute.xlu0 %3668 }
 0xca5   :  { %v3620_v6 = vpop.permute.xlu1 %3619  ;;  %v3674_v14 = vsel %vm1024_vm6, %v3669_v39, 0 }
 0xca6   :  { %v3625_v32 = vsel %vm1024_vm6, %v3620_v6, 0 }
 0xca8   :  { %3935 = vmax.xlane.f32.xlu1 %v3934_v51 }
 0xca9   :  { %7243 = vmatmul.mubr.msk.bf16.vlgmr.msra.gmra.mxu1 %vm1024_vm6, %v9005_v49 }
 0xcaa   :  { %7237 = vmatmul.mubr.msk.bf16.vlgmr.msra.gmra.mxu0 %vm1024_vm6, %v9007_v50  ;;  %7253 = vmatpush3.bf16.xpose.msra.mxu1 %v3674_v14 }
 0xcab   :  { %7247 = vmatpush3.bf16.xpose.msra.mxu0 %v3625_v32  ;;  %7254 = vmatprep.mubr.msk.bf16.mxu1 %vm8342_vm0, %v9961_v1  ;;  %v3767_v35 = vpop.permute.xlu0 %3766  ;;  %v3718_v36 = vpop.permute.xlu1 %3717 }
 0xcac   :  { %7248 = vmatprep.mubr.msk.bf16.mxu0 %vm8342_vm0, %v9961_v1  ;;  %7258 = vmatprep.subr.bf16.mxu0 %v9961_v1  ;;  %v3772_v49 = vsel %vm1024_vm6, %v3767_v35, 0  ;;  %v3723_v50 = vsel %vm1024_vm6, %v3718_v36, 0 }
 0xcad   :  { %7264 = vmatprep.subr.bf16.mxu1 %v9961_v1 }
 0xcb1   :  { %7255 = vmatmul.mubr.msk.bf16.vlgmr.msra.gmra.mxu1 %vm1024_vm6, %v9019_v3  ;;  %v3865_v54 = vpop.permute.xlu0 %3864  ;;  %v3816_v56 = vpop.permute.xlu1 %3815 }
 0xcb2   :  { %7249 = vmatmul.mubr.msk.bf16.vlgmr.msra.gmra.mxu0 %vm1024_vm6, %v9021_v5  ;;  %7265 = vmatpush3.bf16.xpose.msra.mxu1 %v3772_v49  ;;  %v3870_v57 = vsel %vm1024_vm6, %v3865_v54, 0  ;;  %v3821_v62 = vsel %vm1024_vm6, %v3816_v56, 0 }
 0xcb3   :  { %7259 = vmatpush3.bf16.xpose.msra.mxu0 %v3723_v50  ;;  %7266 = vmatprep.mubr.msk.bf16.mxu1 %vm8342_vm0, %v9961_v1 }
 0xcb4   :  { %7260 = vmatprep.mubr.msk.bf16.mxu0 %vm8342_vm0, %v9961_v1  ;;  %7270 = vmatprep.subr.bf16.mxu0 %v9961_v1 }
 0xcb5   :  { %7276 = vmatprep.subr.bf16.mxu1 %v9961_v1  ;;  %v4348_v7 = vpop.permute.xlu1 %4347  ;;  %v4298_v12 = vpop.permute.xlu0 %4297 }
 0xcb6   :  { %v4353_v16 = vsel %vm4303_vm12, %v4348_v7, 0  ;;  %v4305_v15 = vsel %vm4303_vm12, %v4298_v12, 0 }
 0xcb9   :  { %7267 = vmatmul.mubr.msk.bf16.vlgmr.msra.gmra.mxu1 %vm1024_vm6, %v9039_v30 }
 0xcba   :  { %7261 = vmatmul.mubr.msk.bf16.vlgmr.msra.gmra.mxu0 %vm1024_vm6, %v9041_v33  ;;  %7277 = vmatpush3.bf16.xpose.msra.mxu1 %v3870_v57  ;;  %v9269_v19 = vpop.permute.xlu0 %4395  ;;  %v9271_v31 = vpop.permute.xlu1 %4443 }
 0xcbb   :  { %7271 = vmatpush3.bf16.xpose.msra.mxu0 %v3821_v62  ;;  %7278 = vmatprep.mubr.msk.bf16.mxu1 %vm8342_vm0, %v9961_v1 }
 0xcbc   :  { %7272 = vmatprep.mubr.msk.bf16.mxu0 %vm8342_vm0, %v9961_v1  ;;  %7282 = vmatprep.subr.bf16.mxu0 %v9961_v1 }
 0xcbd   :  { %7288 = vmatprep.subr.bf16.mxu1 %v9961_v1 }
 0xcbe   :  { %v9273_v61 = vpop.permute.xlu0 %4491  ;;  %v9275_v38 = vpop.permute.xlu1 %4539 }
 0xcc1   :  { %7279 = vmatmul.mubr.msk.bf16.vlgmr.msra.gmra.mxu1 %vm1024_vm6, %v9053_v42 }
 0xcc2   :  { %7273 = vmatmul.mubr.msk.bf16.vlgmr.msra.gmra.mxu0 %vm1024_vm6, %v9055_v43  ;;  %7289 = vmatpush3.bf16.msra.mxu1 %v4353_v16 }
 0xcc3   :  { %7283 = vmatpush3.bf16.msra.mxu0 %v4305_v15  ;;  %7284 = vmatprep.mubr.msk.bf16.mxu0 %vm8342_vm0, %v9961_v1  ;;  %v9277_v40 = vpop.permute.xlu0 %4587  ;;  %v9279_v44 = vpop.permute.xlu1 %4635 }
 0xcc4   :  { %7290 = vmatprep.mubr.msk.bf16.mxu1 %vm8342_vm0, %v9961_v1  ;;  %7294 = vmatprep.subr.bf16.mxu0 %v9961_v1 }
 0xcc5   :  { %7300 = vmatprep.subr.bf16.mxu1 %v9961_v1 }
 0xcc7   :  { %v9281_v45 = vpop.permute.xlu0 %4683  ;;  %v9291_v24 = vpop.permute.xlu1 %4731 }
 0xccc   :  { %v9293_v17 = vpop.permute.xlu0 %4779  ;;  %v9299_v39 = vpop.permute.xlu1 %4827 }
 0xcd0   :  { %v9301_v51 = vpop.permute.xlu0 %4875  ;;  %v9307_v56 = vpop.permute.xlu1 %5115 }
 0xcd1   :  { %10012 = vst [vmem:[#allocation63_spill] sm:$0xff] %v9307_v56 }
 0xcd5   :  { %v9309_v57 = vpop.permute.xlu0 %4971 }
 0xced   :  { %v9283_v46 = vpop.f32.mrf.mxu0  ;;  %v9285_v48 = vpop.f32.mrf.mxu1 }
 0xcee   :  { %v3940_v52 = vsel %vm3912_vm11, %v9285_v48, -inf  ;;  %v3937_v13 = vsel %vm3912_vm11, %v9283_v46, -inf }
 0xcef   :  { %3941 = vmax.xlane.f32.xlu1 %v3940_v52  ;;  %v7148_v8 = vpop.f32.mrf.mxu1  ;;  %3938 = vmax.xlane.f32.xlu0 %v3937_v13  ;;  %v7142_v21 = vpop.f32.mrf.mxu0 }
 0xcf0   :  { %v9319_v21 = vpop.permute.xlu1 %5211 }
 0xcf1   :  { %v2782_v25 = vpop.f32.mrf.mxu0  ;;  %v2831_v26 = vpop.f32.mrf.mxu1  ;;  %10013 = vst [vmem:[#allocation64_spill] sm:$0xff] %v9319_v21 }
 0xcf2   :  { %v9321_v25 = vpop.permute.xlu0 %5067 }
 0xcf3   :  { %v7143_v27 = vpop.f32.mrf.mxu0  ;;  %v7149_v60 = vpop.f32.mrf.mxu1 }
 0xcf6   :  { %v9295_v34 = vpop.f32.mrf.mxu0  ;;  %v9297_v0 = vpop.f32.mrf.mxu1 }
 0xcf7   :  { %v3946_v6 = vsel %vm3912_vm11, %v9297_v0, -inf  ;;  %v3943_v14 = vsel %vm3912_vm11, %v9295_v34, -inf }
 0xcf8   :  { %3947 = vmax.xlane.f32.xlu1 %v3946_v6  ;;  %v7160_v32 = vpop.f32.mrf.mxu1  ;;  %3944 = vmax.xlane.f32.xlu0 %v3943_v14  ;;  %v7154_v35 = vpop.f32.mrf.mxu0 }
 0xcfa   :  { %v2880_v36 = vpop.f32.mrf.mxu0  ;;  %v2929_v49 = vpop.f32.mrf.mxu1 }
 0xcfb   :  { %v9329_v36 = vpop.permute.xlu1 %5499  ;;  %v9331_v49 = vpop.permute.xlu0 %5163 }
 0xcfc   :  { %v7155_v50 = vpop.f32.mrf.mxu0  ;;  %v7161_v54 = vpop.f32.mrf.mxu1  ;;  %10014 = vst [vmem:[#allocation65_spill] sm:$0xff] %v9329_v36  ;;  %10015 = vst [vmem:[#allocation66_spill] sm:$0xff] %v9331_v49 }
 0xcfe   :  { %v9311_v62 = vpop.f32.mrf.mxu0  ;;  %v9313_v7 = vpop.f32.mrf.mxu1 }
 0xcff   :  { %v3952_v12 = vsel %vm3912_vm11, %v9313_v7, -inf  ;;  %v3949_v16 = vsel %vm3912_vm11, %v9311_v62, -inf }
 0xd00   :  { %3953 = vmax.xlane.f32.xlu1 %v3952_v12  ;;  %v7172_v15 = vpop.f32.mrf.mxu1  ;;  %3950 = vmax.xlane.f32.xlu0 %v3949_v16  ;;  %v7166_v52 = vpop.f32.mrf.mxu0 }
 0xd02   :  { %v2978_v13 = vpop.f32.mrf.mxu0  ;;  %v3027_v8 = vpop.f32.mrf.mxu1 }
 0xd03   :  { %v9337_v13 = vpop.permute.xlu1 %4923  ;;  %v9339_v8 = vpop.permute.xlu0 %5259 }
 0xd04   :  { %v7167_v26 = vpop.f32.mrf.mxu0  ;;  %v7173_v27 = vpop.f32.mrf.mxu1  ;;  %10016 = vst [vmem:[#allocation67_spill] sm:$0xff] %v9339_v8 }
 0xd07   :  { %v9323_v60 = vpop.f32.mrf.mxu0  ;;  %v9325_v6 = vpop.f32.mrf.mxu1 }
 0xd08   :  { %v3955_v14 = vsel %vm3912_vm11, %v9323_v60, -inf }
 0xd09   :  { %v7184_v32 = vpop.f32.mrf.mxu1  ;;  %3956 = vmax.xlane.f32.xlu0 %v3955_v14  ;;  %v7178_v35 = vpop.f32.mrf.mxu0 }
 0xd0b   :  { %v3076_v50 = vpop.f32.mrf.mxu0  ;;  %v3125_v54 = vpop.f32.mrf.mxu1 }
 0xd0c   :  { %v9343_v54 = vpop.permute.xlu1 %5019 }
 0xd0d   :  { %v7179_v12 = vpop.f32.mrf.mxu0  ;;  %v7185_v16 = vpop.f32.mrf.mxu1 }
 0xd0e   :  { %v9345_v12 = vpop.permute.xlu0 %5355 }
 0xd0f   :  { %10017 = vst [vmem:[#allocation68_spill] sm:$0xff] %v9345_v12 }
 0xd10   :  { %v9333_v15 = vpop.f32.mrf.mxu0  ;;  %v9335_v52 = vpop.f32.mrf.mxu1 }
 0xd11   :  { %5547 = vrot.lane.b32.xlu1 %v9021_v5, %s8328_s20  ;;  %v9351_v55 = vpop.permute.xlu1 %5307 }
 0xd12   :  { %v7190_v26 = vpop.f32.mrf.mxu0  ;;  %v7196_v27 = vpop.f32.mrf.mxu1  ;;  %10018 = vst [vmem:[#allocation69_spill] sm:$0xff] %v9351_v55 }
 0xd13   :  { %v9353_v5 = vpop.permute.xlu0 %5451 }
 0xd14   :  { %v3174_v14 = vpop.f32.mrf.mxu0  ;;  %v3223_v32 = vpop.f32.mrf.mxu1  ;;  %10019 = vst [vmem:[#allocation70_spill] sm:$0xff] %v9353_v5 }
 0xd16   :  { %v7191_v35 = vpop.f32.mrf.mxu0  ;;  %v7197_v50 = vpop.f32.mrf.mxu1 }
 0xd19   :  { %v9347_v16 = vpop.f32.mrf.mxu0  ;;  %v9349_v1 = vpop.f32.mrf.mxu1 }
 0xd1b   :  { %v7202_v23 = vpop.f32.mrf.mxu0  ;;  %v7208_v11 = vpop.f32.mrf.mxu1 }
 0xd1c   :  { %v9361_v23 = vpop.permute.xlu1 %5403 }
 0xd1d   :  { %v3321_v10 = vpop.f32.mrf.mxu1  ;;  %v3272_v59 = vpop.f32.mrf.mxu0  ;;  %10020 = vst [vmem:[#allocation71_spill] sm:$0xff] %v9361_v23 }
 0xd1f   :  { %v7203_v26 = vpop.f32.mrf.mxu0  ;;  %5595 = vrot.lane.b32.xlu0 %v9019_v3, %s8328_s20  ;;  %v7209_v27 = vpop.f32.mrf.mxu1 }
 0xd20   :  { %v3921_v35 = vpop.xlane.xlu0 %3920 }
 0xd22   :  { %v9357_v14 = vpop.f32.mrf.mxu1  ;;  %v9359_v32 = vpop.f32.mrf.mxu0 }
 0xd24   :  { %v7214_v50 = vpop.f32.mrf.mxu0  ;;  %v7220_v4 = vpop.f32.mrf.mxu1 }
 0xd25   :  { %v3918_v9 = vpop.xlane.xlu0 %3917  ;;  %v3915_v63 = vpop.xlane.xlu1 %3914 }
 0xd26   :  { %v3419_v11 = vpop.f32.mrf.mxu1  ;;  %v3370_v10 = vpop.f32.mrf.mxu0  ;;  %v4010_v3 = vsub.f32 %v9187_v20, %v3918_v9  ;;  %v4009_v47 = vsub.f32 %v9181_v18, %v3915_v63  ;;  %v3958_v9 = vsel %vm3912_vm11, %v9325_v6, -inf  ;;  %v3964_v18 = vsel %vm3912_vm11, %v9335_v52, -inf }
 0xd27   :  { %v4011_v11 = vsub.f32 %v9189_v29, %v3921_v35  ;;  %v3970_v29 = vsel %vm3912_vm11, %v9349_v1, -inf }
 0xd28   :  { %v7215_v59 = vpop.f32.mrf.mxu0  ;;  %v7221_v2 = vpop.f32.mrf.mxu1  ;;  %v4043_v4 = vmul.f32 1.442695, %v4010_v3  ;;  %v4041_v10 = vmul.f32 1.442695, %v4009_v47 }
 0xd29   :  { %v3924_v59 = vpop.xlane.xlu1 %3923  ;;  %v4045_v20 = vmul.f32 1.442695, %v4011_v11  ;;  %v3927_v63 = vpop.xlane.xlu0 %3926 }
 0xd2a   :  { %7790 = vpow2.f32 %v4043_v4  ;;  %v4012_v23 = vsub.f32 %v9191_v37, %v3924_v59  ;;  %v4013_v47 = vsub.f32 %v9193_v58, %v3927_v63 }
 0xd2b   :  { %v9363_v26 = vpop.f32.mrf.mxu1  ;;  %7792 = vpow2.f32 %v4041_v10 }
 0xd2c   :  { %v9366_v27 = vpop.f32.mrf.mxu0  ;;  %7794 = vpow2.f32 %v4045_v20  ;;  %v4049_v37 = vmul.f32 1.442695, %v4013_v47  ;;  %v3973_v20 = vsel %vm3912_vm11, %v9359_v32, -inf }
 0xd2d   :  { %v7232_v41 = vpop.f32.mrf.mxu1  ;;  %v3979_v47 = vsel %vm3912_vm11, %v9366_v27, -inf }
 0xd2e   :  { %v7226_v5 = vpop.f32.mrf.mxu0  ;;  %v4047_v41 = vmul.f32 1.442695, %v4012_v23  ;;  %v3967_v23 = vsel %vm3912_vm11, %v9347_v16, -inf }
 0xd2f   :  { %v3517_v50 = vpop.f32.mrf.mxu1  ;;  %v3976_v5 = vsel %vm3912_vm11, %v9357_v14, -inf }
 0xd30   :  { %v3468_v36 = vpop.f32.mrf.mxu0  ;;  %7796 = vpow2.f32 %v4047_v41 }
 0xd31   :  { %v7233_v2 = vpop.f32.mrf.mxu1  ;;  %v3961_v36 = vsel %vm3912_vm11, %v9333_v15, -inf  ;;  %7798 = vpow2.f32 %v4049_v37 }
 0xd32   :  { %v7227_v12 = vpop.f32.mrf.mxu0 }
 0xd33   :  { %v3933_v12 = vpop.xlane.xlu0 %3932 }
 0xd34   :  { %v4015_v58 = vsub.f32 %v9197_v28, %v3933_v12  ;;  %v3982_v28 = vsel %vm3912_vm11, %v9363_v26, -inf }
 0xd35   :  { %3959 = vmax.xlane.f32.xlu1 %v3958_v9 }
 0xd36   :  { %v4053_v4 = vmul.f32 1.442695, %v4015_v58 }
 0xd37   :  { %v9382_v35 = vpop.eup %7790 }
 0xd38   :  { %v9387_v3 = vpop.eup %7792  ;;  %v4108_v50 = vsel %vm3912_vm11, %v9382_v35, 0.0  ;;  %7800 = vpow2.f32 %v4053_v4 }
 0xd39   :  { %3965 = vmax.xlane.f32.xlu1 %v3964_v18  ;;  %v4105_v11 = vsel %vm3912_vm11, %v9387_v3, 0.0  ;;  %v9393_v10 = vpop.eup %7794  ;;  %v3930_v18 = vpop.xlane.xlu1 %3929 }
 0xd3a   :  { %v4111_v2 = vsel %vm3912_vm11, %v9393_v10, 0.0  ;;  %v4014_v37 = vsub.f32 %v9195_v22, %v3930_v18 }
 0xd3c   :  { %v4051_v12 = vmul.f32 1.442695, %v4014_v37 }
 0xd3d   :  { %3971 = vmax.xlane.f32.xlu1 %v3970_v29  ;;  %v9397_v59 = vpop.eup %7796 }
 0xd3e   :  { %3962 = vmax.xlane.f32.xlu0 %v3961_v36  ;;  %v4114_v9 = vsel %vm3912_vm11, %v9397_v59, 0.0  ;;  %v9405_v63 = vpop.eup %7798  ;;  %7802 = vpow2.f32 %v4051_v12 }
 0xd3f   :  { %v4117_v41 = vsel %vm3912_vm11, %v9405_v63, 0.0 }
 0xd41   :  { %3977 = vmax.xlane.f32.xlu1 %v3976_v5  ;;  %v3936_v5 = vpop.xlane.xlu1 %3935 }
 0xd42   :  { %3968 = vmax.xlane.f32.xlu0 %v3967_v23  ;;  %v4016_v58 = vsub.f32 %v9205_v53, %v3936_v5 }
 0xd44   :  { %v4055_v23 = vmul.f32 1.442695, %v4016_v58 }
 0xd45   :  { %4109 = vadd.xlane.f32.xlu1 %v4108_v50  ;;  %v9411_v29 = vpop.eup %7800 }
 0xd46   :  { %4106 = vadd.xlane.f32.xlu0 %v4105_v11  ;;  %v4123_v36 = vsel %vm3912_vm11, %v9411_v29, 0.0  ;;  %7804 = vpow2.f32 %v4055_v23 }
 0xd49   :  { %3983 = vmax.xlane.f32.xlu1 %v3982_v28 }
 0xd4a   :  { %4112 = vadd.xlane.f32.xlu0 %v4111_v2 }
 0xd4b   :  { %v9423_v22 = vpop.eup %7802 }
 0xd4d   :  { %4115 = vadd.xlane.f32.xlu1 %v4114_v9 }
 0xd4e   :  { %3974 = vmax.xlane.f32.xlu0 %v3973_v20 }
 0xd52   :  { %4118 = vadd.xlane.f32.xlu0 %v4117_v41  ;;  %v4120_v41 = vsel %vm3912_vm11, %v9423_v22, 0.0 }
 0xd53   :  { %v9435_v5 = vpop.eup %7804 }
 0xd56   :  { %3980 = vmax.xlane.f32.xlu0 %v3979_v47 }
 0xd5a   :  { %4124 = vadd.xlane.f32.xlu0 %v4123_v36 }
 0xd69   :  { %v9417_v50 = vpop.f32.mrf.mxu1 }
 0xd6a   :  { %v9419_v4 = vpop.f32.mrf.mxu0  ;;  %v3988_v11 = vsel %vm3912_vm11, %v9417_v50, -inf }
 0xd6b   :  { %v7244_v28 = vpop.f32.mrf.mxu1  ;;  %3989 = vmax.xlane.f32.xlu1 %v3988_v11  ;;  %v3985_v2 = vsel %vm3912_vm11, %v9419_v4, -inf }
 0xd6c   :  { %3986 = vmax.xlane.f32.xlu0 %v3985_v2  ;;  %v7238_v9 = vpop.f32.mrf.mxu0 }
 0xd6d   :  { %v3615_v20 = vpop.f32.mrf.mxu1  ;;  %v4126_v9 = vsel %vm3912_vm11, %v9435_v5, 0.0 }
 0xd6e   :  { %v3566_v53 = vpop.f32.mrf.mxu0 }
 0xd6f   :  { %v7245_v18 = vpop.f32.mrf.mxu1  ;;  %4121 = vadd.xlane.f32.xlu1 %v4120_v41 }
 0xd70   :  { %v7239_v47 = vpop.f32.mrf.mxu0 }
 0xd71   :  { %v9429_v37 = vpop.f32.mrf.mxu1 }
 0xd72   :  { %v9431_v36 = vpop.f32.mrf.mxu0  ;;  %v3994_v12 = vsel %vm3912_vm11, %v9429_v37, -inf }
 0xd73   :  { %v7256_v58 = vpop.f32.mrf.mxu1  ;;  %3995 = vmax.xlane.f32.xlu1 %v3994_v12  ;;  %v3991_v23 = vsel %vm3912_vm11, %v9431_v36, -inf }
 0xd74   :  { %3992 = vmax.xlane.f32.xlu0 %v3991_v23  ;;  %v7250_v11 = vpop.f32.mrf.mxu0 }
 0xd75   :  { %v3713_v28 = vpop.f32.mrf.mxu1 }
 0xd76   :  { %v3664_v2 = vpop.f32.mrf.mxu0 }
 0xd77   :  { %v7257_v20 = vpop.f32.mrf.mxu1  ;;  %4127 = vadd.xlane.f32.xlu1 %v4126_v9 }
 0xd78   :  { %v7251_v53 = vpop.f32.mrf.mxu0  ;;  %v3942_v41 = vpop.xlane.xlu1 %3941 }
 0xd79   :  { %v4018_v18 = vsub.f32 %v9285_v48, %v3942_v41  ;;  %v9442_v47 = vpop.f32.mrf.mxu1  ;;  %v3939_v58 = vpop.xlane.xlu0 %3938 }
 0xd7a   :  { %v4017_v12 = vsub.f32 %v9283_v46, %v3939_v58  ;;  %v9445_v8 = vpop.f32.mrf.mxu0  ;;  %v4000_v23 = vsel %vm3912_vm11, %v9442_v47, -inf }
 0xd7b   :  { %v4059_v11 = vmul.f32 1.442695, %v4018_v18  ;;  %v7268_v28 = vpop.f32.mrf.mxu1  ;;  %4001 = vmax.xlane.f32.xlu1 %v4000_v23  ;;  %v3997_v2 = vsel %vm3912_vm11, %v9445_v8, -inf }
 0xd7c   :  { %v4057_v9 = vmul.f32 1.442695, %v4017_v12  ;;  %3998 = vmax.xlane.f32.xlu0 %v3997_v2  ;;  %v7262_v20 = vpop.f32.mrf.mxu0 }
 0xd7d   :  { %7806 = vpow2.f32 %v4059_v11  ;;  %v3811_v48 = vpop.f32.mrf.mxu1 }
 0xd7e   :  { %7808 = vpow2.f32 %v4057_v9  ;;  %v3762_v53 = vpop.f32.mrf.mxu0 }
 0xd7f   :  { %v7269_v41 = vpop.f32.mrf.mxu1 }
 0xd80   :  { %v7263_v46 = vpop.f32.mrf.mxu0 }
 0xd81   :  { %v3948_v58 = vpop.xlane.xlu1 %3947  ;;  %v9451_v55 = vpop.f32.mrf.mxu1 }
 0xd82   :  { %v4020_v49 = vsub.f32 %v9297_v0, %v3948_v58  ;;  %v3945_v18 = vpop.xlane.xlu0 %3944  ;;  %v9454_v28 = vpop.f32.mrf.mxu0  ;;  %v4006_v23 = vsel %vm3912_vm11, %v9451_v55, -inf }
 0xd83   :  { %v4019_v12 = vsub.f32 %v9295_v34, %v3945_v18  ;;  %v7280_v2 = vpop.f32.mrf.mxu1  ;;  %4007 = vmax.xlane.f32.xlu0 %v4006_v23  ;;  %v4003_v11 = vsel %vm3912_vm11, %v9454_v28, -inf }
 0xd84   :  { %v4063_v9 = vmul.f32 1.442695, %v4020_v49  ;;  %4004 = vmax.xlane.f32.xlu1 %v4003_v11  ;;  %v7274_v20 = vpop.f32.mrf.mxu0 }
 0xd85   :  { %v4061_v48 = vmul.f32 1.442695, %v4019_v12  ;;  %v3909_v53 = vpop.f32.mrf.mxu1 }
 0xd86   :  { %7810 = vpow2.f32 %v4063_v9  ;;  %v3860_v0 = vpop.f32.mrf.mxu0 }
 0xd87   :  { %7812 = vpow2.f32 %v4061_v48  ;;  %v7281_v41 = vpop.f32.mrf.mxu1 }
 0xd88   :  { %v7275_v46 = vpop.f32.mrf.mxu0 }
 0xd89   :  { %v3954_v58 = vpop.xlane.xlu1 %3953  ;;  %v3951_v21 = vpop.xlane.xlu0 %3950 }
 0xd8a   :  { %v9461_v56 = vpop.eup %7806  ;;  %v4022_v34 = vsub.f32 %v9313_v7, %v3954_v58  ;;  %v4021_v18 = vsub.f32 %v9311_v62, %v3951_v21 }
 0xd8b   :  { %v9465_v23 = vpop.eup %7808  ;;  %v4132_v49 = vsel %vm3912_vm11, %v9461_v56, 0.0 }
 0xd8c   :  { %v4067_v12 = vmul.f32 1.442695, %v4022_v34  ;;  %v4065_v2 = vmul.f32 1.442695, %v4021_v18  ;;  %v4129_v11 = vsel %vm3912_vm11, %v9465_v23, 0.0  ;;  %4133 = vadd.xlane.f32.xlu1 %v4132_v49 }
 0xd8d   :  { %4130 = vadd.xlane.f32.xlu0 %v4129_v11  ;;  %v9492_v18 = vpop.permute.xlu1 %5547 }
 0xd8e   :  { %7814 = vpow2.f32 %v4067_v12  ;;  %10021 = vst [vmem:[#allocation72_spill] sm:$0xff] %v9492_v18 }
 0xd8f   :  { %7816 = vpow2.f32 %v4065_v2 }
 0xd92   :  { %v3957_v9 = vpop.xlane.xlu0 %3956 }
 0xd93   :  { %v9471_v20 = vpop.eup %7810  ;;  %v4023_v7 = vsub.f32 %v9323_v60, %v3957_v9 }
 0xd94   :  { %v9474_v62 = vpop.eup %7812  ;;  %v4138_v21 = vsel %vm3912_vm11, %v9471_v20, 0.0 }
 0xd95   :  { %v4069_v48 = vmul.f32 1.442695, %v4023_v7  ;;  %4139 = vadd.xlane.f32.xlu0 %v4138_v21  ;;  %v4135_v53 = vsel %vm3912_vm11, %v9474_v62, 0.0 }
 0xd96   :  { %4136 = vadd.xlane.f32.xlu1 %v4135_v53  ;;  %v9495_v9 = vpop.permute.xlu0 %5595 }
 0xd97   :  { %7818 = vpow2.f32 %v4069_v48 }
 0xd9b   :  { %v9480_v0 = vpop.eup %7814 }
 0xd9c   :  { %v9482_v41 = vpop.eup %7816  ;;  %v4144_v46 = vsel %vm3912_vm11, %v9480_v0, 0.0 }
 0xd9d   :  { %4145 = vadd.xlane.f32.xlu0 %v4144_v46  ;;  %v4141_v60 = vsel %vm3912_vm11, %v9482_v41, 0.0 }
 0xd9e   :  { %4142 = vadd.xlane.f32.xlu1 %v4141_v60 }
 0xda4   :  { %v9488_v58 = vpop.eup %7818 }
 0xda5   :  { %v4147_v34 = vsel %vm3912_vm11, %v9488_v58, 0.0 }
 0xda6   :  { %4148 = vadd.xlane.f32.xlu1 %v4147_v34 }
 0xdbe   :  { %v3960_v49 = vpop.xlane.xlu1 %3959 }
 0xdbf   :  { %v4024_v12 = vsub.f32 %v9325_v6, %v3960_v49 }
 0xdc1   :  { %v4071_v2 = vmul.f32 1.442695, %v4024_v12 }
 0xdc2   :  { %v3966_v11 = vpop.xlane.xlu1 %3965 }
 0xdc3   :  { %7820 = vpow2.f32 %v4071_v2  ;;  %v4026_v7 = vsub.f32 %v9335_v52, %v3966_v11 }
 0xdc5   :  { %v4075_v21 = vmul.f32 1.442695, %v4026_v7 }
 0xdc6   :  { %v3972_v48 = vpop.xlane.xlu1 %3971 }
 0xdc7   :  { %7822 = vpow2.f32 %v4075_v21  ;;  %v4028_v53 = vsub.f32 %v9349_v1, %v3972_v48  ;;  %v3963_v46 = vpop.xlane.xlu0 %3962 }
 0xdc8   :  { %v4025_v60 = vsub.f32 %v9333_v15, %v3963_v46 }
 0xdc9   :  { %v4079_v34 = vmul.f32 1.442695, %v4028_v53 }
 0xdca   :  { %v4073_v18 = vmul.f32 1.442695, %v4025_v60  ;;  %v3978_v42 = vpop.xlane.xlu1 %3977 }
 0xdcb   :  { %7824 = vpow2.f32 %v4079_v34  ;;  %v4030_v6 = vsub.f32 %v9357_v14, %v3978_v42  ;;  %v3969_v49 = vpop.xlane.xlu0 %3968 }
 0xdcc   :  { %7826 = vpow2.f32 %v4073_v18  ;;  %v4027_v12 = vsub.f32 %v9347_v16, %v3969_v49 }
 0xdcd   :  { %v4083_v2 = vmul.f32 1.442695, %v4030_v6 }
 0xdce   :  { %v4077_v52 = vmul.f32 1.442695, %v4027_v12  ;;  %v4110_v11 = vpop.xlane.xlu1 %4109 }
 0xdcf   :  { %7828 = vpow2.f32 %v4083_v2  ;;  %v4107_v7 = vpop.xlane.xlu0 %4106 }
 0xdd0   :  { %v9502_v21 = vpop.eup %7820  ;;  %7830 = vpow2.f32 %v4077_v52 }
 0xdd1   :  { %7832 = vrcp.f32 %v4110_v11  ;;  %v4150_v1 = vsel %vm3912_vm11, %v9502_v21, 0.0 }
 0xdd2   :  { %7834 = vrcp.f32 %v4107_v7  ;;  %v3984_v15 = vpop.xlane.xlu1 %3983  ;;  %4151 = vadd.xlane.f32.xlu0 %v4150_v1 }
 0xdd3   :  { %v4032_v42 = vsub.f32 %v9363_v26, %v3984_v15  ;;  %v4113_v14 = vpop.xlane.xlu0 %4112 }
 0xdd4   :  { %v9507_v18 = vpop.eup %7822  ;;  %7836 = vrcp.f32 %v4113_v14 }
 0xdd5   :  { %v4087_v16 = vmul.f32 1.442695, %v4032_v42  ;;  %v4156_v48 = vsel %vm3912_vm11, %v9507_v18, 0.0 }
 0xdd6   :  { %v4116_v53 = vpop.xlane.xlu1 %4115  ;;  %4157 = vadd.xlane.f32.xlu0 %v4156_v48 }
 0xdd7   :  { %7838 = vpow2.f32 %v4087_v16  ;;  %v3975_v46 = vpop.xlane.xlu0 %3974 }
 0xdd8   :  { %v9511_v60 = vpop.eup %7824  ;;  %7840 = vrcp.f32 %v4116_v53  ;;  %v4029_v34 = vsub.f32 %v9359_v32, %v3975_v46 }
 0xdd9   :  { %v9514_v6 = vpop.eup %7826  ;;  %v4162_v26 = vsel %vm3912_vm11, %v9511_v60, 0.0 }
 0xdda   :  { %v4081_v49 = vmul.f32 1.442695, %v4029_v34  ;;  %4163 = vadd.xlane.f32.xlu0 %v4162_v26  ;;  %v4153_v12 = vsel %vm3912_vm11, %v9514_v6, 0.0 }
 0xddb   :  { %v4119_v2 = vpop.xlane.xlu0 %4118  ;;  %4154 = vadd.xlane.f32.xlu1 %v4153_v12 }
 0xddc   :  { %v9520_v52 = vpop.eup %7828  ;;  %7842 = vpow2.f32 %v4081_v49  ;;  %v4449_v49 = vsel %vm4303_vm12, %v9271_v31, 0 }
 0xddd   :  { %v9522_v11 = vpop.eup %7830  ;;  %v4168_v32 = vsel %vm3912_vm11, %v9520_v52, 0.0  ;;  %7844 = vrcp.f32 %v4119_v2 }
 0xdde   :  { %v7833_v7 = vpop.eup %7832  ;;  %4169 = vadd.xlane.f32.xlu0 %v4168_v32  ;;  %v4159_v1 = vsel %vm3912_vm11, %v9522_v11, 0.0  ;;  %v10022_v32 = vmov 0.0  }
 0xddf   :  { %v7835_v15 = vpop.eup %7834  ;;  %v4234_v42 = vmul.f32 %v7833_v7, %v9382_v35  ;;  %v3981_v14 = vpop.xlane.xlu0 %3980  ;;  %4160 = vadd.xlane.f32.xlu1 %v4159_v1  ;;  %v4401_v35 = vsel %vm4303_vm12, %v9269_v19, 0 }
 0xde0   :  { %v4031_v16 = vsub.f32 %v9366_v27, %v3981_v14  ;;  %v4233_v48 = vmul.f32 %v7835_v15, %v9387_v3 }
 0xde1   :  { %v4266_v53 = vpack.c.bf16 %v4234_v42, %v4234_v42  ;;  %v7837_v26 = vpop.eup %7836 }
 0xde2   :  { %v4085_v46 = vmul.f32 1.442695, %v4031_v16  ;;  %v4265_v34 = vpack.c.bf16 %v4233_v48, %v4233_v48  ;;  %v4235_v19 = vmul.f32 %v7837_v26, %v9393_v10  ;;  %v4497_v10 = vsel %vm4303_vm12, %v9273_v61, 0 }
 0xde3   :  { %7291 = vmatmul.mubr.msk.bf16.vlgmr.msra.gmra.mxu1 %vm4299_vm13, %v4266_v53  ;;  %v4125_v12 = vpop.xlane.xlu0 %4124 }
 0xde4   :  { %v9534_v2 = vpop.eup %7838  ;;  %7846 = vpow2.f32 %v4085_v46  ;;  %7285 = vmatmul.mubr.msk.bf16.vlgmr.msra.gmra.mxu0 %vm4299_vm13, %v4265_v34  ;;  %7301 = vmatpush3.bf16.msra.mxu1 %v4449_v49  ;;  %v4267_v15 = vpack.c.bf16 %v4235_v19, %v4235_v19  ;;  %v4593_v46 = vsel %vm4303_vm12, %v9277_v40, 0 }
 0xde5   :  { %v7841_v27 = vpop.eup %7840  ;;  %7295 = vmatpush3.bf16.msra.mxu0 %v4401_v35  ;;  %v4174_v3 = vsel %vm3912_vm11, %v9534_v2, 0.0  ;;  %7296 = vmatprep.mubr.msk.bf16.mxu0 %vm8342_vm0, %v10022_v32  ;;  %7848 = vrcp.f32 %v4125_v12 }
 0xde6   :  { %v4236_v31 = vmul.f32 %v7841_v27, %v9397_v59  ;;  %4175 = vadd.xlane.f32.xlu0 %v4174_v3  ;;  %7302 = vmatprep.mubr.msk.bf16.mxu1 %vm8342_vm0, %v10022_v32  ;;  %v4545_v59 = vsel %vm4303_vm12, %v9275_v38, 0 }
 0xde7   :  { %7306 = vmatprep.subr.bf16.mxu0 %v10022_v32  ;;  %7312 = vmatprep.subr.bf16.mxu1 %v10022_v32 }
 0xde8   :  { %v4268_v7 = vpack.c.bf16 %v4236_v31, %v4236_v31 }
 0xde9   :  { %v9549_v1 = vpop.eup %7842 }
 0xdea   :  { %v4165_v42 = vsel %vm3912_vm11, %v9549_v1, 0.0  ;;  %v7845_v14 = vpop.eup %7844 }
 0xdeb   :  { %7303 = vmatmul.mubr.msk.bf16.vlgmr.msra.gmra.mxu1 %vm4299_vm13, %v4268_v7  ;;  %4166 = vadd.xlane.f32.xlu1 %v4165_v42  ;;  %v4237_v16 = vmul.f32 %v7845_v14, %v9405_v63 }
 0xdec   :  { %7297 = vmatmul.mubr.msk.bf16.vlgmr.msra.gmra.mxu0 %vm4299_vm13, %v4267_v15  ;;  %7313 = vmatpush3.bf16.msra.mxu1 %v4545_v59 }
 0xded   :  { %7307 = vmatpush3.bf16.msra.mxu0 %v4497_v10  ;;  %7308 = vmatprep.mubr.msk.bf16.mxu0 %vm8342_vm0, %v10022_v32  ;;  %v4269_v48 = vpack.c.bf16 %v4237_v16, %v4237_v16  ;;  %v4641_v16 = vsel %vm4303_vm12, %v9279_v44, 0 }
 0xdee   :  { %7318 = vmatprep.subr.bf16.mxu0 %v10022_v32  ;;  %7314 = vmatprep.mubr.msk.bf16.mxu1 %vm8342_vm0, %v10022_v32 }
 0xdef   :  { %7324 = vmatprep.subr.bf16.mxu1 %v10022_v32 }
 0xdf1   :  { %v9566_v38 = vpop.eup %7846 }
 0xdf2   :  { %v4171_v61 = vsel %vm3912_vm11, %v9566_v38, 0.0  ;;  %v7849_v53 = vpop.eup %7848 }
 0xdf3   :  { %4172 = vadd.xlane.f32.xlu1 %v4171_v61  ;;  %v4239_v49 = vmul.f32 %v7849_v53, %v9411_v29 }
 0xdf4   :  { %7309 = vmatmul.mubr.msk.bf16.vlgmr.msra.gmra.mxu0 %vm4299_vm13, %v4269_v48  ;;  %v3990_v63 = vpop.xlane.xlu1 %3989 }
 0xdf5   :  { %7319 = vmatpush3.bf16.msra.mxu0 %v4593_v46  ;;  %v4034_v34 = vsub.f32 %v9417_v50, %v3990_v63  ;;  %v3987_v26 = vpop.xlane.xlu0 %3986  ;;  %7320 = vmatprep.mubr.msk.bf16.mxu0 %vm8342_vm0, %v10022_v32  ;;  %v4271_v40 = vpack.c.bf16 %v4239_v49, %v4239_v49  ;;  %v4689_v50 = vsel %vm4303_vm12, %v9281_v45, 0  ;;  %v4737_v49 = vsel %vm4303_vm12, %v9291_v24, 0 }
 0xdf6   :  { %v4033_v12 = vsub.f32 %v9419_v4, %v3987_v26  ;;  %7330 = vmatprep.subr.bf16.mxu0 %v10022_v32 }
 0xdf7   :  { %v4091_v35 = vmul.f32 1.442695, %v4034_v34 }
 0xdf8   :  { %v4089_v27 = vmul.f32 1.442695, %v4033_v12  ;;  %v4122_v3 = vpop.xlane.xlu1 %4121 }
 0xdf9   :  { %7850 = vpow2.f32 %v4091_v35 }
 0xdfa   :  { %7852 = vpow2.f32 %v4089_v27 }
 0xdfb   :  { %7854 = vrcp.f32 %v4122_v3 }
 0xdfc   :  { %7321 = vmatmul.mubr.msk.bf16.vlgmr.msra.gmra.mxu0 %vm4299_vm13, %v4271_v40  ;;  %v3996_v31 = vpop.xlane.xlu1 %3995 }
 0xdfd   :  { %7331 = vmatpush3.bf16.msra.mxu0 %v4689_v50  ;;  %v4036_v29 = vsub.f32 %v9429_v37, %v3996_v31  ;;  %7332 = vmatprep.mubr.msk.bf16.mxu0 %vm8342_vm0, %v10022_v32  ;;  %v3993_v59 = vpop.xlane.xlu0 %3992 }
 0xdfe   :  { %7342 = vmatprep.subr.bf16.mxu0 %v10022_v32  ;;  %v4035_v50 = vsub.f32 %v9431_v36, %v3993_v59 }
 0xdff   :  { %v4095_v4 = vmul.f32 1.442695, %v4036_v29 }
 0xe00   :  { %v4128_v19 = vpop.xlane.xlu1 %4127  ;;  %v4093_v36 = vmul.f32 1.442695, %v4035_v50  ;;  %v10023_v50 = vld [vmem:[#allocation60_spill] sm:$0xff] }
 0xe01   :  { %7856 = vpow2.f32 %v4095_v4 }
 0xe02   :  { %7858 = vrcp.f32 %v4128_v19 }
 0xe04   :  { %v4002_v48 = vpop.xlane.xlu1 %4001 }
 0xe05   :  { %v3999_v53 = vpop.xlane.xlu0 %3998 }
 0xe06   :  { %v9586_v7 = vpop.eup %7850 }
 0xe07   :  { %v9588_v15 = vpop.eup %7852  ;;  %v4180_v45 = vsel %vm3912_vm11, %v9586_v7, 0.0 }
 0xe08   :  { %v7855_v42 = vpop.eup %7854  ;;  %4181 = vadd.xlane.f32.xlu0 %v4180_v45  ;;  %v4177_v37 = vsel %vm3912_vm11, %v9588_v15, 0.0  ;;  %v4833_v45 = vsel %vm4303_vm12, %v9299_v39, 0  ;;  %v4038_v39 = vsub.f32 %v9442_v47, %v4002_v48  ;;  %v4929_v47 = vsel %vm4303_vm12, %v9337_v13, 0 }
 0xe09   :  { %v4238_v14 = vmul.f32 %v7855_v42, %v9423_v22  ;;  %4178 = vadd.xlane.f32.xlu1 %v4177_v37 }
 0xe0b   :  { %v4270_v10 = vpack.c.bf16 %v4238_v14, %v4238_v14 }
 0xe0c   :  { %v9606_v34 = vpop.xlane.xlu0 %4007 }
 0xe0d   :  { %7315 = vmatmul.mubr.msk.bf16.vlgmr.msra.gmra.mxu1 %vm4299_vm13, %v4270_v10  ;;  %v4005_v44 = vpop.xlane.xlu1 %4004 }
 0xe0e   :  { %v9598_v61 = vpop.eup %7856  ;;  %7325 = vmatpush3.bf16.msra.mxu1 %v4641_v16  ;;  %7326 = vmatprep.mubr.msk.bf16.mxu1 %vm8342_vm0, %v10022_v32  ;;  %v4039_v42 = vsub.f32 %v9454_v28, %v4005_v44  ;;  %v4099_v16 = vmul.f32 1.442695, %v4038_v39  ;;  %v4881_v28 = vsel %vm4303_vm12, %v9301_v51, 0  ;;  %v5025_v44 = vsel %vm4303_vm12, %v9343_v54, 0 }
 0xe0f   :  { %v4186_v46 = vsel %vm3912_vm11, %v9598_v61, 0.0  ;;  %7336 = vmatprep.subr.bf16.mxu1 %v10022_v32  ;;  %v7859_v22 = vpop.eup %7858 }
 0xe10   :  { %4187 = vadd.xlane.f32.xlu0 %v4186_v46  ;;  %v4240_v63 = vmul.f32 %v7859_v22, %v9435_v5  ;;  %v4101_v48 = vmul.f32 1.442695, %v4039_v42 }
 0xe12   :  { %v4272_v26 = vpack.c.bf16 %v4240_v63, %v4240_v63 }
 0xe15   :  { %7327 = vmatmul.mubr.msk.bf16.vlgmr.msra.gmra.mxu1 %vm4299_vm13, %v4272_v26  ;;  %v4134_v12 = vpop.xlane.xlu1 %4133  ;;  %v4977_v26 = vsel %vm4303_vm12, %v9309_v57, 0 }
 0xe16   :  { %7337 = vmatpush3.bf16.msra.mxu1 %v4737_v49  ;;  %v4131_v35 = vpop.xlane.xlu0 %4130  ;;  %7860 = vrcp.f32 %v4134_v12  ;;  %7338 = vmatprep.mubr.msk.bf16.mxu1 %vm8342_vm0, %v10022_v32 }
 0xe17   :  { %7862 = vrcp.f32 %v4131_v35  ;;  %7348 = vmatprep.subr.bf16.mxu1 %v10022_v32 }
 0xe1a   :  { %5643 = vrot.lane.b32.xlu1 %v9041_v33, %s8328_s20 }
 0xe1e   :  { %v4140_v5 = vpop.xlane.xlu0 %4139 }
 0xe1f   :  { %7864 = vrcp.f32 %v4140_v5  ;;  %v4137_v27 = vpop.xlane.xlu1 %4136 }
 0xe20   :  { %7866 = vrcp.f32 %v4137_v27  ;;  %v5073_v27 = vsel %vm4303_vm12, %v9321_v25, 0 }
 0xe23   :  { %v7861_v24 = vpop.eup %7860 }
 0xe24   :  { %v7863_v3 = vpop.eup %7862  ;;  %v4242_v40 = vmul.f32 %v7861_v24, %v9461_v56  ;;  %v4785_v56 = vsel %vm4303_vm12, %v9293_v17, 0 }
 0xe25   :  { %v4241_v31 = vmul.f32 %v7863_v3, %v9465_v23  ;;  %v4037_v23 = vsub.f32 %v9445_v8, %v3999_v53  ;;  %v4040_v53 = vsub.f32 %v9451_v55, %v9606_v34 }
 0xe26   :  { %v4274_v29 = vpack.c.bf16 %v4242_v40, %v4242_v40  ;;  %5691 = vrot.lane.b32.xlu0 %v9039_v30, %s8328_s20  ;;  %v4146_v4 = vpop.xlane.xlu0 %4145 }
 0xe27   :  { %v4273_v19 = vpack.c.bf16 %v4241_v31, %v4241_v31  ;;  %7868 = vrcp.f32 %v4146_v4  ;;  %v4143_v33 = vpop.xlane.xlu1 %4142  ;;  %v4097_v8 = vmul.f32 1.442695, %v4037_v23 }
 0xe28   :  { %7870 = vrcp.f32 %v4143_v33  ;;  %7339 = vmatmul.mubr.msk.bf16.vlgmr.msra.gmra.mxu1 %vm4299_vm13, %v4274_v29 }
 0xe29   :  { %7333 = vmatmul.mubr.msk.bf16.vlgmr.msra.gmra.mxu0 %vm4299_vm13, %v4273_v19  ;;  %7349 = vmatpush3.bf16.msra.mxu1 %v4833_v45  ;;  %7872 = vpow2.f32 %v4093_v36 }
 0xe2a   :  { %7343 = vmatpush3.bf16.msra.mxu0 %v4785_v56  ;;  %7344 = vmatprep.mubr.msk.bf16.mxu0 %vm8342_vm0, %v10022_v32 }
 0xe2b   :  { %7350 = vmatprep.mubr.msk.bf16.mxu1 %vm8342_vm0, %v10022_v32  ;;  %7354 = vmatprep.subr.bf16.mxu0 %v10022_v32 }
 0xe2c   :  { %v7865_v30 = vpop.eup %7864  ;;  %7360 = vmatprep.subr.bf16.mxu1 %v10022_v32 }
 0xe2d   :  { %v7867_v17 = vpop.eup %7866  ;;  %v4244_v37 = vmul.f32 %v7865_v30, %v9471_v20  ;;  %v4103_v20 = vmul.f32 1.442695, %v4040_v53 }
 0xe2e   :  { %v4243_v14 = vmul.f32 %v7867_v17, %v9474_v62 }
 0xe2f   :  { %v4276_v59 = vpack.c.bf16 %v4244_v37, %v4244_v37  ;;  %v4149_v10 = vpop.xlane.xlu1 %4148 }
 0xe30   :  { %v4275_v46 = vpack.c.bf16 %v4243_v14, %v4243_v14  ;;  %7874 = vrcp.f32 %v4149_v10 }
 0xe31   :  { %7876 = vpow2.f32 %v4097_v8  ;;  %7351 = vmatmul.mubr.msk.bf16.vlgmr.msra.gmra.mxu1 %vm4299_vm13, %v4276_v59 }
 0xe32   :  { %7345 = vmatmul.mubr.msk.bf16.vlgmr.msra.gmra.mxu0 %vm4299_vm13, %v4275_v46  ;;  %7361 = vmatpush3.bf16.msra.mxu1 %v4929_v47  ;;  %7878 = vpow2.f32 %v4099_v16  ;;  %v10025_v16 = vld [vmem:[#allocation64_spill] sm:$0xff]  ;;  %v10026_v46 = vld [vmem:[#allocation66_spill] sm:$0xff] }
 0xe33   :  { %7355 = vmatpush3.bf16.msra.mxu0 %v4881_v28  ;;  %7356 = vmatprep.mubr.msk.bf16.mxu0 %vm8342_vm0, %v10022_v32  ;;  %7880 = vpow2.f32 %v4101_v48  ;;  %v5217_v53 = vsel %vm4303_vm12, %v10025_v16, 0 }
 0xe34   :  { %v7869_v55 = vpop.eup %7868  ;;  %7362 = vmatprep.mubr.msk.bf16.mxu1 %vm8342_vm0, %v10022_v32  ;;  %7366 = vmatprep.subr.bf16.mxu0 %v10022_v32  ;;  %7882 = vpow2.f32 %v4103_v20 }
 0xe35   :  { %v7871_v13 = vpop.eup %7870  ;;  %v4246_v62 = vmul.f32 %v7869_v55, %v9480_v0  ;;  %7372 = vmatprep.subr.bf16.mxu1 %v10022_v32 }
 0xe36   :  { %v4245_v51 = vmul.f32 %v7871_v13, %v9482_v41  ;;  %v9657_v34 = vpop.eup %7872 }
 0xe37   :  { %v4278_v22 = vpack.c.bf16 %v4246_v62, %v4246_v62  ;;  %v4183_v0 = vsel %vm3912_vm11, %v9657_v34, 0.0  ;;  %v10028_v62 = vld [vmem:[#allocation67_spill] sm:$0xff] }
 0xe38   :  { %v4277_v63 = vpack.c.bf16 %v4245_v51, %v4245_v51 }
 0xe39   :  { %7363 = vmatmul.mubr.msk.bf16.vlgmr.msra.gmra.mxu1 %vm4299_vm13, %v4278_v22 }
 0xe3a   :  { %7357 = vmatmul.mubr.msk.bf16.vlgmr.msra.gmra.mxu0 %vm4299_vm13, %v4277_v63  ;;  %7373 = vmatpush3.bf16.msra.mxu1 %v5025_v44 }
 0xe3b   :  { %7367 = vmatpush3.bf16.msra.mxu0 %v4977_v26  ;;  %7368 = vmatprep.mubr.msk.bf16.mxu0 %vm8342_vm0, %v10022_v32 }
 0xe3c   :  { %7378 = vmatprep.subr.bf16.mxu0 %v10022_v32  ;;  %7374 = vmatprep.mubr.msk.bf16.mxu1 %vm8342_vm0, %v10022_v32 }
 0xe3d   :  { %v7875_v54 = vpop.eup %7874  ;;  %7384 = vmatprep.subr.bf16.mxu1 %v10022_v32 }
 0xe3e   :  { %v9670_v41 = vpop.eup %7876  ;;  %v4247_v57 = vmul.f32 %v7875_v54, %v9488_v58  ;;  %4184 = vadd.xlane.f32.xlu1 %v4183_v0  ;;  %v10029_v0 = vld [vmem:[#allocation71_spill] sm:$0xff] }
 0xe3f   :  { %v9673_v12 = vpop.eup %7878  ;;  %v4189_v35 = vsel %vm3912_vm11, %v9670_v41, 0.0 }
 0xe40   :  { %v4279_v49 = vpack.c.bf16 %v4247_v57, %v4247_v57  ;;  %v9677_v5 = vpop.eup %7880  ;;  %v4192_v58 = vsel %vm3912_vm11, %v9673_v12, 0.0  ;;  %v10030_v57 = vld [vmem:[#allocation68_spill] sm:$0xff] }
 0xe41   :  { %v9687_v24 = vpop.eup %7882  ;;  %v4195_v3 = vsel %vm3912_vm11, %v9677_v5, 0.0 }
 0xe42   :  { %4190 = vadd.xlane.f32.xlu1 %v4189_v35  ;;  %7369 = vmatmul.mubr.msk.bf16.vlgmr.msra.gmra.mxu0 %vm4299_vm13, %v4279_v49  ;;  %v4198_v25 = vsel %vm3912_vm11, %v9687_v24, 0.0  ;;  %v5361_v49 = vsel %vm4303_vm12, %v10030_v57, 0 }
 0xe43   :  { %7379 = vmatpush3.bf16.msra.mxu0 %v5073_v27  ;;  %7380 = vmatprep.mubr.msk.bf16.mxu0 %vm8342_vm0, %v10022_v32 }
 0xe44   :  { %7390 = vmatprep.subr.bf16.mxu0 %v10022_v32 }
 0xe45   :  { %4193 = vadd.xlane.f32.xlu0 %v4192_v58 }
 0xe46   :  { %4196 = vadd.xlane.f32.xlu1 %v4195_v3 }
 0xe49   :  { %4199 = vadd.xlane.f32.xlu0 %v4198_v25  ;;  %v10031_v25 = vld [vmem:[#allocation65_spill] sm:$0xff] }
 0xe57   :  { %5739 = vrot.lane.b32.xlu1 %v9055_v43, %s8328_s20  ;;  %v10024_v43 = vld [vmem:[#allocation63_spill] sm:$0xff] }
 0xe58   :  { %v5121_v30 = vsel %vm4303_vm12, %v10024_v43, 0  ;;  %v5601_v43 = vsel %vm4303_vm12, %v9495_v9, 0 }
 0xe5b   :  { %v4152_v40 = vpop.xlane.xlu0 %4151 }
 0xe5c   :  { %7884 = vrcp.f32 %v4152_v40  ;;  %v5505_v40 = vsel %vm4303_vm12, %v10031_v25, 0 }
 0xe5f   :  { %5787 = vrot.lane.b32.xlu0 %v10023_v50, %s8328_s20  ;;  %v4158_v31 = vpop.xlane.xlu0 %4157  ;;  %s8353_s20 = smov 8  }
 0xe60   :  { %7886 = vrcp.f32 %v4158_v31 }
 0xe63   :  { %v4164_v4 = vpop.xlane.xlu0 %4163 }
 0xe64   :  { %v4155_v29 = vpop.xlane.xlu1 %4154 }
 0xe65   :  { %7888 = vrcp.f32 %v4155_v29 }
 0xe66   :  { %7890 = vrcp.f32 %v4164_v4 }
 0xe67   :  { %v4170_v23 = vpop.xlane.xlu0 %4169 }
 0xe68   :  { %v4161_v19 = vpop.xlane.xlu1 %4160 }
 0xe69   :  { %v7885_v33 = vpop.eup %7884  ;;  %7892 = vrcp.f32 %v4161_v19 }
 0xe6a   :  { %v4248_v45 = vmul.f32 %v7885_v33, %v9502_v21  ;;  %7894 = vrcp.f32 %v4170_v23 }
 0xe6c   :  { %v4280_v56 = vpack.c.bf16 %v4248_v45, %v4248_v45 }
 0xe6d   :  { %v7887_v36 = vpop.eup %7886 }
 0xe6e   :  { %7375 = vmatmul.mubr.msk.bf16.vlgmr.msra.gmra.mxu1 %vm4299_vm13, %v4280_v56  ;;  %v4250_v39 = vmul.f32 %v7887_v36, %v9507_v18  ;;  %v5169_v18 = vsel %vm4303_vm12, %v10026_v46, 0 }
 0xe6f   :  { %7385 = vmatpush3.bf16.msra.mxu1 %v5121_v30  ;;  %7386 = vmatprep.mubr.msk.bf16.mxu1 %vm8342_vm0, %v10022_v32  ;;  %v4176_v59 = vpop.xlane.xlu0 %4175 }
 0xe70   :  { %7396 = vmatprep.subr.bf16.mxu1 %v10022_v32  ;;  %v4282_v8 = vpack.c.bf16 %v4250_v39, %v4250_v39  ;;  %v10033_v39 = vld [vmem:[#allocation72_spill] sm:$0xff] }
 0xe72   :  { %v7889_v17 = vpop.eup %7888 }
 0xe73   :  { %v4249_v21 = vmul.f32 %v7889_v17, %v9514_v6  ;;  %v7891_v37 = vpop.eup %7890  ;;  %v5553_v17 = vsel %vm4303_vm12, %v10033_v39, 0 }
 0xe74   :  { %v4167_v42 = vpop.xlane.xlu1 %4166  ;;  %v4252_v6 = vmul.f32 %v7891_v37, %v9511_v60  ;;  %v10027_v60 = vld [vmem:[#allocation69_spill] sm:$0xff] }
 0xe75   :  { %v4281_v14 = vpack.c.bf16 %v4249_v21, %v4249_v21  ;;  %7896 = vrcp.f32 %v4167_v42  ;;  %v5313_v13 = vsel %vm4303_vm12, %v10027_v60, 0 }
 0xe76   :  { %v7893_v10 = vpop.eup %7892  ;;  %7387 = vmatmul.mubr.msk.bf16.vlgmr.msra.gmra.mxu1 %vm4299_vm13, %v4282_v8  ;;  %7898 = vrcp.f32 %v4176_v59  ;;  %v4284_v48 = vpack.c.bf16 %v4252_v6, %v4252_v6 }
 0xe77   :  { %7381 = vmatmul.mubr.msk.bf16.vlgmr.msra.gmra.mxu0 %vm4299_vm13, %v4281_v14  ;;  %7397 = vmatpush3.bf16.msra.mxu1 %v5217_v53  ;;  %v4251_v47 = vmul.f32 %v7893_v10, %v9522_v11  ;;  %v7895_v55 = vpop.eup %7894  ;;  %v5265_v11 = vsel %vm4303_vm12, %v10028_v62, 0 }
 0xe78   :  { %7391 = vmatpush3.bf16.msra.mxu0 %v5169_v18  ;;  %7392 = vmatprep.mubr.msk.bf16.mxu0 %vm8342_vm0, %v10022_v32  ;;  %v4254_v51 = vmul.f32 %v7895_v55, %v9520_v52  ;;  %v5409_v52 = vsel %vm4303_vm12, %v10029_v0, 0 }
 0xe79   :  { %7398 = vmatprep.mubr.msk.bf16.mxu1 %vm8342_vm0, %v10022_v32  ;;  %7402 = vmatprep.subr.bf16.mxu0 %v10022_v32  ;;  %v4283_v20 = vpack.c.bf16 %v4251_v47, %v4251_v47 }
 0xe7a   :  { %7408 = vmatprep.subr.bf16.mxu1 %v10022_v32  ;;  %v4286_v44 = vpack.c.bf16 %v4254_v51, %v4254_v51 }
 0xe7c   :  { %v4173_v28 = vpop.xlane.xlu1 %4172 }
 0xe7d   :  { %7900 = vrcp.f32 %v4173_v28 }
 0xe7e   :  { %7399 = vmatmul.mubr.msk.bf16.vlgmr.msra.gmra.mxu1 %vm4299_vm13, %v4284_v48 }
 0xe7f   :  { %7393 = vmatmul.mubr.msk.bf16.vlgmr.msra.gmra.mxu0 %vm4299_vm13, %v4283_v20  ;;  %7409 = vmatpush3.bf16.msra.mxu1 %v5313_v13 }
 0xe80   :  { %7403 = vmatpush3.bf16.msra.mxu0 %v5265_v11  ;;  %7404 = vmatprep.mubr.msk.bf16.mxu0 %vm8342_vm0, %v10022_v32 }
 0xe81   :  { %7410 = vmatprep.mubr.msk.bf16.mxu1 %vm8342_vm0, %v10022_v32  ;;  %7414 = vmatprep.subr.bf16.mxu0 %v10022_v32 }
 0xe82   :  { %v7897_v22 = vpop.eup %7896  ;;  %7420 = vmatprep.subr.bf16.mxu1 %v10022_v32 }
 0xe83   :  { %v4253_v63 = vmul.f32 %v7897_v22, %v9549_v1  ;;  %v7899_v26 = vpop.eup %7898 }
 0xe84   :  { %v4256_v35 = vmul.f32 %v7899_v26, %v9534_v2  ;;  %v10032_v2 = vld [vmem:[#allocation70_spill] sm:$0xff] }
 0xe85   :  { %v4285_v54 = vpack.c.bf16 %v4253_v63, %v4253_v63  ;;  %v5457_v50 = vsel %vm4303_vm12, %v10032_v2, 0 }
 0xe86   :  { %7411 = vmatmul.mubr.msk.bf16.vlgmr.msra.gmra.mxu1 %vm4299_vm13, %v4286_v44  ;;  %v4288_v58 = vpack.c.bf16 %v4256_v35, %v4256_v35 }
 0xe87   :  { %7405 = vmatmul.mubr.msk.bf16.vlgmr.msra.gmra.mxu0 %vm4299_vm13, %v4285_v54  ;;  %7421 = vmatpush3.bf16.msra.mxu1 %v5409_v52 }
 0xe88   :  { %7415 = vmatpush3.bf16.msra.mxu0 %v5361_v49  ;;  %7416 = vmatprep.mubr.msk.bf16.mxu0 %vm8342_vm0, %v10022_v32 }
 0xe89   :  { %7422 = vmatprep.mubr.msk.bf16.mxu1 %vm8342_vm0, %v10022_v32  ;;  %7426 = vmatprep.subr.bf16.mxu0 %v10022_v32 }
 0xe8a   :  { %v7901_v1 = vpop.eup %7900  ;;  %7432 = vmatprep.subr.bf16.mxu1 %v10022_v32 }
 0xe8b   :  { %v4255_v27 = vmul.f32 %v7901_v1, %v9566_v38 }
 0xe8d   :  { %v4287_v3 = vpack.c.bf16 %v4255_v27, %v4255_v27 }
 0xe8e   :  { %7423 = vmatmul.mubr.msk.bf16.vlgmr.msra.gmra.mxu1 %vm4299_vm13, %v4288_v58 }
 0xe8f   :  { %7417 = vmatmul.mubr.msk.bf16.vlgmr.msra.gmra.mxu0 %vm4299_vm13, %v4287_v3  ;;  %7433 = vmatpush3.bf16.msra.mxu1 %v5505_v40 }
 0xe90   :  { %7427 = vmatpush3.bf16.msra.mxu0 %v5457_v50  ;;  %7428 = vmatprep.mubr.msk.bf16.mxu0 %vm8342_vm0, %v10022_v32 }
 0xe91   :  { %v4182_v31 = vpop.xlane.xlu0 %4181  ;;  %7434 = vmatprep.mubr.msk.bf16.mxu1 %vm8342_vm0, %v10022_v32  ;;  %7438 = vmatprep.subr.bf16.mxu0 %v10022_v32 }
 0xe92   :  { %7902 = vrcp.f32 %v4182_v31  ;;  %v4179_v38 = vpop.xlane.xlu1 %4178  ;;  %7444 = vmatprep.subr.bf16.mxu1 %v10022_v32 }
 0xe93   :  { %7904 = vrcp.f32 %v4179_v38 }
 0xe96   :  { %v5644_v63 = vpop.permute.xlu1 %5643 }
 0xe97   :  { %v5649_v31 = vsel %vm4303_vm12, %v5644_v63, 0 }
 0xe99   :  { %v4188_v29 = vpop.xlane.xlu0 %4187 }
 0xe9a   :  { %7906 = vrcp.f32 %v4188_v29 }
 0xe9d   :  { %v5692_v37 = vpop.permute.xlu0 %5691 }
 0xe9e   :  { %v5697_v53 = vsel %vm4303_vm12, %v5692_v37, 0 }
 0xe9f   :  { %v7903_v4 = vpop.eup %7902 }
 0xea0   :  { %v7905_v19 = vpop.eup %7904  ;;  %v4258_v33 = vmul.f32 %v7903_v4, %v9586_v7 }
 0xea1   :  { %v4257_v45 = vmul.f32 %v7905_v19, %v9588_v15 }
 0xea2   :  { %v4290_v56 = vpack.c.bf16 %v4258_v33, %v4258_v33 }
 0xea3   :  { %v4289_v36 = vpack.c.bf16 %v4257_v45, %v4257_v45  ;;  %v9762_v23 = vpop.f32.mrf.mxu1 }
 0xea4   :  { %v9766_v30 = vpop.f32.mrf.mxu0  ;;  %7435 = vmatmul.mubr.msk.bf16.vlgmr.msra.gmra.mxu1 %vm4299_vm13, %v4290_v56 }
 0xea5   :  { %v7292_v21 = vpop.f32.mrf.mxu1  ;;  %7429 = vmatmul.mubr.msk.bf16.vlgmr.msra.gmra.mxu0 %vm4299_vm13, %v4289_v36  ;;  %7445 = vmatpush3.bf16.msra.mxu1 %v5601_v43 }
 0xea6   :  { %v7286_v7 = vpop.f32.mrf.mxu0  ;;  %7439 = vmatpush3.bf16.msra.mxu0 %v5553_v17  ;;  %7446 = vmatprep.mubr.msk.bf16.mxu1 %vm8342_vm0, %v10022_v32 }
 0xea7   :  { %v7907_v15 = vpop.eup %7906  ;;  %v4392_v8 = vpop.f32.mrf.mxu1  ;;  %7456 = vmatprep.subr.bf16.mxu1 %v10022_v32  ;;  %7440 = vmatprep.mubr.msk.bf16.mxu0 %vm8342_vm0, %v10022_v32 }
 0xea8   :  { %v4260_v9 = vmul.f32 %v7907_v15, %v9598_v61  ;;  %v4344_v42 = vpop.f32.mrf.mxu0  ;;  %7450 = vmatprep.subr.bf16.mxu0 %v10022_v32 }
 0xea9   :  { %v7293_v14 = vpop.f32.mrf.mxu1 }
 0xeaa   :  { %v4292_v59 = vpack.c.bf16 %v4260_v9, %v4260_v9  ;;  %v7287_v10 = vpop.f32.mrf.mxu0 }
 0xeab   :  { %v9779_v16 = vpop.f32.mrf.mxu1 }
 0xeac   :  { %v9782_v46 = vpop.f32.mrf.mxu0  ;;  %7447 = vmatmul.mubr.msk.bf16.vlgmr.msra.gmra.mxu1 %vm4299_vm13, %v4292_v59 }
 0xead   :  { %v7304_v18 = vpop.f32.mrf.mxu1  ;;  %7457 = vmatpush3.bf16.msra.mxu1 %v5697_v53  ;;  %7458 = vmatprep.mubr.msk.bf16.mxu1 %vm8342_vm0, %v10022_v32 }
 0xeae   :  { %v7298_v61 = vpop.f32.mrf.mxu0  ;;  %7468 = vmatprep.subr.bf16.mxu1 %v10022_v32 }
 0xeaf   :  { %v4488_v6 = vpop.f32.mrf.mxu1 }
 0xeb0   :  { %v4440_v47 = vpop.f32.mrf.mxu0 }
 0xeb1   :  { %v7305_v48 = vpop.f32.mrf.mxu1 }
 0xeb2   :  { %v7299_v28 = vpop.f32.mrf.mxu0 }
 0xeb4   :  { %v9788_v55 = vpop.f32.mrf.mxu0 }
 0xeb6   :  { %v7310_v20 = vpop.f32.mrf.mxu0 }
 0xeb8   :  { %v4536_v60 = vpop.f32.mrf.mxu0 }
 0xeba   :  { %v7311_v13 = vpop.f32.mrf.mxu0 }
 0xebc   :  { %v9790_v62 = vpop.f32.mrf.mxu0 }
 0xebe   :  { %v7322_v11 = vpop.f32.mrf.mxu0 }
 0xec0   :  { %v4632_v51 = vpop.f32.mrf.mxu0 }
 0xec2   :  { %v7323_v22 = vpop.f32.mrf.mxu0 }
 0xec7   :  { %v4185_v44 = vpop.xlane.xlu1 %4184 }
 0xec8   :  { %7908 = vrcp.f32 %v4185_v44 }
 0xecb   :  { %v4191_v26 = vpop.xlane.xlu1 %4190 }
 0xecc   :  { %7910 = vrcp.f32 %v4191_v26 }
 0xecd   :  { %v9792_v54 = vpop.f32.mrf.mxu1 }
 0xece   :  { %v4194_v0 = vpop.xlane.xlu0 %4193 }
 0xecf   :  { %v7316_v52 = vpop.f32.mrf.mxu1  ;;  %7912 = vrcp.f32 %v4194_v0  ;;  %v4197_v57 = vpop.xlane.xlu1 %4196 }
 0xed1   :  { %v4584_v49 = vpop.f32.mrf.mxu1 }
 0xed2   :  { %v4200_v35 = vpop.xlane.xlu0 %4199 }
 0xed3   :  { %v7317_v1 = vpop.f32.mrf.mxu1  ;;  %7914 = vrcp.f32 %v4200_v35  ;;  %v5740_v45 = vpop.permute.xlu1 %5739 }
 0xed4   :  { %7916 = vrcp.f32 %v4197_v57  ;;  %v5745_v17 = vsel %vm4303_vm12, %v5740_v45, 0 }
 0xed5   :  { %v7909_v27 = vpop.eup %7908  ;;  %v9794_v58 = vpop.f32.mrf.mxu1 }
 0xed6   :  { %v4259_v3 = vmul.f32 %v7909_v27, %v9657_v34  ;;  %v5788_v19 = vpop.permute.xlu0 %5787 }
 0xed7   :  { %v7328_v25 = vpop.f32.mrf.mxu1  ;;  %v5793_v39 = vsel %vm4303_vm12, %v5788_v19, 0 }
 0xed8   :  { %v4291_v40 = vpack.c.bf16 %v4259_v3, %v4259_v3 }
 0xed9   :  { %v7911_v2 = vpop.eup %7910  ;;  %v4680_v50 = vpop.f32.mrf.mxu1 }
 0xeda   :  { %7441 = vmatmul.mubr.msk.bf16.vlgmr.msra.gmra.mxu0 %vm4299_vm13, %v4291_v40  ;;  %v4261_v4 = vmul.f32 %v7911_v2, %v9670_v41 }
 0xedb   :  { %v7329_v38 = vpop.f32.mrf.mxu1  ;;  %7451 = vmatpush3.bf16.msra.mxu0 %v5649_v31  ;;  %7452 = vmatprep.mubr.msk.bf16.mxu0 %vm8342_vm0, %v10022_v32 }
 0xedc   :  { %v7913_v29 = vpop.eup %7912  ;;  %7462 = vmatprep.subr.bf16.mxu0 %v10022_v32  ;;  %v4293_v36 = vpack.c.bf16 %v4261_v4, %v4261_v4 }
 0xedd   :  { %v4262_v34 = vmul.f32 %v7913_v29, %v9673_v12 }
 0xedf   :  { %v4294_v33 = vpack.c.bf16 %v4262_v34, %v4262_v34 }
 0xee0   :  { %v7915_v56 = vpop.eup %7914 }
 0xee1   :  { %v7917_v43 = vpop.eup %7916  ;;  %7459 = vmatmul.mubr.msk.bf16.vlgmr.msra.gmra.mxu1 %vm4299_vm13, %v4294_v33  ;;  %v4264_v41 = vmul.f32 %v7915_v56, %v9687_v24 }
 0xee2   :  { %7453 = vmatmul.mubr.msk.bf16.vlgmr.msra.gmra.mxu0 %vm4299_vm13, %v4293_v36  ;;  %7469 = vmatpush3.bf16.msra.mxu1 %v5793_v39  ;;  %v4263_v12 = vmul.f32 %v7917_v43, %v9677_v5 }
 0xee3   :  { %7463 = vmatpush3.bf16.msra.mxu0 %v5745_v17  ;;  %7464 = vmatprep.mubr.msk.bf16.mxu0 %vm8342_vm0, %v10022_v32  ;;  %v4296_v21 = vpack.c.bf16 %v4264_v41, %v4264_v41 }
 0xee4   :  { %7470 = vmatprep.mubr.msk.bf16.mxu1 %vm8342_vm0, %v10022_v32  ;;  %7474 = vmatprep.subr.bf16.mxu0 %v10022_v32  ;;  %v4295_v7 = vpack.c.bf16 %v4263_v12, %v4263_v12 }
 0xee5   :  { %7482 = vmatprep.subr.bf16.mxu1 %v10022_v32 }
 0xee8   :  { %v4773_v15 = vpop.f32.mrf.mxu1 }
 0xee9   :  { %v4725_v8 = vpop.f32.mrf.mxu0  ;;  %7471 = vmatmul.mubr.msk.bf16.vlgmr.msra.gmra.mxu1 %vm4299_vm13, %v4296_v21  ;;  %5845 = vrot.lane.b32.xlu0 %v4773_v15, %s8353_s20 }
 0xeea   :  { %7465 = vmatmul.mubr.msk.bf16.vlgmr.msra.gmra.mxu0 %vm4299_vm13, %v4295_v7  ;;  %5843 = vrot.lane.b32.xlu1 %v4725_v8, %s8353_s20  ;;  %v7340_v5 = vpop.f32.mrf.mxu1 }
 0xeeb   :  { %v7334_v24 = vpop.f32.mrf.mxu0  ;;  %7478 = vmatprep.mubr.msk.bf16.mxu0 %vm8342_vm0, %v10022_v32  ;;  %7486 = vmatprep.mubr.msk.bf16.mxu1 %vm8342_vm0, %v10022_v32 }
 0xeec   :  { %v4776_v9 = vpop.f32.mrf.mxu1 }
 0xeed   :  { %v4728_v42 = vpop.f32.mrf.mxu0 }
 0xeee   :  { %v7341_v37 = vpop.f32.mrf.mxu1 }
 0xeef   :  { %v7335_v14 = vpop.f32.mrf.mxu0 }
 0xef1   :  { %v4869_v59 = vpop.f32.mrf.mxu1 }
 0xef2   :  { %v4821_v10 = vpop.f32.mrf.mxu0  ;;  %5849 = vrot.lane.b32.xlu0 %v4869_v59, %s8353_s20 }
 0xef3   :  { %5847 = vrot.lane.b32.xlu1 %v4821_v10, %s8353_s20  ;;  %v7352_v53 = vpop.f32.mrf.mxu1 }
 0xef4   :  { %v7346_v18 = vpop.f32.mrf.mxu0 }
 0xef5   :  { %v4872_v61 = vpop.f32.mrf.mxu1 }
 0xef6   :  { %v4824_v6 = vpop.f32.mrf.mxu0 }
 0xef7   :  { %v7353_v47 = vpop.f32.mrf.mxu1 }
 0xef8   :  { %v7347_v48 = vpop.f32.mrf.mxu0 }
 0xef9   :  { %v4965_v28 = vpop.f32.mrf.mxu1 }
 0xefa   :  { %v4917_v20 = vpop.f32.mrf.mxu0  ;;  %5853 = vrot.lane.b32.xlu0 %v4965_v28, %s8353_s20 }
 0xefb   :  { %5851 = vrot.lane.b32.xlu1 %v4917_v20, %s8353_s20  ;;  %v7364_v60 = vpop.f32.mrf.mxu1 }
 0xefc   :  { %v7358_v13 = vpop.f32.mrf.mxu0 }
 0xefd   :  { %v4968_v11 = vpop.f32.mrf.mxu1 }
 0xefe   :  { %v4920_v51 = vpop.f32.mrf.mxu0 }
 0xeff   :  { %v7365_v22 = vpop.f32.mrf.mxu1 }
 0xf00   :  { %v7359_v63 = vpop.f32.mrf.mxu0 }
 0xf02   :  { %v5013_v44 = vpop.f32.mrf.mxu0 }
 0xf03   :  { %5855 = vrot.lane.b32.xlu1 %v5013_v44, %s8353_s20 }
 0xf04   :  { %v7370_v26 = vpop.f32.mrf.mxu0 }
 0xf06   :  { %v5016_v0 = vpop.f32.mrf.mxu0 }
 0xf08   :  { %v7371_v52 = vpop.f32.mrf.mxu0 }
 0xf2e   :  { %v5061_v57 = vpop.f32.mrf.mxu1 }
 0xf2f   :  { %5857 = vrot.lane.b32.xlu0 %v5061_v57, %s8353_s20  ;;  %v7732_v57 = vld [vmem:[#allocation20 + $0x8] sm:$0xff]  }
 0xf30   :  { %v7376_v49 = vpop.f32.mrf.mxu1  ;;  %7475 = vmatpush3.bf16.msra.mxu0 %v7732_v57 }
 0xf31   :  { %7476 = vmatprep.subr.bf16.mxu0 %v10022_v32 }
 0xf32   :  { %v5064_v35 = vpop.f32.mrf.mxu1 }
 0xf34   :  { %v7377_v1 = vpop.f32.mrf.mxu1 }
 0xf35   :  { %v7733_v1 = vld [vmem:[#allocation20] sm:$0xff]  }
 0xf36   :  { %v5157_v27 = vpop.f32.mrf.mxu1  ;;  %7477 = vmatpush3.bf16.msra.mxu0 %v7733_v1 }
 0xf37   :  { %v5109_v3 = vpop.f32.mrf.mxu0  ;;  %5877 = vrot.lane.b32.xlu0 %v5157_v27, %s8346_s18  ;;  %7490 = vmatprep.subr.bf16.mxu0 %v10022_v32 }
 0xf38   :  { %5875 = vrot.lane.b32.xlu1 %v5109_v3, %s8346_s18  ;;  %v7388_v25 = vpop.f32.mrf.mxu1 }
 0xf39   :  { %v7382_v40 = vpop.f32.mrf.mxu0 }
 0xf3a   :  { %v5160_v2 = vpop.f32.mrf.mxu1 }
 0xf3b   :  { %v5112_v50 = vpop.f32.mrf.mxu0 }
 0xf3c   :  { %v7389_v31 = vpop.f32.mrf.mxu1 }
 0xf3d   :  { %v7383_v38 = vpop.f32.mrf.mxu0 }
 0xf3e   :  { %v5253_v29 = vpop.f32.mrf.mxu1 }
 0xf3f   :  { %v5205_v4 = vpop.f32.mrf.mxu0  ;;  %5881 = vrot.lane.b32.xlu0 %v5253_v29, %s8346_s18 }
 0xf40   :  { %5879 = vrot.lane.b32.xlu1 %v5205_v4, %s8346_s18  ;;  %v7400_v34 = vpop.f32.mrf.mxu1 }
 0xf41   :  { %v7394_v19 = vpop.f32.mrf.mxu0 }
 0xf42   :  { %v5256_v33 = vpop.f32.mrf.mxu1 }
 0xf43   :  { %v5208_v45 = vpop.f32.mrf.mxu0 }
 0xf44   :  { %v7401_v56 = vpop.f32.mrf.mxu1 }
 0xf45   :  { %v7395_v36 = vpop.f32.mrf.mxu0 }
 0xf46   :  { %v5349_v43 = vpop.f32.mrf.mxu1 }
 0xf47   :  { %v5301_v39 = vpop.f32.mrf.mxu0  ;;  %5885 = vrot.lane.b32.xlu0 %v5349_v43, %s8346_s18 }
 0xf48   :  { %5883 = vrot.lane.b32.xlu1 %v5301_v39, %s8346_s18  ;;  %v7412_v17 = vpop.f32.mrf.mxu1 }
 0xf49   :  { %v7406_v41 = vpop.f32.mrf.mxu0 }
 0xf4a   :  { %v5352_v12 = vpop.f32.mrf.mxu1 }
 0xf4b   :  { %v5304_v21 = vpop.f32.mrf.mxu0 }
 0xf4c   :  { %v7413_v7 = vpop.f32.mrf.mxu1 }
 0xf4d   :  { %v7407_v15 = vpop.f32.mrf.mxu0 }
 0xf4e   :  { %v5445_v8 = vpop.f32.mrf.mxu1 }
 0xf4f   :  { %v5397_v5 = vpop.f32.mrf.mxu0  ;;  %5889 = vrot.lane.b32.xlu0 %v5445_v8, %s8346_s18 }
 0xf50   :  { %5887 = vrot.lane.b32.xlu1 %v5397_v5, %s8346_s18  ;;  %v7424_v24 = vpop.f32.mrf.mxu1 }
 0xf51   :  { %v7418_v9 = vpop.f32.mrf.mxu0 }
 0xf52   :  { %v5448_v42 = vpop.f32.mrf.mxu1 }
 0xf53   :  { %v5400_v37 = vpop.f32.mrf.mxu0 }
 0xf54   :  { %v7425_v14 = vpop.f32.mrf.mxu1 }
 0xf55   :  { %v7419_v59 = vpop.f32.mrf.mxu0 }
 0xf5b   :  { %v5846_v19 = vpop.permute.xlu0 %5845 }
 0xf5c   :  { %v5844_v33 = vpop.permute.xlu1 %5843  ;;  %v5932_v59 = vsel %vm1024_vm6, %v9762_v23, %v5846_v19 }
 0xf64   :  { %v5541_v10 = vpop.f32.mrf.mxu1  ;;  %v5850_v45 = vpop.permute.xlu0 %5849 }
 0xf65   :  { %v5493_v53 = vpop.f32.mrf.mxu0  ;;  %5909 = vrot.lane.b32.xlu0 %v5541_v10, %s8354_s2  ;;  %v5848_v56 = vpop.permute.xlu1 %5847 }
 0xf66   :  { %5907 = vrot.lane.b32.xlu1 %v5493_v53, %s8354_s2  ;;  %v7436_v18 = vpop.f32.mrf.mxu1  ;;  %v5933_v10 = vsel %vm1024_vm6, %v9782_v46, %v5848_v56  ;;  %v5931_v53 = vsel %vm1024_vm6, %v9766_v30, %v5844_v33 }
 0xf67   :  { %v7430_v61 = vpop.f32.mrf.mxu0  ;;  %v5934_v18 = vsel %vm1024_vm6, %v9779_v16, %v5850_v45 }
 0xf68   :  { %v5544_v6 = vpop.f32.mrf.mxu1 }
 0xf69   :  { %v5496_v47 = vpop.f32.mrf.mxu0 }
 0xf6a   :  { %v7437_v48 = vpop.f32.mrf.mxu1 }
 0xf6b   :  { %v7431_v28 = vpop.f32.mrf.mxu0 }
 0xf6c   :  { %v5637_v20 = vpop.f32.mrf.mxu1  ;;  %v5854_v36 = vpop.permute.xlu0 %5853 }
 0xf6d   :  { %5913 = vrot.lane.b32.xlu0 %v5637_v20, %s8354_s2  ;;  %v5852_v43 = vpop.permute.xlu1 %5851  ;;  %v5936_v61 = vsel %vm1024_vm6, %v9792_v54, %v5854_v36 }
 0xf6e   :  { %v7448_v60 = vpop.f32.mrf.mxu1  ;;  %v5935_v23 = vsel %vm1024_vm6, %v9788_v55, %v5852_v43 }
 0xf70   :  { %v5640_v13 = vpop.f32.mrf.mxu1 }
 0xf72   :  { %v7449_v11 = vpop.f32.mrf.mxu1 }
 0xf75   :  { %v5856_v39 = vpop.permute.xlu1 %5855 }
 0xf9a   :  { %v5589_v51 = vpop.f32.mrf.mxu0 }
 0xf9b   :  { %5911 = vrot.lane.b32.xlu1 %v5589_v51, %s8354_s2 }
 0xf9c   :  { %v7442_v22 = vpop.f32.mrf.mxu0 }
 0xf9e   :  { %v5592_v63 = vpop.f32.mrf.mxu0 }
 0xfa0   :  { %v7443_v44 = vpop.f32.mrf.mxu0 }
 0xfa1   :  { %v5733_v26 = vpop.f32.mrf.mxu1  ;;  %v5858_v17 = vpop.permute.xlu0 %5857  ;;  %v5937_v44 = vsel %vm1024_vm6, %v9790_v62, %v5856_v39 }
 0xfa2   :  { %v5685_v0 = vpop.f32.mrf.mxu0  ;;  %5917 = vrot.lane.b32.xlu0 %v5733_v26, %s8354_s2  ;;  %v5938_v22 = vsel %vm1024_vm6, %v9794_v58, %v5858_v17 }
 0xfa3   :  { %5915 = vrot.lane.b32.xlu1 %v5685_v0, %s8354_s2  ;;  %v7460_v52 = vpop.f32.mrf.mxu1 }
 0xfa4   :  { %v7454_v49 = vpop.f32.mrf.mxu0 }
 0xfa5   :  { %v5736_v35 = vpop.f32.mrf.mxu1 }
 0xfa6   :  { %v5688_v27 = vpop.f32.mrf.mxu0 }
 0xfa7   :  { %v7461_v3 = vpop.f32.mrf.mxu1 }
 0xfa8   :  { %v7455_v25 = vpop.f32.mrf.mxu0  ;;  %v10034_v3 = vld [vmem:[#allocation57_spill] sm:$0xff] }
 0xfa9   :  { %v5829_v40 = vpop.f32.mrf.mxu1  ;;  %v5878_v41 = vpop.permute.xlu0 %5877 }
 0xfaa   :  { %v5781_v2 = vpop.f32.mrf.mxu0  ;;  %5921 = vrot.lane.b32.xlu0 %v5829_v40, %s8354_s2  ;;  %v5876_v12 = vpop.permute.xlu1 %5875  ;;  %v5940_v28 = vsel %vm634_vm4, %v5932_v59, %v5878_v41 }
 0xfab   :  { %5919 = vrot.lane.b32.xlu1 %v5781_v2, %s8354_s2  ;;  %v7472_v50 = vpop.f32.mrf.mxu1  ;;  %v5939_v46 = vsel %vm634_vm4, %v5931_v53, %v5876_v12 }
 0xfac   :  { %v7466_v31 = vpop.f32.mrf.mxu0 }
 0xfad   :  { %v5832_v38 = vpop.f32.mrf.mxu1 }
 0xfae   :  { %v5784_v29 = vpop.f32.mrf.mxu0 }
 0xfaf   :  { %v7473_v4 = vpop.f32.mrf.mxu1  ;;  %v7734_v29 = vld [vmem:[#allocation23 + $0x8] sm:$0xff]  }
 0xfb0   :  { %v7467_v34 = vpop.f32.mrf.mxu0  ;;  %7483 = vmatpush3.bf16.msra.mxu1 %v7734_v29  ;;  %v7735_v4 = vld [vmem:[#allocation23] sm:$0xff]  }
 0xfb1   :  { %v5882_v21 = vpop.permute.xlu0 %5881  ;;  %7484 = vmatprep.subr.bf16.mxu1 %v10022_v32  ;;  %v6722_v34 = vld [vmem:[#allocation22] ss:$0 sm:$0xff]  ;;  %v10038_v29 = vld [vmem:[#allocation53_spill] sm:$0xff] }
 0xfb2   :  { %v5880_v7 = vpop.permute.xlu1 %5879  ;;  %v5942_v30 = vsel %vm634_vm4, %v5934_v18, %v5882_v21 }
 0xfb3   :  { %v5941_v6 = vsel %vm634_vm4, %v5933_v10, %v5880_v7 }
 0xfb4   :  { %7485 = vmatpush3.bf16.msra.mxu1 %v7735_v4 }
 0xfb5   :  { %7498 = vmatprep.subr.bf16.mxu1 %v10022_v32 }
 0xfb9   :  { %v5886_v15 = vpop.permute.xlu0 %5885 }
 0xfba   :  { %v5884_v8 = vpop.permute.xlu1 %5883  ;;  %v5944_v16 = vsel %vm634_vm4, %v5936_v61, %v5886_v15 }
 0xfbb   :  { %v5943_v60 = vsel %vm634_vm4, %v5935_v23, %v5884_v8 }
 0xfc1   :  { %v5890_v5 = vpop.permute.xlu0 %5889 }
 0xfc2   :  { %v5888_v24 = vpop.permute.xlu1 %5887  ;;  %v5946_v26 = vsel %vm634_vm4, %v5938_v22, %v5890_v5 }
 0xfc3   :  { %v5945_v52 = vsel %vm634_vm4, %v5937_v44, %v5888_v24 }
 0xfd7   :  { %v5910_v9 = vpop.permute.xlu0 %5909 }
 0xfd8   :  { %v5908_v42 = vpop.permute.xlu1 %5907  ;;  %v5949_v54 = vsel %vm5947_vm14, %v5940_v28, %v5910_v9 }
 0xfd9   :  { %v5948_v13 = vsel %vm5947_vm14, %v5939_v46, %v5908_v42  ;;  %v10035_v42 = vld [vmem:[#allocation58_spill] sm:$0xff] }
 0xfda   :  { %v5964_v57 = vcombine.low %v5948_v13, %v5949_v54  ;;  %v6728_v13 = vld [vmem:[#allocation25] ss:$0 sm:$0xff] }
 0xfdc   :  { %v5972_v58 = vrot.slane %v5964_v57, %v10034_v3 }
 0xfdf   :  { %v5914_v37 = vpop.permute.xlu0 %5913 }
 0xfe0   :  { %v5951_v11 = vsel %vm5947_vm14, %v5942_v30, %v5914_v37 }
0x100d   :  { %v5912_v14 = vpop.permute.xlu1 %5911 }
0x100e   :  { %v5950_v20 = vsel %vm5947_vm14, %v5941_v6, %v5912_v14 }
0x100f   :  { %v5965_v63 = vcombine.low %v5950_v20, %v5951_v11 }
0x1011   :  { %v5979_v25 = vrot.slane %v5965_v63, %v10034_v3 }
0x1013   :  { %v5980_v50 = vcombine.low %v5972_v58, %v5979_v25 }
0x1014   :  { %v5918_v47 = vpop.permute.xlu0 %5917 }
0x1015   :  { %v5916_v48 = vpop.permute.xlu1 %5915  ;;  %v5953_v55 = vsel %vm5947_vm14, %v5944_v16, %v5918_v47 }
0x1016   :  { %v5952_v51 = vsel %vm5947_vm14, %v5943_v60, %v5916_v48 }
0x1017   :  { %v5981_v49 = vcombine.low %v5952_v51, %v5953_v55 }
0x1019   :  { %v5989_v2 = vrot.slane %v5981_v49, %v10034_v3 }
0x101c   :  { %v5922_v0 = vpop.permute.xlu0 %5921 }
0x101d   :  { %v5955_v35 = vsel %vm5947_vm14, %v5946_v26, %v5922_v0  ;;  %v5920_v1 = vpop.permute.xlu1 %5919  ;;  %v6732_v26 = vld [vmem:[#allocation26] ss:$0 sm:$0xff] }
0x101e   :  { %v5954_v27 = vsel %vm5947_vm14, %v5945_v52, %v5920_v1 }
0x101f   :  { %v5982_v40 = vcombine.low %v5954_v27, %v5955_v35  ;;  %v10036_v27 = vld [vmem:[#allocation52_spill] sm:$0xff] }
0x1021   :  { %v5996_v62 = vrot.slane %v5982_v40, %v10034_v3 }
0x1023   :  { %v5997_v31 = vcombine.low %v5989_v2, %v5996_v62 }
0x1025   :  { %v6000_v38 = vpack.c.bf16 %v5997_v31, %v5980_v50 }
0x1027   :  { %7479 = vmatmul.mubr.msk.bf16.vlgmr.msra.gmra.mxu0 %vm1516_vm7, %v6000_v38 }
0x1028   :  { %7494 = vmatprep.mubr.msk.bf16.mxu0 %vm8342_vm0, %v10022_v32 }
0x10e7   :  { %v6056_v19 = vpop.f32.mrf.mxu0 }
0x10e8   :  { %v6057_v33 = vadd.f32 %v6722_v34, %v6056_v19 }
0x10e9   :  { %v7480_v45 = vpop.f32.mrf.mxu0 }
0x10ea   :  { %v6065_v56 = vcombine.high %v6057_v33, %v6057_v33  ;;  %v6072_v36 = vrot.slane %v6057_v33, %v10034_v3 }
0x10eb   :  { %v6059_v43 = vpop.f32.mrf.mxu0 }
0x10ec   :  { %v6079_v39 = vrot.slane %v6065_v56, %v10034_v3  ;;  %v6080_v17 = vcombine.high %v6072_v36, %v6072_v36  ;;  %v6060_v41 = vadd.f32 %v6722_v34, %v6059_v43  ;;  %v10039_v34 = vld [vmem:[#allocation54_spill] sm:$0xff] }
0x10ed   :  { %v7481_v12 = vpop.f32.mrf.mxu0 }
0x10ee   :  { %v6081_v21 = vcombine.high %v6079_v39, %v6079_v39  ;;  %v6082_v7 = vcombine.high %v6060_v41, %v6060_v41  ;;  %v6089_v15 = vrot.slane %v6060_v41, %v10034_v3  ;;  %v6107_v8 = vcombine.low %v6072_v36, %v6080_v17  ;;  %v10040_v17 = vld [vmem:[#allocation61_spill] sm:$0xff]  ;;  %v10041_v41 = vld [vmem:[#allocation62_spill] sm:$0xff] }
0x10ef   :  { %v6805_v12 = vadd.f32 %v10041_v41, %v10040_v17  ;;  %v7740_v41 = vld [vmem:[%s8499_s5 + $0x8] sm:$0xff]  }
0x10f0   :  { %v6116_v5 = vcombine.low %v6079_v39, %v6081_v21  ;;  %v6096_v24 = vrot.slane %v6082_v7, %v10034_v3  ;;  %v6097_v9 = vcombine.high %v6089_v15, %v6089_v15  ;;  %v6114_v10 = vrot.slane %v6107_v8, %v10035_v42  ;;  %v7932_v21 = vld [vmem:[#allocation14] ss:$0 sm:$0xff]  ;;  %7491 = vmatpush3.bf16.msra.mxu0 %v7740_v41 }
0x10f1   :  { %v1965_v7 = vadd.f32 %v7932_v21, %v6805_v12  ;;  %7492 = vmatprep.subr.bf16.mxu0 %v10022_v32 }
0x10f2   :  { %v6123_v37 = vrot.slane %v6116_v5, %v10035_v42  ;;  %v6098_v14 = vcombine.high %v6096_v24, %v6096_v24  ;;  %v6125_v59 = vcombine.low %v6089_v15, %v6097_v9  ;;  %v10042_v15 = vld [vmem:[#allocation56_spill] sm:$0xff] }
0x10f3   :  { %v1969_v8 = vadd.f32 %v1965_v7, %v10042_v15 }
0x10f4   :  { %v6134_v53 = vcombine.low %v6096_v24, %v6098_v14  ;;  %v6155_v18 = vcombine.low %v6114_v10, %v6123_v37  ;;  %v6726_v61 = vcombine.high %v6114_v10, %v6123_v37  ;;  %v6132_v6 = vrot.slane %v6125_v59, %v10035_v42 }
0x10f5   :  { %v1975_v5 = vsel %vm362_vm3, %v1969_v8, 0.0  ;;  %v1981_v24 = vmul.f32 %v1969_v8, %v1969_v8 }
0x10f6   :  { %v6141_v47 = vrot.slane %v6134_v53, %v10035_v42  ;;  %v6163_v28 = vrot.slane %v6155_v18, %v10034_v3  ;;  %v6180_v46 = vrot.slane %v6726_v61, %v10034_v3  ;;  %v10043_v53 = vld [vmem:[#allocation55_spill] sm:$0xff] }
0x10f7   :  { %v1985_v9 = vsel %vm362_vm3, %v1981_v24, 0.0  ;;  %v10044_v18 = vld [vmem:[#allocation59_spill] sm:$0xff] }
0x10f8   :  { %v6156_v48 = vcombine.low %v6132_v6, %v6141_v47  ;;  %v6727_v23 = vcombine.high %v6132_v6, %v6141_v47  ;;  %v1968_v61 = vadd.f32 %v10044_v18, %v10043_v53 }
0x10fa   :  { %v6170_v20 = vrot.slane %v6156_v48, %v10034_v3  ;;  %v6187_v30 = vrot.slane %v6727_v23, %v10034_v3  ;;  %v10037_v3 = vld [vmem:[#allocation51_spill] sm:$0xff]  ;;  %v1972_v47 = vsel %vm362_vm3, %v1968_v61, 0.0  ;;  %v1980_v48 = vmul.f32 %v1968_v61, %v1968_v61 }
0x10fb   :  { %v6276_v25 = vsub.s32 %v10037_v3, %v10036_v27 }
0x10fc   :  { %v9901_v16 = vcombine.low %v6163_v28, %v6170_v20  ;;  %v9903_v60 = vcombine.low %v6180_v46, %v6187_v30  ;;  %v1982_v23 = vsel %vm362_vm3, %v1980_v48, 0.0  ;;  %v7736_v28 = vld [vmem:[%s8494_s13 + $0x18] sm:$0xff]   ;;  %v7737_v46 = vld [vmem:[%s8494_s13 + $0x10] sm:$0xff]   ;;  %v7738_v20 = vld [vmem:[%s8494_s13 + $0x8] sm:$0xff]  }
0x10fd   :  { %v7739_v30 = vld [vmem:[%s8494_s13] sm:$0xff]  }
0x10fe   :  { %v6191_v54 = vpack.c.bf16 %v9903_v60, %v9901_v16 }
0x1100   :  { %7487 = vmatmul.mubr.msk.bf16.vlgmr.msra.gmra.mxu1 %vm1516_vm7, %v6191_v54 }
0x1101   :  { %7506 = vmatprep.mubr.msk.bf16.mxu1 %vm8342_vm0, %v10022_v32  ;;  %vm6285_vm0 = vcmask 58368   ;;  %7499 = vmatpush3.bf16.msra.mxu1 %v7736_v28 }
0x1102   :  { %7500 = vmatprep.subr.bf16.mxu1 %v10022_v32 }
0x1105   :  { %7501 = vmatpush3.bf16.msra.mxu1 %v7737_v46 }
0x1106   :  { %7502 = vmatprep.subr.bf16.mxu1 %v10022_v32 }
0x1109   :  { %7503 = vmatpush3.bf16.msra.mxu1 %v7738_v20 }
0x110a   :  { %7504 = vmatprep.subr.bf16.mxu1 %v10022_v32 }
0x110d   :  { %7505 = vmatpush3.bf16.msra.mxu1 %v7739_v30 }
0x11c0   :  { %v6248_v11 = vpop.f32.mrf.mxu1 }
0x11c1   :  { %v6249_v55 = vadd.f32 %v6728_v13, %v6248_v11 }
0x11c2   :  { %v7488_v51 = vpop.f32.mrf.mxu1 }
0x11c3   :  { %7918 = vtanh.f32 %v6249_v55 }
0x11c4   :  { %v6251_v22 = vpop.f32.mrf.mxu1 }
0x11c5   :  { %v6252_v63 = vadd.f32 %v6728_v13, %v6251_v22 }
0x11c6   :  { %v7489_v44 = vpop.f32.mrf.mxu1 }
0x11c7   :  { %7920 = vtanh.f32 %v6252_v63 }
0x11d0   :  { %v7919_v0 = vpop.eup %7918 }
0x11d1   :  { %v6264_v52 = vmul.f32 %v7919_v0, %v6732_v26 }
0x11d3   :  { %v6266_v57 = vsel %vm1516_vm7, %v6264_v52, 0.0 }
0x11d4   :  { %v7921_v49 = vpop.eup %7920  ;;  %6267 = vadd.xlane.f32.xlu1 %v6266_v57 }
0x11d5   :  { %v6265_v35 = vmul.f32 %v7921_v49, %v6732_v26 }
0x11d7   :  { %v6269_v1 = vsel %vm1516_vm7, %v6265_v35, 0.0 }
0x11d8   :  { %6270 = vadd.xlane.f32.xlu0 %v6269_v1 }
0x125d   :  { %v6268_v40 = vpop.xlane.xlu1 %6267 }
0x125e   :  { %v6277_v2 = vrot.slane %v6268_v40, %v6276_v25 }
0x1261   :  { %v6271_v58 = vpop.xlane.xlu0 %6270 }
0x1262   :  { %v6281_v62 = vrot.slane %v6271_v58, %v6276_v25 }
0x1264   :  { %v6283_v50 = vsel %vm6282_vm15, %v6281_v62, %v6277_v2 }
0x1265   :  { %v6286_v31 = vsel %vm6285_vm0, %v6283_v50, -inf }
0x1266   :  { %6287 = vmax.xlane.f32.xlu0 %v6286_v31  ;;  %v6647_v31 = vld [vmem:[#allocation16] ss:$0 sm:$0xff] }
0x12ef   :  { %v6288_v38 = vpop.xlane.xlu0 %6287 }
0x12f0   :  { %v6293_v4 = vrot.slane %v6288_v38, %v10038_v29  ;;  %v6297_v19 = vrot.slane %v6288_v38, %v10039_v34 }
0x12f2   :  { %v6300_v33 = vsub.f32 %v6268_v40, %v6293_v4  ;;  %v6301_v45 = vsub.f32 %v6271_v58, %v6297_v19  ;;  %v6648_v4 = vld [vmem:[#allocation17] ss:$0 sm:$0xff] }
0x12f4   :  { %v6302_v56 = vmul.f32 1.442695, %v6300_v33  ;;  %v6304_v36 = vmul.f32 1.442695, %v6301_v45 }
0x12f6   :  { %7922 = vpow2.f32 %v6302_v56 }
0x12f7   :  { %7924 = vpow2.f32 %v6304_v36 }
0x1303   :  { %v7923_v43 = vpop.eup %7922 }
0x1304   :  { %v7925_v39 = vpop.eup %7924  ;;  %6309 = vperm.xlu1 %7619, %v7923_v43  }
0x1305   :  { %6312 = vperm.xlu0 %7573, %v7925_v39  }
0x1324   :  { %1976 = vadd.xlane.f32.xlu0 %v1975_v5 }
0x1328   :  { %1986 = vadd.xlane.f32.xlu0 %v1985_v9 }
0x137f   :  { %v6310_v42 = vpop.permute.xlu1 %6309 }
0x1380   :  { %v6313_v37 = vpop.permute.xlu0 %6312  ;;  %v6317_v14 = vrot.slane %v6310_v42, %v6276_v25 }
0x1381   :  { %v6321_v59 = vrot.slane %v6313_v37, %v6276_v25 }
0x1383   :  { %v6322_v10 = vsel %vm6282_vm15, %v6321_v59, %v6317_v14 }
0x1384   :  { %v6324_v6 = vsel %vm6285_vm0, %v6322_v10, 0.0 }
0x1385   :  { %6325 = vadd.xlane.f32.xlu1 %v6324_v6 }
0x1389   :  { %1973 = vadd.xlane.f32.xlu1 %v1972_v47 }
0x138d   :  { %1983 = vadd.xlane.f32.xlu1 %v1982_v23 }
0x13ad   :  { %v1977_v54 = vpop.xlane.xlu0 %1976 }
0x13ae   :  { %v1979_v11 = vmul.f32 0.015625, %v1977_v54 }
0x13b0   :  { %v1991_v51 = vmul.f32 %v1979_v11, %v1979_v11  ;;  %v1995_v25 = vsub.f32 %v1969_v8, %v1979_v11 }
0x13b1   :  { %v1987_v13 = vpop.xlane.xlu0 %1986 }
0x13b2   :  { %v1989_v55 = vmul.f32 0.015625, %v1987_v13 }
0x13b4   :  { %v1993_v22 = vsub.f32 %v1989_v55, %v1991_v51 }
0x13b6   :  { %v1997_v63 = vadd.f32 1e-05, %v1993_v22 }
0x13b8   :  { %7926 = vrsqrt.f32 %v1997_v63  ;;  %v6741_v63 = vld [vmem:[%s8504_s8] ss:$0 sm:$0xff] }
0x13c5   :  { %v7927_v1 = vpop.eup %7926 }
0x13c6   :  { %v2001_v2 = vmul.f32 %v7927_v1, %v1995_v25 }
0x13c8   :  { %v2009_v38 = vmul.f32 %v6647_v31, %v2001_v2 }
0x13ca   :  { %v2017_v19 = vadd.f32 %v6648_v4, %v2009_v38 }
0x13cc   :  { %v6376_v56 = vpack.c.bf16 %v2017_v19, %v2017_v19 }
0x140e   :  { %v6326_v44 = vpop.xlane.xlu1 %6325 }
0x140f   :  { %7928 = vrcp.f32 %v6326_v44 }
0x1412   :  { %v1974_v26 = vpop.xlane.xlu1 %1973 }
0x1413   :  { %v1978_v0 = vmul.f32 0.015625, %v1974_v26 }
0x1415   :  { %v1990_v57 = vmul.f32 %v1978_v0, %v1978_v0  ;;  %v1994_v33 = vsub.f32 %v1968_v61, %v1978_v0 }
0x1416   :  { %v1984_v52 = vpop.xlane.xlu1 %1983 }
0x1417   :  { %v1988_v49 = vmul.f32 0.015625, %v1984_v52 }
0x1419   :  { %v1992_v35 = vsub.f32 %v1988_v49, %v1990_v57 }
0x141b   :  { %v1996_v27 = vadd.f32 1e-05, %v1992_v35 }
0x141c   :  { %v7929_v3 = vpop.eup %7928 }
0x141d   :  { %7930 = vrsqrt.f32 %v1996_v27  ;;  %v6332_v40 = vrot.slane %v7929_v3, %v10038_v29  ;;  %v6336_v58 = vrot.slane %v7929_v3, %v10039_v34  ;;  %v6447_v29 = vunpack.c.l.b16 %v6376_v56 }
0x141f   :  { %v6339_v62 = vmul.f32 %v7923_v43, %v6332_v40  ;;  %v6340_v50 = vmul.f32 %v7925_v39, %v6336_v58  ;;  %v7741_v43 = vld [vmem:[%s8499_s5] sm:$0xff]   ;;  %v6448_v21 = vrot.slane %v6447_v29, 7  ;;  %s8355_s5 = smov [#allocation28]  }
0x1420   :  { %7493 = vmatpush3.bf16.msra.mxu0 %v7741_v43  ;;  %s6533_s13 = sshll.u32 %s8355_s5, 4  ;;  %s6534_s13 = int_to_ptr.vmem [resolvable:$true] %s6533_s13 }
0x1421   :  { %6343 = vperm.xlu0 %7573, %v6339_v62   ;;  %6348 = vperm.xlu1 %7619, %v6340_v50   ;;  %s8253_s21 = scalar_lea.vmem %s6534_s13, 32  ;;  %p8258_p11 = scmp.lt.s32.totalorder %s6534_s13, %s6534_s13 }
0x1422   :  { %p8254_p10 = scmp.ne.s32.totalorder %s6534_s13, %s8253_s21  ;;  %p8259_p12 = scmp.lt.s32.totalorder %s8253_s21, %s8253_s21 }
0x1424   :  { %p8260_p13 = por %p8259_p12, %p8258_p11 }
0x1426   :  { %p8261_p0 = pnand %p8260_p13, %p8254_p10 }
0x142a   :  { %v7931_v45 = vpop.eup %7930 }
0x142b   :  { %v2000_v36 = vmul.f32 %v7931_v45, %v1994_v33 }
0x142d   :  { %v2008_v17 = vmul.f32 %v6647_v31, %v2000_v36 }
0x142f   :  { %v2016_v12 = vadd.f32 %v6648_v4, %v2008_v17 }
0x1431   :  { %v6375_v34 = vpack.c.bf16 %v2016_v12, %v2016_v12 }
0x1433   :  { %v6446_v39 = vunpack.c.l.b16 %v6375_v34 }
0x1435   :  { %v6449_v7 = vsel %vm6282_vm15, %v6448_v21, %v6446_v39 }
0x1436   :  { %v6450_v15 = vpack.c.b16 %v6449_v7, %v6449_v7 }
0x1438   :  { %7507 = vmatmul.mubr.msk.bf16.vlgmr.msra.gmra.mxu1 %vm362_vm3, %v6450_v15 }
0x149c   :  { %v6344_v8 = vpop.permute.xlu0 %6343  ;;  %v6349_v5 = vpop.permute.xlu1 %6348 }
0x149d   :  { %v6351_v24 = vmul.f32 %v6344_v8, %v9901_v16  ;;  %v6352_v9 = vmul.f32 %v6349_v5, %v9903_v60 }
0x149f   :  { %v6353_v42 = vsel %vm1516_vm7, %v6351_v24, 0.0  ;;  %v6360_v37 = vsel %vm1516_vm7, %v6352_v9, 0.0 }
0x14a0   :  { %v6354_v32 = vrot.slane %v6353_v42, 4  ;;  %v6361_v14 = vrot.slane %v6360_v37, 4 }
0x14a2   :  { %v6355_v59 = vadd.f32 %v6354_v32, %v6353_v42  ;;  %v6362_v10 = vadd.f32 %v6361_v14, %v6360_v37 }
0x14a4   :  { %v6356_v53 = vrot.slane %v6355_v59, 2  ;;  %v6363_v18 = vrot.slane %v6362_v10, 2 }
0x14a6   :  { %v6357_v61 = vadd.f32 %v6356_v53, %v6355_v59  ;;  %v6364_v6 = vadd.f32 %v6363_v18, %v6362_v10 }
0x14a8   :  { %v6358_v47 = vrot.slane %v6357_v61, 1  ;;  %v6365_v48 = vrot.slane %v6364_v6, 1 }
0x14aa   :  { %v6359_v23 = vadd.f32 %v6358_v47, %v6357_v61  ;;  %v6366_v28 = vadd.f32 %v6365_v48, %v6364_v6 }
0x14ac   :  { %v6381_v16 = vpack.c.bf16 %v6359_v23, %v6359_v23  ;;  %v6382_v46 = vpack.c.bf16 %v6366_v28, %v6366_v28 }
0x14ae   :  { %v6385_v60 = vunpack.c.l.b16 %v6381_v16  ;;  %v6386_v20 = vunpack.c.l.b16 %v6382_v46 }
0x14b0   :  { %v6387_v30 = vsel %vm6282_vm15, %v6386_v20, %v6385_v60 }
0x14b1   :  { %v6388_v54 = vpack.c.b16 %v6387_v30, %v6387_v30 }
0x14b3   :  { %7495 = vmatmul.mubr.msk.bf16.vlgmr.msra.gmra.mxu0 %vm1516_vm7, %v6388_v54 }
0x14f8   :  { %v6512_v13 = vpop.f32.mrf.mxu1 }
0x14fa   :  { %v7508_v11 = vpop.f32.mrf.mxu1 }
0x14fc   :  { %v6515_v55 = vpop.f32.mrf.mxu1 }
0x14fe   :  { %v7509_v51 = vpop.f32.mrf.mxu1 }
0x1573   :  { %v6438_v22 = vpop.f32.mrf.mxu0 }
0x1574   :  { %v6513_v44 = vadd.f32 %v6512_v13, %v6438_v22 }
0x1575   :  { %v7496_v26 = vpop.f32.mrf.mxu0 }
0x1576   :  { %v6525_v0 = vadd.f32 %v6741_v63, %v6513_v44 }
0x1577   :  { %v6441_v52 = vpop.f32.mrf.mxu0 }
0x1578   :  { %6526 = vst [vmem:[#allocation28] sm:$0x3] %v6525_v0 }
0x1579   :  { %v7497_v57 = vpop.f32.mrf.mxu0 }
0x157a   :  { %8264 = shalt.err (!%p8261_p0)
}
0x157b   :  { %6536 = dma.vmem_to_hbm [thread:$0]  %s6534_s13, 32, %s8509_s29, [#allocation4]  }
0x157c   :  { %8291 = dma.done.wait [#allocation4], 32  }
0x157d   :  { %8292 = vsyncadd [#allocation4], 4294967264 }
0x157e   :  { %6540 = vsyncpa [#allocation3], 1 }
0x157f   :  { %6541 = vsyncpa [#allocation6], 1 }
0x1580   :  { %6542 = vsyncpa [#allocation9], 1 }
0x1581   :  { %6543 = vsyncpa [#allocation12], 1 }
0x1582   :  { %6544 = vsyncpa [#allocation15], 1 }
0x1583   :  { %6545 = vsyncpa [#allocation18], 1 }
0x1584   :  { %6546 = vsyncpa [#allocation21], 1 }
0x1585   :  { %6547 = vsyncpa [#allocation24], 1 }
0x1586   :  { %6548 = vsyncpa [#allocation27], 1 }
0x1587   :  { %6549 = vsyncpa [#allocation4], 1 }

</bundles_post_ra>
